<compile_context>
chip_gen: v7x
topology: tpu7x:2x2x1
jax: 0.10.0
libtpu: 0.0.40
codegen_flags: <defaults>
</compile_context>

<pallas_src>
import jax
import jax.numpy as jnp
from jax.experimental import pallas as pl
from jax.experimental.pallas import tpu as pltpu

EPS = 1e-5
MM_DTYPE = jnp.bfloat16   # MXU-operand / h1-intermediate dtype (accumulation f32)
ROW_TILE = 512            # row tile for the (N, C) passes 2/3


# ------------------------------- kernels ------------------------------------

def conv1_bn1stats_kernel(x_ref, w1_ref, h1_ref, st1_ref, col_ref, acc_ref):
    """Per image: h1 = conv3x3(relu(x)) (implicit GEMM, K=3C) + partial BN1 stats.

    x_ref   : (1, H, W, C) f32   unpadded NHWC image tile
    w1_ref  : (3, 3C, C)   bf16  ky-major, (kx, cin)-stacked weights
    h1_ref  : (H*W, C)     bf16  conv output (pre-BN)
    st1_ref : (1, 2, C)    f32   per-image (sum, sumsq) of the f32 accumulator
    col_ref : (H+2, W, 3C) bf16  kx-stacked, zero-padded im2col-over-W scratch
    acc_ref : (H*W, C)     f32   conv accumulator scratch
    """
    H, W, C = x_ref.shape[1], x_ref.shape[2], x_ref.shape[3]
    HW, KC = H * W, 3 * C

    # relu + single up-front bf16 cast (no per-tap re-cast; relu(0-pad) = 0).
    xr = jnp.maximum(x_ref[0], 0.0).astype(col_ref.dtype)          # (H, W, C)
    zc = jnp.zeros((H, 1, C), col_ref.dtype)

    # kx-stacked buffer: col[y, x, kx*C:(kx+1)*C] = relu(x)[y-1, x+kx-1, :]
    # (zero out of range -> implicit 1-px halo, no HBM-level jnp.pad).
    # Stores are full along W, lane slices are 128-aligned.
    col_ref[...] = jnp.zeros_like(col_ref)                          # halo rows
    col_ref[1:H + 1, :, 0:C]      = jnp.concatenate([zc, xr[:, :W - 1, :]], axis=1)
    col_ref[1:H + 1, :, C:2 * C]  = xr
    col_ref[1:H + 1, :, 2 * C:KC] = jnp.concatenate([xr[:, 1:, :], zc], axis=1)

    # 3x3 conv as 3 MXU matmuls with K = 3C, accumulated in a VMEM f32 scratch
    # (keeps the accumulator out of the vreg file; fills the 256-wide MXU).
    for ky in range(3):
        contrib = jnp.dot(col_ref[ky:ky + H].reshape(HW, KC), w1_ref[ky],
                          preferred_element_type=jnp.float32)
        if ky == 0:
            acc_ref[...] = contrib
        else:
            acc_ref[...] += contrib

    h1_ref[...] = acc_ref[...].astype(h1_ref.dtype)
    # Fused partial BN1 stats from the exact f32 accumulator (pre-bf16 store).
    st1_ref[0] = jnp.concatenate(
        [jnp.sum(acc_ref[...], axis=0, keepdims=True),
         jnp.sum(acc_ref[...] * acc_ref[...], axis=0, keepdims=True)], axis=0)


def bn1_conv2_stats_kernel(h1_ref, s1_ref, t1_ref, w2_ref, st2_ref):
    """Per row tile: partial BN2 stats of conv1x1(relu(bn1(h1))).  No h2 store."""
    h = jnp.maximum(h1_ref[...].astype(jnp.float32) * s1_ref[...] + t1_ref[...], 0.0)
    h2 = jnp.dot(h.astype(w2_ref.dtype), w2_ref[...],
                 preferred_element_type=jnp.float32)
    st2_ref[0] = jnp.concatenate(
        [jnp.sum(h2, axis=0, keepdims=True),
         jnp.sum(h2 * h2, axis=0, keepdims=True)], axis=0)


def bn1_conv2_bn2_residual_kernel(x_ref, h1_ref, s1_ref, t1_ref, w2_ref,
                                  s2_ref, t2_ref, o_ref):
    """Per row tile: out = x + bn2(conv1x1(relu(bn1(h1)))) (1x1 conv recomputed)."""
    h = jnp.maximum(h1_ref[...].astype(jnp.float32) * s1_ref[...] + t1_ref[...], 0.0)
    h2 = jnp.dot(h.astype(w2_ref.dtype), w2_ref[...],
                 preferred_element_type=jnp.float32)
    o_ref[...] = x_ref[...] + h2 * s2_ref[...] + t2_ref[...]


# ------------------------------- helpers ------------------------------------

def _row_tile(n, target):
    """Largest divisor of n that is a multiple of 8 and <= target (else n)."""
    if n <= target:
        return n
    for t in range(target, 7, -1):
        if t % 8 == 0 and n % t == 0:
            return t
    return n


def _bn_scale_shift(partial_stats, n, gamma, beta):
    """Fold per-tile (sum, sumsq) into BN scale/shift: y = h * scale + shift.

    Note: E[x^2] - E[x]^2 in f32 can lose precision vs two-pass/Welford when
    |mean| >> std; fine at ResBlock activation magnitudes.
    """
    s = jnp.sum(partial_stats, axis=0)                # (2, C)
    mu = s[0] / n
    var = jnp.maximum(s[1] / n - mu * mu, 0.0)        # biased var; clamp rounding
    scale = gamma * jax.lax.rsqrt(var + EPS)
    shift = beta - mu * scale
    return scale.reshape(1, -1), shift.reshape(1, -1)


# ------------------------------- wrapper ------------------------------------

@jax.jit
def resblock_forward(x_nchw, params):
    B, C, H, W = x_nchw.shape
    N, HW = B * H * W, H * W
    f32 = jnp.float32
    par = pltpu.CompilerParams(dimension_semantics=("parallel",))

    # Module contract is NCHW; one transpose in, one transpose out.
    x_nhwc = jnp.transpose(x_nchw, (0, 2, 3, 1)).astype(f32)      # C on lanes
    x_rows = x_nhwc.reshape(N, C)                                 # free view

    # torch (Cout,Cin,3,3) -> (ky, kx*Cin, Cout); (Cout,Cin,1,1) -> (Cin, Cout).
    # Conv biases are intentionally dropped: a per-channel constant added right
    # before training-mode BN is cancelled exactly by the mean subtraction.
    w1 = jnp.transpose(params["w1"], (2, 3, 1, 0)).reshape(3, 3 * C, C).astype(MM_DTYPE)
    w2 = params["w2"].reshape(C, C).T.astype(MM_DTYPE)

    # ---- pass 1: 3x3 conv (implicit GEMM, K=3C) + partial BN1 stats ---------
    h1, st1 = pl.pallas_call(
        conv1_bn1stats_kernel,
        out_shape=(jax.ShapeDtypeStruct((N, C), MM_DTYPE),
                   jax.ShapeDtypeStruct((B, 2, C), f32)),
        grid=(B,),
        in_specs=[pl.BlockSpec((1, H, W, C), lambda b: (b, 0, 0, 0)),
                  pl.BlockSpec((3, 3 * C, C), lambda b: (0, 0, 0))],
        out_specs=(pl.BlockSpec((HW, C), lambda b: (b, 0)),
                   pl.BlockSpec((1, 2, C), lambda b: (b, 0, 0))),
        scratch_shapes=[pltpu.VMEM((H + 2, W, 3 * C), MM_DTYPE),
                        pltpu.VMEM((HW, C), f32)],
        compiler_params=par,
        cost_estimate=pl.CostEstimate(
            flops=int(2 * N * 9 * C * C), transcendentals=0,
            bytes_accessed=int(4 * (N * C + 2 * B * C) + 2 * (N * C + w1.size))),
    )(x_nhwc, w1)

    scale1, shift1 = _bn_scale_shift(st1, N, params["g1"], params["be1"])

    # ---- pass 2: partial BN2 stats of conv1x1(relu(bn1(h1))), row-tiled -----
    TN = _row_tile(N, ROW_TILE)
    nt = N // TN
    st2 = pl.pallas_call(
        bn1_conv2_stats_kernel,
        out_shape=jax.ShapeDtypeStruct((nt, 2, C), f32),
        grid=(nt,),
        in_specs=[pl.BlockSpec((TN, C), lambda i: (i, 0)),
                  pl.BlockSpec((1, C), lambda i: (0, 0)),
                  pl.BlockSpec((1, C), lambda i: (0, 0)),
                  pl.BlockSpec((C, C), lambda i: (0, 0))],
        out_specs=pl.BlockSpec((1, 2, C), lambda i: (i, 0, 0)),
        compiler_params=par,
        cost_estimate=pl.CostEstimate(
            flops=int(2 * N * C * C), transcendentals=0,
            bytes_accessed=int(2 * N * C + 2 * C * C + 4 * (nt * 2 * C + 2 * C))),
    )(h1, scale1, shift1, w2)

    scale2, shift2 = _bn_scale_shift(st2, N, params["g2"], params["be2"])

    # ---- pass 3: out = x + bn2(conv1x1(relu(bn1(h1)))), residual aliased ----
    out_rows = pl.pallas_call(
        bn1_conv2_bn2_residual_kernel,
        out_shape=jax.ShapeDtypeStruct((N, C), f32),
        grid=(nt,),
        in_specs=[pl.BlockSpec((TN, C), lambda i: (i, 0)),
                  pl.BlockSpec((TN, C), lambda i: (i, 0)),
                  pl.BlockSpec((1, C), lambda i: (0, 0)),
                  pl.BlockSpec((1, C), lambda i: (0, 0)),
                  pl.BlockSpec((C, C), lambda i: (0, 0)),
                  pl.BlockSpec((1, C), lambda i: (0, 0)),
                  pl.BlockSpec((1, C), lambda i: (0, 0))],
        out_specs=pl.BlockSpec((TN, C), lambda i: (i, 0)),
        input_output_aliases={0: 0},          # skip path consumed only here
        compiler_params=par,
        cost_estimate=pl.CostEstimate(
            flops=int(2 * N * C * C + 3 * N * C), transcendentals=0,
            bytes_accessed=int(4 * 2 * N * C + 2 * N * C + 2 * C * C)),
    )(x_rows, h1, scale1, shift1, w2, scale2, shift2)

    return jnp.transpose(out_rows.reshape(B, H, W, C), (0, 3, 1, 2))   # NCHW


# ------------------------------ reference -----------------------------------

@jax.jit
def resblock_reference(x_nchw, params):
    """Pure-JAX f32 reference mirroring the PyTorch forward (training-mode BN)."""
    x = jnp.transpose(x_nchw, (0, 2, 3, 1)).astype(jnp.float32)
    xr = jax.nn.relu(x)

    def conv(h, w_torch, b):
        w_hwio = jnp.transpose(w_torch, (2, 3, 1, 0))
        return jax.lax.conv_general_dilated(
            h, w_hwio, window_strides=(1, 1), padding="SAME",
            dimension_numbers=("NHWC", "HWIO", "NHWC"),
            precision=jax.lax.Precision.HIGHEST) + b

    def bn(h, g, be):
        mu = jnp.mean(h, axis=(0, 1, 2), keepdims=True)
        var = jnp.mean((h - mu) ** 2, axis=(0, 1, 2), keepdims=True)
        return (h - mu) * jax.lax.rsqrt(var + EPS) * g + be

    h = jax.nn.relu(bn(conv(xr, params["w1"], params["b1"]), params["g1"], params["be1"]))
    h = bn(conv(h, params["w2"], params["b2"]), params["g2"], params["be2"])
    return jnp.transpose(x + h, (0, 3, 1, 2))


def init_params(key, dim):
    ks = jax.random.split(key, 8)
    return {
        "w1": 0.1 * jax.random.normal(ks[0], (dim, dim, 3, 3), jnp.float32),
        "b1": 0.1 * jax.random.normal(ks[1], (dim,), jnp.float32),
        "w2": 0.1 * jax.random.normal(ks[2], (dim, dim, 1, 1), jnp.float32),
        "b2": 0.1 * jax.random.normal(ks[3], (dim,), jnp.float32),
        "g1": 1.0 + 0.1 * jax.random.normal(ks[4], (dim,), jnp.float32),
        "be1": 0.1 * jax.random.normal(ks[5], (dim,), jnp.float32),
        "g2": 1.0 + 0.1 * jax.random.normal(ks[6], (dim,), jnp.float32),
        "be2": 0.1 * jax.random.normal(ks[7], (dim,), jnp.float32),
    }
    # TODO(synk): BatchNorm running-stat buffer updates (training-time side
    # effect) are not modeled; they do not affect the forward output.


if __name__ == "__main__":
    key = jax.random.PRNGKey(0)
    k_x, k_p = jax.random.split(key)

    # Small but lane-dense shapes (VQVAE ResBlock dims are typically >= 128).
    B, C, H, W = 2, 128, 16, 16
    x = jax.random.normal(k_x, (B, C, H, W), jnp.float32)
    params = init_params(k_p, C)

    out = jax.block_until_ready(resblock_forward(x, params))
    ref = jax.block_until_ready(resblock_reference(x, params))

    assert out.shape == (B, C, H, W)
    diff = out - ref
    err_max = float(jnp.max(jnp.abs(diff)))
    rel_rms = float(jnp.sqrt(jnp.mean(diff * diff)) / jnp.sqrt(jnp.mean(ref * ref)))
    # Tolerances cover the bf16 h1 intermediate + bf16 MXU operands vs the f32
    # reference (BN statistics themselves are computed in exact f32).
    assert err_max < 1.25e-1, err_max
    assert rel_rms < 2e-2, rel_rms

    print("KERNEL_OK")
</pallas_src>

<mosaic_0001>
module attributes {stable_mosaic.version = 11 : i64} {
  func.func @conv1_bn1stats_kernel(%arg0: i32, %arg1: memref<1x16x16x128xf32, #tpu.memory_space<vmem>>, %arg2: memref<3x384x128xbf16, #tpu.memory_space<vmem>>, %arg3: memref<256x128xbf16, #tpu.memory_space<vmem>>, %arg4: memref<1x2x128xf32, #tpu.memory_space<vmem>>, %arg5: memref<18x16x384xbf16, #tpu.memory_space<vmem>>, %arg6: memref<256x128xf32, #tpu.memory_space<vmem>>) attributes {dimension_semantics = [#tpu.dimension_semantics<parallel>], iteration_bounds = array<i64: 2>, scalar_prefetch = 0 : i64, scratch_operands = 2 : i64, tpu.core_type = #tpu.core_type<tc>, window_params = [{transform_indices = @transform_0, window_bounds = array<i64: 1, 16, 16, 128>}, {pipeline_mode = #tpu.pipeline_mode<synchronous>, transform_indices = @transform_1, window_bounds = array<i64: 3, 384, 128>}, {transform_indices = @transform_2, window_bounds = array<i64: 256, 128>}, {transform_indices = @transform_3, window_bounds = array<i64: 1, 2, 128>}]} {
    %c0 = arith.constant 0 : index
    %c0_0 = arith.constant 0 : index
    %c0_1 = arith.constant 0 : index
    %c0_2 = arith.constant 0 : index
    %0 = vector.load %arg1[%c0, %c0_0, %c0_1, %c0_2] : memref<1x16x16x128xf32, #tpu.memory_space<vmem>>, vector<1x16x16x128xf32>
    %1 = vector.shape_cast %0 : vector<1x16x16x128xf32> to vector<16x16x128xf32>
    %cst = arith.constant 0.000000e+00 : f32
    %2 = vector.broadcast %cst : f32 to vector<16x16x128xf32>
    %3 = arith.maximumf %1, %2 : vector<16x16x128xf32>
    %4 = arith.truncf %3 : vector<16x16x128xf32> to vector<16x16x128xbf16>
    %cst_3 = arith.constant 0.000000e+00 : bf16
    %5 = vector.broadcast %cst_3 : bf16 to vector<16x1x128xbf16>
    %cst_4 = arith.constant 0.000000e+00 : bf16
    %6 = vector.broadcast %cst_4 : bf16 to vector<18x16x384xbf16>
    %c0_5 = arith.constant 0 : index
    %c0_6 = arith.constant 0 : index
    %c0_7 = arith.constant 0 : index
    %7 = vector.load %arg5[%c0_5, %c0_6, %c0_7] : memref<18x16x384xbf16, #tpu.memory_space<vmem>>, vector<18x16x384xbf16>
    tpu.vector_store %arg5[%c0_5, %c0_6, %c0_7], %6 {strides = array<i32>} : memref<18x16x384xbf16, #tpu.memory_space<vmem>>, vector<18x16x384xbf16>,
    %8 = vector.extract_strided_slice %4 {offsets = [0, 0, 0], sizes = [16, 15, 128], strides = [1, 1, 1]} : vector<16x16x128xbf16> to vector<16x15x128xbf16>
    %9 = tpu.concatenate %5, %8 in 1 : vector<16x1x128xbf16>, vector<16x15x128xbf16> -> vector<16x16x128xbf16>
    %c1 = arith.constant 1 : index
    %c0_8 = arith.constant 0 : index
    %c0_9 = arith.constant 0 : index
    %10 = vector.load %arg5[%c1, %c0_8, %c0_9] : memref<18x16x384xbf16, #tpu.memory_space<vmem>>, vector<16x16x128xbf16>
    tpu.vector_store %arg5[%c1, %c0_8, %c0_9], %9 {strides = array<i32>} : memref<18x16x384xbf16, #tpu.memory_space<vmem>>, vector<16x16x128xbf16>,
    %c1_10 = arith.constant 1 : index
    %c0_11 = arith.constant 0 : index
    %c128 = arith.constant 128 : index
    %11 = vector.load %arg5[%c1_10, %c0_11, %c128] : memref<18x16x384xbf16, #tpu.memory_space<vmem>>, vector<16x16x128xbf16>
    tpu.vector_store %arg5[%c1_10, %c0_11, %c128], %4 {strides = array<i32>} : memref<18x16x384xbf16, #tpu.memory_space<vmem>>, vector<16x16x128xbf16>,
    %12 = vector.extract_strided_slice %4 {offsets = [0, 1, 0], sizes = [16, 15, 128], strides = [1, 1, 1]} : vector<16x16x128xbf16> to vector<16x15x128xbf16>
    %13 = tpu.concatenate %12, %5 in 1 : vector<16x15x128xbf16>, vector<16x1x128xbf16> -> vector<16x16x128xbf16>
    %c1_12 = arith.constant 1 : index
    %c0_13 = arith.constant 0 : index
    %c256 = arith.constant 256 : index
    %14 = vector.load %arg5[%c1_12, %c0_13, %c256] : memref<18x16x384xbf16, #tpu.memory_space<vmem>>, vector<16x16x128xbf16>
    tpu.vector_store %arg5[%c1_12, %c0_13, %c256], %13 {strides = array<i32>} : memref<18x16x384xbf16, #tpu.memory_space<vmem>>, vector<16x16x128xbf16>,
    %c0_14 = arith.constant 0 : index
    %c0_15 = arith.constant 0 : index
    %c0_16 = arith.constant 0 : index
    %15 = vector.load %arg5[%c0_14, %c0_15, %c0_16] : memref<18x16x384xbf16, #tpu.memory_space<vmem>>, vector<16x16x384xbf16>
    %16 = vector.shape_cast %15 : vector<16x16x384xbf16> to vector<256x384xbf16>
    %c0_17 = arith.constant 0 : index
    %c0_18 = arith.constant 0 : index
    %c0_19 = arith.constant 0 : index
    %17 = vector.load %arg2[%c0_17, %c0_18, %c0_19] : memref<3x384x128xbf16, #tpu.memory_space<vmem>>, vector<1x384x128xbf16>
    %18 = vector.shape_cast %17 : vector<1x384x128xbf16> to vector<384x128xbf16>
    %cst_20 = arith.constant dense<0.000000e+00> : vector<256x128xf32>
    %19 = tpu.matmul %16, %18, %cst_20 {dimension_numbers = #tpu.dot_dimension_numbers<[1], [0], [0], [1], [0, 0, 1, 1], [], []>} : vector<256x384xbf16>, vector<384x128xbf16>, vector<256x128xf32> -> vector<256x128xf32>
    %c0_21 = arith.constant 0 : index
    %c0_22 = arith.constant 0 : index
    %20 = vector.load %arg6[%c0_21, %c0_22] : memref<256x128xf32, #tpu.memory_space<vmem>>, vector<256x128xf32>
    tpu.vector_store %arg6[%c0_21, %c0_22], %19 {strides = array<i32>} : memref<256x128xf32, #tpu.memory_space<vmem>>, vector<256x128xf32>,
    %c1_23 = arith.constant 1 : index
    %c0_24 = arith.constant 0 : index
    %c0_25 = arith.constant 0 : index
    %21 = vector.load %arg5[%c1_23, %c0_24, %c0_25] : memref<18x16x384xbf16, #tpu.memory_space<vmem>>, vector<16x16x384xbf16>
    %22 = vector.shape_cast %21 : vector<16x16x384xbf16> to vector<256x384xbf16>
    %c1_26 = arith.constant 1 : index
    %c0_27 = arith.constant 0 : index
    %c0_28 = arith.constant 0 : index
    %23 = vector.load %arg2[%c1_26, %c0_27, %c0_28] : memref<3x384x128xbf16, #tpu.memory_space<vmem>>, vector<1x384x128xbf16>
    %24 = vector.shape_cast %23 : vector<1x384x128xbf16> to vector<384x128xbf16>
    %cst_29 = arith.constant dense<0.000000e+00> : vector<256x128xf32>
    %25 = tpu.matmul %22, %24, %cst_29 {dimension_numbers = #tpu.dot_dimension_numbers<[1], [0], [0], [1], [0, 0, 1, 1], [], []>} : vector<256x384xbf16>, vector<384x128xbf16>, vector<256x128xf32> -> vector<256x128xf32>
    %c0_30 = arith.constant 0 : index
    %c0_31 = arith.constant 0 : index
    %26 = vector.load %arg6[%c0_30, %c0_31] : memref<256x128xf32, #tpu.memory_space<vmem>>, vector<256x128xf32>
    %27 = arith.addf %26, %25 : vector<256x128xf32>
    %c0_32 = arith.constant 0 : index
    %c0_33 = arith.constant 0 : index
    %28 = vector.load %arg6[%c0_32, %c0_33] : memref<256x128xf32, #tpu.memory_space<vmem>>, vector<256x128xf32>
    tpu.vector_store %arg6[%c0_32, %c0_33], %27 {strides = array<i32>} : memref<256x128xf32, #tpu.memory_space<vmem>>, vector<256x128xf32>,
    %c2 = arith.constant 2 : index
    %c0_34 = arith.constant 0 : index
    %c0_35 = arith.constant 0 : index
    %29 = vector.load %arg5[%c2, %c0_34, %c0_35] : memref<18x16x384xbf16, #tpu.memory_space<vmem>>, vector<16x16x384xbf16>
    %30 = vector.shape_cast %29 : vector<16x16x384xbf16> to vector<256x384xbf16>
    %c2_36 = arith.constant 2 : index
    %c0_37 = arith.constant 0 : index
    %c0_38 = arith.constant 0 : index
    %31 = vector.load %arg2[%c2_36, %c0_37, %c0_38] : memref<3x384x128xbf16, #tpu.memory_space<vmem>>, vector<1x384x128xbf16>
    %32 = vector.shape_cast %31 : vector<1x384x128xbf16> to vector<384x128xbf16>
    %cst_39 = arith.constant dense<0.000000e+00> : vector<256x128xf32>
    %33 = tpu.matmul %30, %32, %cst_39 {dimension_numbers = #tpu.dot_dimension_numbers<[1], [0], [0], [1], [0, 0, 1, 1], [], []>} : vector<256x384xbf16>, vector<384x128xbf16>, vector<256x128xf32> -> vector<256x128xf32>
    %c0_40 = arith.constant 0 : index
    %c0_41 = arith.constant 0 : index
    %34 = vector.load %arg6[%c0_40, %c0_41] : memref<256x128xf32, #tpu.memory_space<vmem>>, vector<256x128xf32>
    %35 = arith.addf %34, %33 : vector<256x128xf32>
    %c0_42 = arith.constant 0 : index
    %c0_43 = arith.constant 0 : index
    %36 = vector.load %arg6[%c0_42, %c0_43] : memref<256x128xf32, #tpu.memory_space<vmem>>, vector<256x128xf32>
    tpu.vector_store %arg6[%c0_42, %c0_43], %35 {strides = array<i32>} : memref<256x128xf32, #tpu.memory_space<vmem>>, vector<256x128xf32>,
    %c0_44 = arith.constant 0 : index
    %c0_45 = arith.constant 0 : index
    %37 = vector.load %arg6[%c0_44, %c0_45] : memref<256x128xf32, #tpu.memory_space<vmem>>, vector<256x128xf32>
    %38 = arith.truncf %37 : vector<256x128xf32> to vector<256x128xbf16>
    %c0_46 = arith.constant 0 : index
    %c0_47 = arith.constant 0 : index
    %39 = vector.load %arg3[%c0_46, %c0_47] : memref<256x128xbf16, #tpu.memory_space<vmem>>, vector<256x128xbf16>
    tpu.vector_store %arg3[%c0_46, %c0_47], %38 {strides = array<i32>} : memref<256x128xbf16, #tpu.memory_space<vmem>>, vector<256x128xbf16>,
    %c0_48 = arith.constant 0 : index
    %c0_49 = arith.constant 0 : index
    %40 = vector.load %arg6[%c0_48, %c0_49] : memref<256x128xf32, #tpu.memory_space<vmem>>, vector<256x128xf32>
    %cst_50 = arith.constant dense<0.000000e+00> : vector<128xf32>
    %41 = vector.multi_reduction <add>, %40, %cst_50 [0] : vector<256x128xf32> to vector<128xf32>
    %42 = vector.shape_cast %41 : vector<128xf32> to vector<1x128xf32>
    %c0_51 = arith.constant 0 : index
    %c0_52 = arith.constant 0 : index
    %43 = vector.load %arg6[%c0_51, %c0_52] : memref<256x128xf32, #tpu.memory_space<vmem>>, vector<256x128xf32>
    %c0_53 = arith.constant 0 : index
    %c0_54 = arith.constant 0 : index
    %44 = vector.load %arg6[%c0_53, %c0_54] : memref<256x128xf32, #tpu.memory_space<vmem>>, vector<256x128xf32>
    %45 = arith.mulf %43, %44 : vector<256x128xf32>
    %cst_55 = arith.constant dense<0.000000e+00> : vector<128xf32>
    %46 = vector.multi_reduction <add>, %45, %cst_55 [0] : vector<256x128xf32> to vector<128xf32>
    %47 = vector.shape_cast %46 : vector<128xf32> to vector<1x128xf32>
    %48 = tpu.concatenate %42, %47 in 0 : vector<1x128xf32>, vector<1x128xf32> -> vector<2x128xf32>
    %c0_56 = arith.constant 0 : index
    %c0_57 = arith.constant 0 : index
    %c0_58 = arith.constant 0 : index
    %49 = vector.load %arg4[%c0_56, %c0_57, %c0_58] : memref<1x2x128xf32, #tpu.memory_space<vmem>>, vector<1x2x128xf32>
    %50 = vector.shape_cast %49 : vector<1x2x128xf32> to vector<2x128xf32>
    %51 = vector.shape_cast %48 : vector<2x128xf32> to vector<1x2x128xf32>
    tpu.vector_store %arg4[%c0_56, %c0_57, %c0_58], %51 {strides = array<i32>} : memref<1x2x128xf32, #tpu.memory_space<vmem>>, vector<1x2x128xf32>,
    return
  }
  func.func @transform_0(%arg0: i32) -> (i32, i32, i32, i32) {
    %c0_i32 = arith.constant 0 : i32
    %c0_i32_0 = arith.constant 0 : i32
    %c0_i32_1 = arith.constant 0 : i32
    %c0_i32_2 = arith.constant 0 : i32
    return %arg0, %c0_i32, %c0_i32_0, %c0_i32_1 : i32, i32, i32, i32
  }
  func.func @transform_1(%arg0: i32) -> (i32, i32, i32) {
    %c0_i32 = arith.constant 0 : i32
    %c0_i32_0 = arith.constant 0 : i32
    %c0_i32_1 = arith.constant 0 : i32
    %c0_i32_2 = arith.constant 0 : i32
    return %c0_i32, %c0_i32_0, %c0_i32_1 : i32, i32, i32
  }
  func.func @transform_2(%arg0: i32) -> (i32, i32) {
    %c0_i32 = arith.constant 0 : i32
    %c0_i32_0 = arith.constant 0 : i32
    return %arg0, %c0_i32 : i32, i32
  }
  func.func @transform_3(%arg0: i32) -> (i32, i32, i32) {
    %c0_i32 = arith.constant 0 : i32
    %c0_i32_0 = arith.constant 0 : i32
    %c0_i32_1 = arith.constant 0 : i32
    return %arg0, %c0_i32, %c0_i32_0 : i32, i32, i32
  }
}

module attributes {stable_mosaic.version = 11 : i64} {
  func.func @bn1_conv2_bn2_residual_kernel(%arg0: i32, %arg1: memref<512x128xf32, #tpu.memory_space<vmem>>, %arg2: memref<512x128xbf16, #tpu.memory_space<vmem>>, %arg3: memref<1x128xf32, #tpu.memory_space<vmem>>, %arg4: memref<1x128xf32, #tpu.memory_space<vmem>>, %arg5: memref<128x128xbf16, #tpu.memory_space<vmem>>, %arg6: memref<1x128xf32, #tpu.memory_space<vmem>>, %arg7: memref<1x128xf32, #tpu.memory_space<vmem>>, %arg8: memref<512x128xf32, #tpu.memory_space<vmem>>) attributes {dimension_semantics = [#tpu.dimension_semantics<parallel>], iteration_bounds = array<i64: 1>, scalar_prefetch = 0 : i64, scratch_operands = 0 : i64, tpu.core_type = #tpu.core_type<tc>, window_params = [{transform_indices = @transform_0, window_bounds = array<i64: 512, 128>}, {transform_indices = @transform_1, window_bounds = array<i64: 512, 128>}, {pipeline_mode = #tpu.pipeline_mode<synchronous>, transform_indices = @transform_2, window_bounds = array<i64: 1, 128>}, {pipeline_mode = #tpu.pipeline_mode<synchronous>, transform_indices = @transform_3, window_bounds = array<i64: 1, 128>}, {pipeline_mode = #tpu.pipeline_mode<synchronous>, transform_indices = @transform_4, window_bounds = array<i64: 128, 128>}, {pipeline_mode = #tpu.pipeline_mode<synchronous>, transform_indices = @transform_5, window_bounds = array<i64: 1, 128>}, {pipeline_mode = #tpu.pipeline_mode<synchronous>, transform_indices = @transform_6, window_bounds = array<i64: 1, 128>}, {transform_indices = @transform_7, window_bounds = array<i64: 512, 128>}]} {
    %c0 = arith.constant 0 : index
    %c0_0 = arith.constant 0 : index
    %0 = vector.load %arg2[%c0, %c0_0] : memref<512x128xbf16, #tpu.memory_space<vmem>>, vector<512x128xbf16>
    %1 = arith.extf %0 : vector<512x128xbf16> to vector<512x128xf32>
    %c0_1 = arith.constant 0 : index
    %c0_2 = arith.constant 0 : index
    %2 = vector.load %arg3[%c0_1, %c0_2] : memref<1x128xf32, #tpu.memory_space<vmem>>, vector<1x128xf32>
    %3 = vector.broadcast %2 : vector<1x128xf32> to vector<512x128xf32>
    %4 = arith.mulf %1, %3 : vector<512x128xf32>
    %c0_3 = arith.constant 0 : index
    %c0_4 = arith.constant 0 : index
    %5 = vector.load %arg4[%c0_3, %c0_4] : memref<1x128xf32, #tpu.memory_space<vmem>>, vector<1x128xf32>
    %6 = vector.broadcast %5 : vector<1x128xf32> to vector<512x128xf32>
    %7 = arith.addf %4, %6 : vector<512x128xf32>
    %cst = arith.constant 0.000000e+00 : f32
    %8 = vector.broadcast %cst : f32 to vector<512x128xf32>
    %9 = arith.maximumf %7, %8 : vector<512x128xf32>
    %10 = arith.truncf %9 : vector<512x128xf32> to vector<512x128xbf16>
    %c0_5 = arith.constant 0 : index
    %c0_6 = arith.constant 0 : index
    %11 = vector.load %arg5[%c0_5, %c0_6] : memref<128x128xbf16, #tpu.memory_space<vmem>>, vector<128x128xbf16>
    %cst_7 = arith.constant dense<0.000000e+00> : vector<512x128xf32>
    %12 = tpu.matmul %10, %11, %cst_7 {dimension_numbers = #tpu.dot_dimension_numbers<[1], [0], [0], [1], [0, 0, 1, 1], [], []>} : vector<512x128xbf16>, vector<128x128xbf16>, vector<512x128xf32> -> vector<512x128xf32>
    %c0_8 = arith.constant 0 : index
    %c0_9 = arith.constant 0 : index
    %13 = vector.load %arg1[%c0_8, %c0_9] : memref<512x128xf32, #tpu.memory_space<vmem>>, vector<512x128xf32>
    %c0_10 = arith.constant 0 : index
    %c0_11 = arith.constant 0 : index
    %14 = vector.load %arg6[%c0_10, %c0_11] : memref<1x128xf32, #tpu.memory_space<vmem>>, vector<1x128xf32>
    %15 = vector.broadcast %14 : vector<1x128xf32> to vector<512x128xf32>
    %16 = arith.mulf %12, %15 : vector<512x128xf32>
    %17 = arith.addf %13, %16 : vector<512x128xf32>
    %c0_12 = arith.constant 0 : index
    %c0_13 = arith.constant 0 : index
    %18 = vector.load %arg7[%c0_12, %c0_13] : memref<1x128xf32, #tpu.memory_space<vmem>>, vector<1x128xf32>
    %19 = vector.broadcast %18 : vector<1x128xf32> to vector<512x128xf32>
    %20 = arith.addf %17, %19 : vector<512x128xf32>
    %c0_14 = arith.constant 0 : index
    %c0_15 = arith.constant 0 : index
    %21 = vector.load %arg8[%c0_14, %c0_15] : memref<512x128xf32, #tpu.memory_space<vmem>>, vector<512x128xf32>
    tpu.vector_store %arg8[%c0_14, %c0_15], %20 {strides = array<i32>} : memref<512x128xf32, #tpu.memory_space<vmem>>, vector<512x128xf32>,
    return
  }
  func.func @transform_0(%arg0: i32) -> (i32, i32) {
    %c0_i32 = arith.constant 0 : i32
    %c0_i32_0 = arith.constant 0 : i32
    return %arg0, %c0_i32 : i32, i32
  }
  func.func @transform_1(%arg0: i32) -> (i32, i32) {
    %c0_i32 = arith.constant 0 : i32
    %c0_i32_0 = arith.constant 0 : i32
    return %arg0, %c0_i32 : i32, i32
  }
  func.func @transform_2(%arg0: i32) -> (i32, i32) {
    %c0_i32 = arith.constant 0 : i32
    %c0_i32_0 = arith.constant 0 : i32
    %c0_i32_1 = arith.constant 0 : i32
    return %c0_i32, %c0_i32_0 : i32, i32
  }
  func.func @transform_3(%arg0: i32) -> (i32, i32) {
    %c0_i32 = arith.constant 0 : i32
    %c0_i32_0 = arith.constant 0 : i32
    %c0_i32_1 = arith.constant 0 : i32
    return %c0_i32, %c0_i32_0 : i32, i32
  }
  func.func @transform_4(%arg0: i32) -> (i32, i32) {
    %c0_i32 = arith.constant 0 : i32
    %c0_i32_0 = arith.constant 0 : i32
    %c0_i32_1 = arith.constant 0 : i32
    return %c0_i32, %c0_i32_0 : i32, i32
  }
  func.func @transform_5(%arg0: i32) -> (i32, i32) {
    %c0_i32 = arith.constant 0 : i32
    %c0_i32_0 = arith.constant 0 : i32
    %c0_i32_1 = arith.constant 0 : i32
    return %c0_i32, %c0_i32_0 : i32, i32
  }
  func.func @transform_6(%arg0: i32) -> (i32, i32) {
    %c0_i32 = arith.constant 0 : i32
    %c0_i32_0 = arith.constant 0 : i32
    %c0_i32_1 = arith.constant 0 : i32
    return %c0_i32, %c0_i32_0 : i32, i32
  }
  func.func @transform_7(%arg0: i32) -> (i32, i32) {
    %c0_i32 = arith.constant 0 : i32
    %c0_i32_0 = arith.constant 0 : i32
    return %arg0, %c0_i32 : i32, i32
  }
}

module attributes {stable_mosaic.version = 11 : i64} {
  func.func @bn1_conv2_stats_kernel(%arg0: i32, %arg1: memref<512x128xbf16, #tpu.memory_space<vmem>>, %arg2: memref<1x128xf32, #tpu.memory_space<vmem>>, %arg3: memref<1x128xf32, #tpu.memory_space<vmem>>, %arg4: memref<128x128xbf16, #tpu.memory_space<vmem>>, %arg5: memref<1x2x128xf32, #tpu.memory_space<vmem>>) attributes {dimension_semantics = [#tpu.dimension_semantics<parallel>], iteration_bounds = array<i64: 1>, scalar_prefetch = 0 : i64, scratch_operands = 0 : i64, tpu.core_type = #tpu.core_type<tc>, window_params = [{transform_indices = @transform_0, window_bounds = array<i64: 512, 128>}, {pipeline_mode = #tpu.pipeline_mode<synchronous>, transform_indices = @transform_1, window_bounds = array<i64: 1, 128>}, {pipeline_mode = #tpu.pipeline_mode<synchronous>, transform_indices = @transform_2, window_bounds = array<i64: 1, 128>}, {pipeline_mode = #tpu.pipeline_mode<synchronous>, transform_indices = @transform_3, window_bounds = array<i64: 128, 128>}, {transform_indices = @transform_4, window_bounds = array<i64: 1, 2, 128>}]} {
    %c0 = arith.constant 0 : index
    %c0_0 = arith.constant 0 : index
    %0 = vector.load %arg1[%c0, %c0_0] : memref<512x128xbf16, #tpu.memory_space<vmem>>, vector<512x128xbf16>
    %1 = arith.extf %0 : vector<512x128xbf16> to vector<512x128xf32>
    %c0_1 = arith.constant 0 : index
    %c0_2 = arith.constant 0 : index
    %2 = vector.load %arg2[%c0_1, %c0_2] : memref<1x128xf32, #tpu.memory_space<vmem>>, vector<1x128xf32>
    %3 = vector.broadcast %2 : vector<1x128xf32> to vector<512x128xf32>
    %4 = arith.mulf %1, %3 : vector<512x128xf32>
    %c0_3 = arith.constant 0 : index
    %c0_4 = arith.constant 0 : index
    %5 = vector.load %arg3[%c0_3, %c0_4] : memref<1x128xf32, #tpu.memory_space<vmem>>, vector<1x128xf32>
    %6 = vector.broadcast %5 : vector<1x128xf32> to vector<512x128xf32>
    %7 = arith.addf %4, %6 : vector<512x128xf32>
    %cst = arith.constant 0.000000e+00 : f32
    %8 = vector.broadcast %cst : f32 to vector<512x128xf32>
    %9 = arith.maximumf %7, %8 : vector<512x128xf32>
    %10 = arith.truncf %9 : vector<512x128xf32> to vector<512x128xbf16>
    %c0_5 = arith.constant 0 : index
    %c0_6 = arith.constant 0 : index
    %11 = vector.load %arg4[%c0_5, %c0_6] : memref<128x128xbf16, #tpu.memory_space<vmem>>, vector<128x128xbf16>
    %cst_7 = arith.constant dense<0.000000e+00> : vector<512x128xf32>
    %12 = tpu.matmul %10, %11, %cst_7 {dimension_numbers = #tpu.dot_dimension_numbers<[1], [0], [0], [1], [0, 0, 1, 1], [], []>} : vector<512x128xbf16>, vector<128x128xbf16>, vector<512x128xf32> -> vector<512x128xf32>
    %cst_8 = arith.constant dense<0.000000e+00> : vector<128xf32>
    %13 = vector.multi_reduction <add>, %12, %cst_8 [0] : vector<512x128xf32> to vector<128xf32>
    %14 = vector.shape_cast %13 : vector<128xf32> to vector<1x128xf32>
    %15 = arith.mulf %12, %12 : vector<512x128xf32>
    %cst_9 = arith.constant dense<0.000000e+00> : vector<128xf32>
    %16 = vector.multi_reduction <add>, %15, %cst_9 [0] : vector<512x128xf32> to vector<128xf32>
    %17 = vector.shape_cast %16 : vector<128xf32> to vector<1x128xf32>
    %18 = tpu.concatenate %14, %17 in 0 : vector<1x128xf32>, vector<1x128xf32> -> vector<2x128xf32>
    %c0_10 = arith.constant 0 : index
    %c0_11 = arith.constant 0 : index
    %c0_12 = arith.constant 0 : index
    %19 = vector.load %arg5[%c0_10, %c0_11, %c0_12] : memref<1x2x128xf32, #tpu.memory_space<vmem>>, vector<1x2x128xf32>
    %20 = vector.shape_cast %19 : vector<1x2x128xf32> to vector<2x128xf32>
    %21 = vector.shape_cast %18 : vector<2x128xf32> to vector<1x2x128xf32>
    tpu.vector_store %arg5[%c0_10, %c0_11, %c0_12], %21 {strides = array<i32>} : memref<1x2x128xf32, #tpu.memory_space<vmem>>, vector<1x2x128xf32>,
    return
  }
  func.func @transform_0(%arg0: i32) -> (i32, i32) {
    %c0_i32 = arith.constant 0 : i32
    %c0_i32_0 = arith.constant 0 : i32
    return %arg0, %c0_i32 : i32, i32
  }
  func.func @transform_1(%arg0: i32) -> (i32, i32) {
    %c0_i32 = arith.constant 0 : i32
    %c0_i32_0 = arith.constant 0 : i32
    %c0_i32_1 = arith.constant 0 : i32
    return %c0_i32, %c0_i32_0 : i32, i32
  }
  func.func @transform_2(%arg0: i32) -> (i32, i32) {
    %c0_i32 = arith.constant 0 : i32
    %c0_i32_0 = arith.constant 0 : i32
    %c0_i32_1 = arith.constant 0 : i32
    return %c0_i32, %c0_i32_0 : i32, i32
  }
  func.func @transform_3(%arg0: i32) -> (i32, i32) {
    %c0_i32 = arith.constant 0 : i32
    %c0_i32_0 = arith.constant 0 : i32
    %c0_i32_1 = arith.constant 0 : i32
    return %c0_i32, %c0_i32_0 : i32, i32
  }
  func.func @transform_4(%arg0: i32) -> (i32, i32, i32) {
    %c0_i32 = arith.constant 0 : i32
    %c0_i32_0 = arith.constant 0 : i32
    %c0_i32_1 = arith.constant 0 : i32
    return %arg0, %c0_i32, %c0_i32_0 : i32, i32, i32
  }
}

</mosaic_0001>

<bundles_post_ra>
// kernel: resblock_forward.5
= control target key start
LH: loop header
LB: loop body
LE: loop exit
PB: predicated region body
PF: predicated region fallthrough
CT: control target
= control target key end

     0   :  { %s2228_s4 = inlined_call_operand.vmem [shape: bf16[128,128], index: 4, kind: input, shape index: {}]   ;;  %s2229_s1 = inlined_call_operand.vmem [shape: bf16[512,128], index: 1, kind: input, shape index: {}]   ;;  %s2230_s2 = inlined_call_operand.vmem [shape: f32[1,128], index: 2, kind: input, shape index: {}]   ;;  %s2231_s3 = inlined_call_operand.vmem [shape: f32[1,128], index: 3, kind: input, shape index: {}]   ;;  %s2232_s5 = inlined_call_operand.vmem [shape: f32[1,128], index: 5, kind: input, shape index: {}]   ;;  %s2233_s0 = inlined_call_operand.vmem [shape: f32[512,128], index: 0, kind: input, shape index: {}, may-alias: {0,7}]   ;;  %s2234_s6 = inlined_call_operand.vmem [shape: f32[1,128], index: 6, kind: input, shape index: {}]   ;;  %s2235_s7 = inlined_call_operand.vmem [shape: f32[512,128], index: 7, kind: output, shape index: {}, may-alias: {0,7}]  }
   0x1   :  { %v1391_v0 = vld [vmem:[%s2228_s4] sm:$0xff]   ;;  %v1392_v1 = vld [vmem:[%s2228_s4 + $0x8] sm:$0xff]   ;;  %v1393_v2 = vld [vmem:[%s2228_s4 + $0x10] sm:$0xff]  }
   0x2   :  { %1295 = vmatprep.subr.bf16.mxu0 %v1391_v0  ;;  %1375 = vmatprep.subr.bf16.mxu1 %v1391_v0  ;;  %v1394_v3 = vld [vmem:[%s2228_s4 + $0x18] sm:$0xff]   ;;  %v1097_v4 = vld [vmem:[%s2229_s1] sm:$0xff]   ;;  %v1224_v9 = vld [vmem:[%s2229_s1 + $0x8] sm:$0xff]  }
   0x3   :  { %1296 = vmatpush3.bf16.msra.mxu0 %v1391_v0  ;;  %1383 = vmatpush3.bf16.msra.mxu1 %v1391_v0  ;;  %v1457_v5 = vld [vmem:[%s2230_s2] ss:$0 sm:$0xff]  ;;  %v1098_v6 = vunpack.c.l.bf16 %v1097_v4  ;;  %v1099_v7 = vunpack.c.h.bf16 %v1097_v4  ;;  %v1240_v10 = vld [vmem:[%s2229_s1 + $0x88] sm:$0xff]   ;;  %v1102_v14 = vunpack.c.l.bf16 %v1224_v9  ;;  %v1103_v15 = vunpack.c.h.bf16 %v1224_v9  ;;  %v1225_v16 = vld [vmem:[%s2229_s1 + $0x10] sm:$0xff]  }
   0x4   :  { %1297 = vmatprep.subr.bf16.mxu0 %v1392_v1  ;;  %1376 = vmatprep.subr.bf16.mxu1 %v1392_v1  ;;  %v1239_v8 = vld [vmem:[%s2229_s1 + $0x80] sm:$0xff]   ;;  %v1166_v19 = vunpack.c.l.bf16 %v1240_v10  ;;  %v1167_v20 = vunpack.c.h.bf16 %v1240_v10  ;;  %v1106_v25 = vunpack.c.l.bf16 %v1225_v16  ;;  %v1241_v38 = vld [vmem:[%s2229_s1 + $0x90] sm:$0xff]   ;;  %v1396_v39 = vld [vmem:[%s2228_s4 + $0x28] sm:$0xff]   ;;  %v1107_v48 = vunpack.c.h.bf16 %v1225_v16 }
   0x5   :  { %v1471_v11 = vld [vmem:[%s2231_s3] ss:$0 sm:$0xff]  ;;  %v1162_v12 = vunpack.c.l.bf16 %v1239_v8  ;;  %v1163_v13 = vunpack.c.h.bf16 %v1239_v8  ;;  %v162_v17 = vmul.f32 %v1098_v6, %v1457_v5  ;;  %v163_v18 = vmul.f32 %v1099_v7, %v1457_v5  ;;  %v1226_v44 = vld [vmem:[%s2229_s1 + $0x18] sm:$0xff]   ;;  %v1397_v58 = vld [vmem:[%s2228_s4 + $0x30] sm:$0xff]  }
   0x6   :  { %v1395_v21 = vld [vmem:[%s2228_s4 + $0x20] sm:$0xff]   ;;  %v164_v24 = vmul.f32 %v1102_v14, %v1457_v5  ;;  %v165_v28 = vmul.f32 %v1103_v15, %v1457_v5  ;;  %v196_v29 = vmul.f32 %v1166_v19, %v1457_v5  ;;  %v197_v33 = vmul.f32 %v1167_v20, %v1457_v5  ;;  %v1242_v53 = vld [vmem:[%s2229_s1 + $0x98] sm:$0xff]  }
   0x7   :  { %1298 = vmatpush3.bf16.msra.mxu0 %v1392_v1  ;;  %1384 = vmatpush3.bf16.msra.mxu1 %v1392_v1  ;;  %v194_v22 = vmul.f32 %v1162_v12, %v1457_v5  ;;  %v195_v23 = vmul.f32 %v1163_v13, %v1457_v5  ;;  %v233_v26 = vadd.f32 %v1471_v11, %v162_v17  ;;  %v1170_v52 = vunpack.c.l.bf16 %v1241_v38  ;;  %v1398_v14 = vld [vmem:[%s2228_s4 + $0x38] sm:$0xff]   ;;  %v1243_v19 = vld [vmem:[%s2229_s1 + $0xa0] sm:$0xff]  }
   0x8   :  { %1299 = vmatprep.subr.bf16.mxu0 %v1393_v2  ;;  %1377 = vmatprep.subr.bf16.mxu1 %v1393_v2  ;;  %v234_v27 = vadd.f32 %v1471_v11, %v163_v18  ;;  %v235_v32 = vadd.f32 %v1471_v11, %v164_v24  ;;  %v236_v36 = vadd.f32 %v1471_v11, %v165_v28  ;;  %v1171_v56 = vunpack.c.h.bf16 %v1241_v38  ;;  %v1228_v28 = vld [vmem:[%s2229_s1 + $0x28] sm:$0xff]  }
   0x9   :  { %v265_v30 = vadd.f32 %v1471_v11, %v194_v22  ;;  %v266_v31 = vadd.f32 %v1471_v11, %v195_v23  ;;  %v297_v34 = vmax.f32 %v233_v26, 0.0  ;;  %v267_v37 = vadd.f32 %v1471_v11, %v196_v29 }
   0xa   :  { %v298_v35 = vmax.f32 %v234_v27, 0.0  ;;  %v299_v42 = vmax.f32 %v235_v32, 0.0  ;;  %v268_v43 = vadd.f32 %v1471_v11, %v197_v33  ;;  %v300_v46 = vmax.f32 %v236_v36, 0.0  ;;  %v1244_v33 = vld [vmem:[%s2229_s1 + $0xa8] sm:$0xff]  }
   0xb   :  { %1300 = vmatpush3.bf16.msra.mxu0 %v1393_v2  ;;  %1385 = vmatpush3.bf16.msra.mxu1 %v1393_v2  ;;  %v329_v40 = vmax.f32 %v265_v30, 0.0  ;;  %v330_v41 = vmax.f32 %v266_v31, 0.0  ;;  %v331_v47 = vmax.f32 %v267_v37, 0.0  ;;  %v166_v51 = vmul.f32 %v1106_v25, %v1457_v5 }
   0xc   :  { %1301 = vmatprep.subr.bf16.mxu0 %v1394_v3  ;;  %1378 = vmatprep.subr.bf16.mxu1 %v1394_v3  ;;  %v361_v45 = vpack.c.bf16 %v298_v35, %v297_v34  ;;  %v332_v50 = vmax.f32 %v268_v43, 0.0  ;;  %v1508_v54 = vpack.c.bf16 %v300_v46, %v299_v42  ;;  %v167_v55 = vmul.f32 %v1107_v48, %v1457_v5  ;;  %v1229_v42 = vld [vmem:[%s2229_s1 + $0x30] sm:$0xff]  }
   0xd   :  { %v377_v49 = vpack.c.bf16 %v330_v41, %v329_v40  ;;  %v1110_v57 = vunpack.c.l.bf16 %v1226_v44  ;;  %v237_v60 = vadd.f32 %v1471_v11, %v166_v51  ;;  %v198_v61 = vmul.f32 %v1170_v52, %v1457_v5 }
   0xe   :  { %v1514_v59 = vpack.c.bf16 %v332_v50, %v331_v47  ;;  %v1111_v62 = vunpack.c.h.bf16 %v1226_v44  ;;  %1311 = vmatprep.mubr.bf16.mxu0 %v361_v45  ;;  %v238_v63 = vadd.f32 %v1471_v11, %v167_v55  ;;  %v199_v0 = vmul.f32 %v1171_v56, %v1457_v5 }
   0xf   :  { %1302 = vmatpush3.bf16.msra.mxu0 %v1394_v3  ;;  %1386 = vmatpush3.bf16.msra.mxu1 %v1394_v3  ;;  %v168_v1 = vmul.f32 %v1110_v57, %v1457_v5  ;;  %v1174_v2 = vunpack.c.l.bf16 %v1242_v53  ;;  %v1227_v3 = vld [vmem:[%s2229_s1 + $0x20] sm:$0xff]   ;;  %v301_v4 = vmax.f32 %v237_v60, 0.0  ;;  %v269_v6 = vadd.f32 %v1471_v11, %v198_v61  ;;  %v1245_v61 = vld [vmem:[%s2229_s1 + $0xb0] sm:$0xff]  }
  0x10   :  { %1303 = vmatprep.subr.bf16.mxu0 %v1395_v21  ;;  %1379 = vmatprep.subr.bf16.mxu1 %v1395_v21  ;;  %v169_v7 = vmul.f32 %v1111_v62, %v1457_v5  ;;  %v1175_v8 = vunpack.c.h.bf16 %v1242_v53  ;;  %v302_v9 = vmax.f32 %v238_v63, 0.0  ;;  %v270_v10 = vadd.f32 %v1471_v11, %v199_v0 }
  0x11   :  { %1343 = vmatprep.mubr.bf16.mxu1 %v377_v49  ;;  %v239_v12 = vadd.f32 %v1471_v11, %v168_v1  ;;  %v200_v13 = vmul.f32 %v1174_v2, %v1457_v5  ;;  %v333_v15 = vmax.f32 %v269_v6, 0.0  ;;  %v1114_v18 = vunpack.c.l.bf16 %v1227_v3  ;;  %v1230_v2 = vld [vmem:[%s2229_s1 + $0x38] sm:$0xff]  }
  0x12   :  { %v240_v16 = vadd.f32 %v1471_v11, %v169_v7  ;;  %v201_v17 = vmul.f32 %v1175_v8, %v1457_v5  ;;  %v363_v20 = vpack.c.bf16 %v302_v9, %v301_v4  ;;  %v1115_v26 = vunpack.c.h.bf16 %v1227_v3 }
  0x13   :  { %1304 = vmatpush3.bf16.msra.mxu0 %v1395_v21  ;;  %1387 = vmatpush3.bf16.msra.mxu1 %v1395_v21  ;;  %v334_v21 = vmax.f32 %v270_v10, 0.0  ;;  %v303_v22 = vmax.f32 %v239_v12, 0.0  ;;  %v271_v23 = vadd.f32 %v1471_v11, %v200_v13  ;;  %v170_v27 = vmul.f32 %v1114_v18, %v1457_v5 }
  0x14   :  { %1305 = vmatprep.subr.bf16.mxu0 %v1396_v39  ;;  %1380 = vmatprep.subr.bf16.mxu1 %v1396_v39  ;;  %v304_v24 = vmax.f32 %v240_v16, 0.0  ;;  %v272_v25 = vadd.f32 %v1471_v11, %v201_v17  ;;  %v1178_v31 = vunpack.c.l.bf16 %v1243_v19  ;;  %v1179_v32 = vunpack.c.h.bf16 %v1243_v19 }
  0x15   :  { %v379_v29 = vpack.c.bf16 %v334_v21, %v333_v15  ;;  %v335_v30 = vmax.f32 %v271_v23, 0.0  ;;  %v171_v36 = vmul.f32 %v1115_v26, %v1457_v5  ;;  %v241_v37 = vadd.f32 %v1471_v11, %v170_v27  ;;  %v1246_v15 = vld [vmem:[%s2229_s1 + $0xb8] sm:$0xff]  }
  0x16   :  { %v1546_v34 = vpack.c.bf16 %v304_v24, %v303_v22  ;;  %v336_v35 = vmax.f32 %v272_v25, 0.0  ;;  %v202_v38 = vmul.f32 %v1178_v31, %v1457_v5  ;;  %v1118_v40 = vunpack.c.l.bf16 %v1228_v28 }
  0x17   :  { %1306 = vmatpush3.bf16.msra.mxu0 %v1396_v39  ;;  %1388 = vmatpush3.bf16.msra.mxu1 %v1396_v39  ;;  %v203_v39 = vmul.f32 %v1179_v32, %v1457_v5  ;;  %v1119_v41 = vunpack.c.h.bf16 %v1228_v28  ;;  %v242_v44 = vadd.f32 %v1471_v11, %v171_v36  ;;  %v305_v45 = vmax.f32 %v241_v37, 0.0 }
  0x18   :  { %1307 = vmatprep.subr.bf16.mxu0 %v1397_v58  ;;  %1381 = vmatprep.subr.bf16.mxu1 %v1397_v58  ;;  %v380_v43 = vpack.c.bf16 %v336_v35, %v335_v30  ;;  %v1182_v46 = vunpack.c.l.bf16 %v1244_v33  ;;  %v273_v47 = vadd.f32 %v1471_v11, %v202_v38  ;;  %v172_v49 = vmul.f32 %v1118_v40, %v1457_v5 }
  0x19   :  { %v274_v48 = vadd.f32 %v1471_v11, %v203_v39  ;;  %v1183_v50 = vunpack.c.h.bf16 %v1244_v33  ;;  %v306_v51 = vmax.f32 %v242_v44, 0.0  ;;  %v173_v52 = vmul.f32 %v1119_v41, %v1457_v5  ;;  %v1247_v33 = vld [vmem:[%s2229_s1 + $0xc0] sm:$0xff]  }
  0x1a   :  { %v204_v53 = vmul.f32 %v1182_v46, %v1457_v5  ;;  %v1122_v55 = vunpack.c.l.bf16 %v1229_v42  ;;  %v337_v56 = vmax.f32 %v273_v47, 0.0  ;;  %v1123_v1 = vunpack.c.h.bf16 %v1229_v42 }
  0x1b   :  { %1308 = vmatpush3.bf16.msra.mxu0 %v1397_v58  ;;  %1389 = vmatpush3.bf16.msra.mxu1 %v1397_v58  ;;  %v338_v57 = vmax.f32 %v274_v48, 0.0  ;;  %v243_v58 = vadd.f32 %v1471_v11, %v172_v49  ;;  %v205_v60 = vmul.f32 %v1183_v50, %v1457_v5  ;;  %v365_v62 = vpack.c.bf16 %v306_v51, %v305_v45  ;;  %v1248_v51 = vld [vmem:[%s2229_s1 + $0xc8] sm:$0xff]  }
  0x1c   :  { %1309 = vmatprep.subr.bf16.mxu0 %v1398_v14  ;;  %1382 = vmatprep.subr.bf16.mxu1 %v1398_v14  ;;  %v244_v63 = vadd.f32 %v1471_v11, %v173_v52  ;;  %v275_v0 = vadd.f32 %v1471_v11, %v204_v53  ;;  %v175_v8 = vmul.f32 %v1123_v1, %v1457_v5  ;;  %v1186_v9 = vunpack.c.l.bf16 %v1245_v61 }
  0x1d   :  { %v381_v3 = vpack.c.bf16 %v338_v57, %v337_v56  ;;  %v307_v4 = vmax.f32 %v243_v58, 0.0  ;;  %v276_v6 = vadd.f32 %v1471_v11, %v205_v60  ;;  %v1187_v13 = vunpack.c.h.bf16 %v1245_v61 }
  0x1e   :  { %v308_v7 = vmax.f32 %v244_v63, 0.0  ;;  %v246_v17 = vadd.f32 %v1471_v11, %v175_v8  ;;  %v206_v18 = vmul.f32 %v1186_v9, %v1457_v5  ;;  %v1127_v19 = vunpack.c.h.bf16 %v1230_v2 }
  0x1f   :  { %1310 = vmatpush3.bf16.msra.mxu0 %v1398_v14  ;;  %1390 = vmatpush3.bf16.msra.mxu1 %v1398_v14  ;;  %v340_v10 = vmax.f32 %v276_v6, 0.0  ;;  %v1126_v14 = vunpack.c.l.bf16 %v1230_v2  ;;  %v207_v23 = vmul.f32 %v1187_v13, %v1457_v5  ;;  %v1190_v28 = vunpack.c.l.bf16 %v1246_v15  ;;  %v1233_v2 = vld [vmem:[%s2229_s1 + $0x50] sm:$0xff]  }
  0x20   :  { %v366_v16 = vpack.c.bf16 %v308_v7, %v307_v4  ;;  %v310_v25 = vmax.f32 %v246_v17, 0.0  ;;  %v277_v26 = vadd.f32 %v1471_v11, %v206_v18  ;;  %v177_v27 = vmul.f32 %v1127_v19, %v1457_v5 }
  0x21   :  { %v176_v24 = vmul.f32 %v1126_v14, %v1457_v5  ;;  %v1191_v31 = vunpack.c.h.bf16 %v1246_v15  ;;  %v208_v38 = vmul.f32 %v1190_v28, %v1457_v5  ;;  %v1195_v50 = vunpack.c.h.bf16 %v1247_v33 }
  0x22   :  { %1312 = vmatmul.mubr.bf16.vlgmr.msra.gmra.mrb[0].mxu0 %v1508_v54  ;;  %1344 = vmatmul.mubr.bf16.vlgmr.msra.gmra.mrb[0].mxu1 %v1514_v59  ;;  %v174_v54 = vmul.f32 %v1122_v55, %v1457_v5  ;;  %v339_v59 = vmax.f32 %v275_v0, 0.0  ;;  %v341_v36 = vmax.f32 %v277_v26, 0.0  ;;  %v248_v37 = vadd.f32 %v1471_v11, %v177_v27 }
  0x23   :  { %1315 = vmatprep.mubr.bf16.mxu0 %v363_v20  ;;  %1347 = vmatprep.mubr.bf16.mxu1 %v379_v29  ;;  %v1231_v20 = vld [vmem:[%s2229_s1 + $0x40] sm:$0xff]   ;;  %v278_v29 = vadd.f32 %v1471_v11, %v207_v23  ;;  %v247_v30 = vadd.f32 %v1471_v11, %v176_v24  ;;  %v209_v41 = vmul.f32 %v1191_v31, %v1457_v5  ;;  %v1198_v1 = vunpack.c.l.bf16 %v1248_v51 }
  0x24   :  { %v245_v12 = vadd.f32 %v1471_v11, %v174_v54  ;;  %v382_v21 = vpack.c.bf16 %v340_v10, %v339_v59  ;;  %v1130_v32 = vunpack.c.l.bf16 %v1231_v20  ;;  %v1131_v42 = vunpack.c.h.bf16 %v1231_v20  ;;  %v1249_v10 = vld [vmem:[%s2229_s1 + $0xd0] sm:$0xff]   ;;  %v1234_v20 = vld [vmem:[%s2229_s1 + $0x58] sm:$0xff]  }
  0x25   :  { %v342_v39 = vmax.f32 %v278_v29, 0.0  ;;  %v311_v40 = vmax.f32 %v247_v30, 0.0  ;;  %v312_v44 = vmax.f32 %v248_v37, 0.0  ;;  %v279_v45 = vadd.f32 %v1471_v11, %v208_v38 }
  0x26   :  { %v309_v22 = vmax.f32 %v245_v12, 0.0  ;;  %v178_v46 = vmul.f32 %v1130_v32, %v1457_v5  ;;  %v280_v48 = vadd.f32 %v1471_v11, %v209_v41  ;;  %v179_v49 = vmul.f32 %v1131_v42, %v1457_v5 }
  0x27   :  { %v383_v47 = vpack.c.bf16 %v342_v39, %v341_v36  ;;  %v368_v52 = vpack.c.bf16 %v312_v44, %v311_v40  ;;  %v343_v53 = vmax.f32 %v279_v45, 0.0  ;;  %v211_v60 = vmul.f32 %v1195_v50, %v1457_v5  ;;  %v1235_v44 = vld [vmem:[%s2229_s1 + $0x60] sm:$0xff]  }
  0x28   :  { %v367_v35 = vpack.c.bf16 %v310_v25, %v309_v22  ;;  %v249_v55 = vadd.f32 %v1471_v11, %v178_v46  ;;  %v344_v57 = vmax.f32 %v280_v48, 0.0  ;;  %v250_v58 = vadd.f32 %v1471_v11, %v179_v49 }
  0x29   :  { %v282_v6 = vadd.f32 %v1471_v11, %v211_v60  ;;  %v1199_v8 = vunpack.c.h.bf16 %v1248_v51  ;;  %v212_v9 = vmul.f32 %v1198_v1, %v1457_v5  ;;  %v1138_v15 = vunpack.c.l.bf16 %v1233_v2  ;;  %v1251_v51 = vld [vmem:[%s2229_s1 + $0xe0] sm:$0xff]  }
  0x2a   :  { %1316 = vmatmul.mubr.bf16.gmra.mrb[4].mxu0 %v1546_v34  ;;  %1348 = vmatmul.mubr.bf16.gmra.mrb[4].mxu1 %v380_v43  ;;  %v1194_v34 = vunpack.c.l.bf16 %v1247_v33  ;;  %v1232_v43 = vld [vmem:[%s2229_s1 + $0x48] sm:$0xff]   ;;  %v314_v4 = vmax.f32 %v250_v58, 0.0  ;;  %v1139_v19 = vunpack.c.h.bf16 %v1233_v2  ;;  %v1202_v24 = vunpack.c.l.bf16 %v1249_v10  ;;  %v1250_v33 = vld [vmem:[%s2229_s1 + $0xd8] sm:$0xff]  }
  0x2b   :  { %1319 = vmatprep.mubr.bf16.mxu0 %v365_v62  ;;  %1351 = vmatprep.mubr.bf16.mxu1 %v381_v3  ;;  %v1134_v61 = vunpack.c.l.bf16 %v1232_v43  ;;  %v313_v62 = vmax.f32 %v249_v55, 0.0  ;;  %v1135_v0 = vunpack.c.h.bf16 %v1232_v43  ;;  %v384_v3 = vpack.c.bf16 %v344_v57, %v343_v53  ;;  %v1236_v2 = vld [vmem:[%s2229_s1 + $0x68] sm:$0xff]  }
  0x2c   :  { %v210_v56 = vmul.f32 %v1194_v34, %v1457_v5  ;;  %v346_v13 = vmax.f32 %v282_v6, 0.0  ;;  %v213_v17 = vmul.f32 %v1199_v8, %v1457_v5  ;;  %v283_v18 = vadd.f32 %v1471_v11, %v212_v9 }
  0x2d   :  { %v180_v54 = vmul.f32 %v1134_v61, %v1457_v5  ;;  %v181_v59 = vmul.f32 %v1135_v0, %v1457_v5  ;;  %v369_v12 = vpack.c.bf16 %v314_v4, %v313_v62  ;;  %v182_v23 = vmul.f32 %v1138_v15, %v1457_v5 }
  0x2e   :  { %v281_v63 = vadd.f32 %v1471_v11, %v210_v56  ;;  %v284_v26 = vadd.f32 %v1471_v11, %v213_v17  ;;  %v347_v27 = vmax.f32 %v283_v18, 0.0  ;;  %v183_v28 = vmul.f32 %v1139_v19, %v1457_v5  ;;  %v1237_v19 = vld [vmem:[%s2229_s1 + $0x70] sm:$0xff]  }
  0x2f   :  { %v251_v14 = vadd.f32 %v1471_v11, %v180_v54  ;;  %v253_v29 = vadd.f32 %v1471_v11, %v182_v23  ;;  %v1203_v30 = vunpack.c.h.bf16 %v1249_v10  ;;  %v214_v31 = vmul.f32 %v1202_v24, %v1457_v5 }
  0x30   :  { %v345_v7 = vmax.f32 %v281_v63, 0.0  ;;  %v1142_v32 = vunpack.c.l.bf16 %v1234_v20  ;;  %v348_v36 = vmax.f32 %v284_v26, 0.0  ;;  %v254_v37 = vadd.f32 %v1471_v11, %v183_v28  ;;  %v1253_v28 = vld [vmem:[%s2229_s1 + $0xf0] sm:$0xff]  }
  0x31   :  { %v315_v22 = vmax.f32 %v251_v14, 0.0  ;;  %v1143_v38 = vunpack.c.h.bf16 %v1234_v20  ;;  %v317_v39 = vmax.f32 %v253_v29, 0.0  ;;  %v215_v40 = vmul.f32 %v1203_v30, %v1457_v5 }
  0x32   :  { %1320 = vmatmul.mubr.bf16.gmra.mrb[8].mxu0 %v366_v16  ;;  %1352 = vmatmul.mubr.bf16.gmra.mrb[8].mxu1 %v382_v21  ;;  %v252_v16 = vadd.f32 %v1471_v11, %v181_v59  ;;  %v385_v21 = vpack.c.bf16 %v346_v13, %v345_v7  ;;  %v285_v41 = vadd.f32 %v1471_v11, %v214_v31  ;;  %v318_v46 = vmax.f32 %v254_v37, 0.0  ;;  %v1252_v7 = vld [vmem:[%s2229_s1 + $0xe8] sm:$0xff]  }
  0x33   :  { %1323 = vmatprep.mubr.bf16.mxu0 %v367_v35  ;;  %1355 = vmatprep.mubr.bf16.mxu1 %v383_v47  ;;  %v184_v42 = vmul.f32 %v1142_v32, %v1457_v5  ;;  %v386_v45 = vpack.c.bf16 %v348_v36, %v347_v27  ;;  %v185_v34 = vmul.f32 %v1143_v38, %v1457_v5  ;;  %v1206_v43 = vunpack.c.l.bf16 %v1250_v33  ;;  %v1238_v38 = vld [vmem:[%s2229_s1 + $0x78] sm:$0xff]  }
  0x34   :  { %v316_v25 = vmax.f32 %v252_v16, 0.0  ;;  %v286_v47 = vadd.f32 %v1471_v11, %v215_v40  ;;  %v349_v48 = vmax.f32 %v285_v41, 0.0  ;;  %v1207_v50 = vunpack.c.h.bf16 %v1250_v33 }
  0x35   :  { %v255_v49 = vadd.f32 %v1471_v11, %v184_v42  ;;  %v371_v53 = vpack.c.bf16 %v318_v46, %v317_v39  ;;  %v216_v55 = vmul.f32 %v1206_v43, %v1457_v5  ;;  %v1146_v56 = vunpack.c.l.bf16 %v1235_v44 }
  0x36   :  { %v370_v35 = vpack.c.bf16 %v316_v25, %v315_v22  ;;  %v350_v57 = vmax.f32 %v286_v47, 0.0  ;;  %v217_v60 = vmul.f32 %v1207_v50, %v1457_v5  ;;  %v1147_v61 = vunpack.c.h.bf16 %v1235_v44  ;;  %v1254_v50 = vld [vmem:[%s2229_s1 + $0xf8] sm:$0xff]  }
  0x37   :  { %v319_v58 = vmax.f32 %v255_v49, 0.0  ;;  %v287_v63 = vadd.f32 %v1471_v11, %v216_v55  ;;  %v186_v0 = vmul.f32 %v1146_v56, %v1457_v5  ;;  %v1210_v1 = vunpack.c.l.bf16 %v1251_v51 }
  0x38   :  { %v288_v4 = vadd.f32 %v1471_v11, %v217_v60  ;;  %v187_v6 = vmul.f32 %v1147_v61, %v1457_v5  ;;  %v1211_v54 = vunpack.c.h.bf16 %v1251_v51  ;;  %v1150_v14 = vunpack.c.l.bf16 %v1236_v2 }
  0x39   :  { %v351_v59 = vmax.f32 %v287_v63, 0.0  ;;  %v257_v8 = vadd.f32 %v1471_v11, %v186_v0  ;;  %v218_v9 = vmul.f32 %v1210_v1, %v1457_v5  ;;  %v1151_v17 = vunpack.c.h.bf16 %v1236_v2 }
  0x3a   :  { %1324 = vmatmul.mubr.bf16.gmra.mrb[12].mxu0 %v368_v52  ;;  %1356 = vmatmul.mubr.bf16.gmra.mrb[12].mxu1 %v384_v3  ;;  %v256_v52 = vadd.f32 %v1471_v11, %v185_v34  ;;  %v387_v3 = vpack.c.bf16 %v350_v57, %v349_v48  ;;  %v352_v10 = vmax.f32 %v288_v4, 0.0  ;;  %v219_v13 = vmul.f32 %v1211_v54, %v1457_v5 }
  0x3b   :  { %1327 = vmatprep.mubr.bf16.mxu0 %v369_v12  ;;  %1359 = vmatprep.mubr.bf16.mxu1 %v385_v21  ;;  %v258_v12 = vadd.f32 %v1471_v11, %v187_v6  ;;  %v289_v16 = vadd.f32 %v1471_v11, %v218_v9  ;;  %v1214_v18 = vunpack.c.l.bf16 %v1252_v7  ;;  %v321_v20 = vmax.f32 %v257_v8, 0.0 }
  0x3c   :  { %v320_v62 = vmax.f32 %v256_v52, 0.0  ;;  %v290_v22 = vadd.f32 %v1471_v11, %v219_v13  ;;  %v188_v23 = vmul.f32 %v1150_v14, %v1457_v5  ;;  %v189_v25 = vmul.f32 %v1151_v17, %v1457_v5 }
  0x3d   :  { %v322_v21 = vmax.f32 %v258_v12, 0.0  ;;  %v353_v24 = vmax.f32 %v289_v16, 0.0  ;;  %v1215_v26 = vunpack.c.h.bf16 %v1252_v7  ;;  %v220_v27 = vmul.f32 %v1214_v18, %v1457_v5 }
  0x3e   :  { %v372_v15 = vpack.c.bf16 %v320_v62, %v319_v58  ;;  %v388_v29 = vpack.c.bf16 %v352_v10, %v351_v59  ;;  %v354_v30 = vmax.f32 %v290_v22, 0.0  ;;  %v259_v31 = vadd.f32 %v1471_v11, %v188_v23  ;;  %v780_v22 = vld [vmem:[%s2233_s0 + $0x110] sm:$0xff] }
  0x3f   :  { %v1154_v32 = vunpack.c.l.bf16 %v1237_v19  ;;  %v260_v33 = vadd.f32 %v1471_v11, %v189_v25  ;;  %v291_v36 = vadd.f32 %v1471_v11, %v220_v27  ;;  %v1155_v37 = vunpack.c.h.bf16 %v1237_v19 }
  0x40   :  { %v373_v39 = vpack.c.bf16 %v322_v21, %v321_v20  ;;  %v389_v40 = vpack.c.bf16 %v354_v30, %v353_v24  ;;  %v1218_v42 = vunpack.c.l.bf16 %v1253_v28  ;;  %v323_v44 = vmax.f32 %v259_v31, 0.0 }
  0x41   :  { %v190_v41 = vmul.f32 %v1154_v32, %v1457_v5  ;;  %v191_v34 = vmul.f32 %v1155_v37, %v1457_v5  ;;  %v1219_v47 = vunpack.c.h.bf16 %v1253_v28  ;;  %v1158_v49 = vunpack.c.l.bf16 %v1238_v38  ;;  %v778_v28 = vld [vmem:[%s2233_s0 + $0x100] sm:$0xff] }
  0x42   :  { %1328 = vmatmul.mubr.bf16.gmra.mrb[16].mxu0 %v370_v35  ;;  %1360 = vmatmul.mubr.bf16.gmra.mrb[16].mxu1 %v386_v45  ;;  %v221_v35 = vmul.f32 %v1215_v26, %v1457_v5  ;;  %v324_v45 = vmax.f32 %v260_v33, 0.0  ;;  %v222_v48 = vmul.f32 %v1218_v42, %v1457_v5  ;;  %v355_v51 = vmax.f32 %v291_v36, 0.0  ;;  %v746_v26 = vld [vmem:[%s2233_s0] sm:$0xff]  ;;  %v749_v33 = vld [vmem:[%s2233_s0 + $0x18] sm:$0xff]  ;;  %v747_v42 = vld [vmem:[%s2233_s0 + $0x8] sm:$0xff] }
  0x43   :  { %1331 = vmatprep.mubr.bf16.mxu0 %v371_v53  ;;  %1363 = vmatprep.mubr.bf16.mxu1 %v387_v3  ;;  %v261_v43 = vadd.f32 %v1471_v11, %v190_v41  ;;  %v262_v52 = vadd.f32 %v1471_v11, %v191_v34  ;;  %v1159_v55 = vunpack.c.h.bf16 %v1238_v38  ;;  %v223_v57 = vmul.f32 %v1219_v47, %v1457_v5  ;;  %v781_v36 = vld [vmem:[%s2233_s0 + $0x118] sm:$0xff] }
  0x44   :  { %v292_v46 = vadd.f32 %v1471_v11, %v221_v35  ;;  %v293_v58 = vadd.f32 %v1471_v11, %v222_v48  ;;  %v192_v60 = vmul.f32 %v1158_v49, %v1457_v5  ;;  %v1222_v63 = vunpack.c.l.bf16 %v1254_v50 }
  0x45   :  { %v325_v56 = vmax.f32 %v261_v43, 0.0  ;;  %v326_v61 = vmax.f32 %v262_v52, 0.0  ;;  %v193_v62 = vmul.f32 %v1159_v55, %v1457_v5  ;;  %v374_v0 = vpack.c.bf16 %v324_v45, %v323_v44  ;;  %v779_v45 = vld [vmem:[%s2233_s0 + $0x108] sm:$0xff] }
  0x46   :  { %v356_v53 = vmax.f32 %v292_v46, 0.0  ;;  %v294_v1 = vadd.f32 %v1471_v11, %v223_v57  ;;  %v357_v2 = vmax.f32 %v293_v58, 0.0  ;;  %v1223_v3 = vunpack.c.h.bf16 %v1254_v50 }
  0x47   :  { %v263_v6 = vadd.f32 %v1471_v11, %v192_v60  ;;  %v264_v54 = vadd.f32 %v1471_v11, %v193_v62  ;;  %v224_v7 = vmul.f32 %v1222_v63, %v1457_v5  ;;  %v375_v59 = vpack.c.bf16 %v326_v61, %v325_v56 }
  0x48   :  { %v390_v4 = vpack.c.bf16 %v356_v53, %v355_v51  ;;  %v358_v8 = vmax.f32 %v294_v1, 0.0  ;;  %v225_v9 = vmul.f32 %v1223_v3, %v1457_v5  ;;  %v1709_v5 = vld [vmem:[%s2232_s5] ss:$0 sm:$0xff] }
  0x49   :  { %v295_v10 = vadd.f32 %v1471_v11, %v224_v7  ;;  %v327_v14 = vmax.f32 %v263_v6, 0.0 }
  0x4a   :  { %1332 = vmatmul.mubr.bf16.gmra.mrb[20].mxu0 %v372_v15  ;;  %1364 = vmatmul.mubr.bf16.gmra.mrb[20].mxu1 %v388_v29  ;;  %v391_v12 = vpack.c.bf16 %v358_v8, %v357_v2  ;;  %v296_v13 = vadd.f32 %v1471_v11, %v225_v9  ;;  %v328_v15 = vmax.f32 %v264_v54, 0.0  ;;  %v748_v11 = vld [vmem:[%s2233_s0 + $0x10] sm:$0xff]  ;;  %v1728_v29 = vld [vmem:[%s2234_s6] ss:$0 sm:$0xff] }
  0x4b   :  { %1335 = vmatprep.mubr.bf16.mxu0 %v373_v39  ;;  %1367 = vmatprep.mubr.bf16.mxu1 %v389_v40  ;;  %v359_v16 = vmax.f32 %v295_v10, 0.0 }
  0x4c   :  { %v360_v17 = vmax.f32 %v296_v13, 0.0  ;;  %v376_v18 = vpack.c.bf16 %v328_v15, %v327_v14 }
  0x4e   :  { %v392_v19 = vpack.c.bf16 %v360_v17, %v359_v16 }
  0x52   :  { %1336 = vmatmul.mubr.bf16.gmra.mrb[24].mxu0 %v374_v0  ;;  %1368 = vmatmul.mubr.bf16.gmra.mrb[24].mxu1 %v390_v4 }
  0x53   :  { %1339 = vmatprep.mubr.bf16.mxu0 %v375_v59  ;;  %1371 = vmatprep.mubr.bf16.mxu1 %v391_v12 }
  0x5a   :  { %1340 = vmatmul.mubr.bf16.gmra.mrb[28].mxu0 %v376_v18  ;;  %1372 = vmatmul.mubr.bf16.gmra.mrb[28].mxu1 %v392_v19 }
  0xf5   :  { %v1313_v20 = vpop.f32.mrb[0].mxu0  ;;  %v1345_v21 = vpop.f32.mrb[0].mxu1 }
  0xf6   :  { %v819_v23 = vmul.f32 %v1313_v20, %v1709_v5  ;;  %v851_v24 = vmul.f32 %v1345_v21, %v1709_v5  ;;  %v491_v25 = vpop.f32.mrb[1].mxu0  ;;  %v619_v27 = vpop.f32.mrb[1].mxu1 }
  0xf7   :  { %v817_v30 = vmul.f32 %v1709_v5, %v491_v25  ;;  %v849_v31 = vmul.f32 %v1709_v5, %v619_v27  ;;  %v1314_v32 = vpop.f32.mrb[2].mxu0  ;;  %v1346_v35 = vpop.f32.mrb[2].mxu1 }
  0xf8   :  { %v883_v37 = vadd.f32 %v819_v23, %v748_v11  ;;  %v915_v38 = vadd.f32 %v851_v24, %v780_v22  ;;  %v820_v39 = vmul.f32 %v1314_v32, %v1709_v5  ;;  %v852_v40 = vmul.f32 %v1346_v35, %v1709_v5  ;;  %v494_v41 = vpop.f32.mrb[3].mxu0  ;;  %v622_v44 = vpop.f32.mrb[3].mxu1 }
  0xf9   :  { %v881_v46 = vadd.f32 %v817_v30, %v746_v26  ;;  %v913_v34 = vadd.f32 %v849_v31, %v778_v28  ;;  %v818_v43 = vmul.f32 %v1709_v5, %v494_v41  ;;  %v850_v47 = vmul.f32 %v1709_v5, %v622_v44 }
  0xfa   :  { %v954_v48 = vadd.f32 %v1728_v29, %v883_v37  ;;  %v986_v49 = vadd.f32 %v1728_v29, %v915_v38  ;;  %v884_v50 = vadd.f32 %v820_v39, %v749_v33  ;;  %v916_v51 = vadd.f32 %v852_v40, %v781_v36 }
  0xfb   :  { %v952_v53 = vadd.f32 %v1728_v29, %v881_v46  ;;  %v984_v52 = vadd.f32 %v1728_v29, %v913_v34  ;;  %v882_v55 = vadd.f32 %v818_v43, %v747_v42  ;;  %v914_v56 = vadd.f32 %v850_v47, %v779_v45 }
  0xfc   :  { %1018 = vst [vmem:[%s2235_s7 + $0x10] sm:$0xff] %v954_v48  ;;  %1050 = vst [vmem:[%s2235_s7 + $0x110] sm:$0xff] %v986_v49  ;;  %v955_v57 = vadd.f32 %v1728_v29, %v884_v50  ;;  %v987_v58 = vadd.f32 %v1728_v29, %v916_v51 }
  0xfd   :  { %1016 = vst [vmem:[%s2235_s7] sm:$0xff] %v952_v53  ;;  %1048 = vst [vmem:[%s2235_s7 + $0x100] sm:$0xff] %v984_v52  ;;  %v953_v60 = vadd.f32 %v1728_v29, %v882_v55  ;;  %v985_v61 = vadd.f32 %v1728_v29, %v914_v56  ;;  %v1317_v62 = vpop.f32.mrb[4].mxu0  ;;  %v1349_v0 = vpop.f32.mrb[4].mxu1 }
  0xfe   :  { %v823_v2 = vmul.f32 %v1317_v62, %v1709_v5  ;;  %v855_v3 = vmul.f32 %v1349_v0, %v1709_v5  ;;  %v507_v4 = vpop.f32.mrb[5].mxu0  ;;  %v635_v54 = vpop.f32.mrb[5].mxu1 }
  0xff   :  { %v821_v59 = vmul.f32 %v1709_v5, %v507_v4  ;;  %v853_v8 = vmul.f32 %v1709_v5, %v635_v54  ;;  %v1318_v9 = vpop.f32.mrb[6].mxu0  ;;  %v1350_v12 = vpop.f32.mrb[6].mxu1 }
 0x100   :  { %v824_v16 = vmul.f32 %v1318_v9, %v1709_v5  ;;  %v856_v17 = vmul.f32 %v1350_v12, %v1709_v5  ;;  %v510_v18 = vpop.f32.mrb[7].mxu0  ;;  %v638_v20 = vpop.f32.mrb[7].mxu1 }
 0x101   :  { %v822_v23 = vmul.f32 %v1709_v5, %v510_v18  ;;  %v854_v24 = vmul.f32 %v1709_v5, %v638_v20 }
 0x104   :  { %v752_v63 = vld [vmem:[%s2233_s0 + $0x30] sm:$0xff] }
 0x105   :  { %v784_v1 = vld [vmem:[%s2233_s0 + $0x130] sm:$0xff]  ;;  %v887_v14 = vadd.f32 %v823_v2, %v752_v63  ;;  %v1321_v39 = vpop.f32.mrb[8].mxu0  ;;  %v1353_v41 = vpop.f32.mrb[8].mxu1 }
 0x106   :  { %1019 = vst [vmem:[%s2235_s7 + $0x18] sm:$0xff] %v955_v57  ;;  %1051 = vst [vmem:[%s2235_s7 + $0x118] sm:$0xff] %v987_v58  ;;  %v919_v15 = vadd.f32 %v855_v3, %v784_v1  ;;  %v827_v44 = vmul.f32 %v1321_v39, %v1709_v5  ;;  %v859_v45 = vmul.f32 %v1353_v41, %v1709_v5  ;;  %v523_v46 = vpop.f32.mrb[9].mxu0  ;;  %v651_v43 = vpop.f32.mrb[9].mxu1 }
 0x107   :  { %v958_v25 = vadd.f32 %v1728_v29, %v887_v14  ;;  %v825_v48 = vmul.f32 %v1709_v5, %v523_v46  ;;  %v857_v49 = vmul.f32 %v1709_v5, %v651_v43  ;;  %v1322_v50 = vpop.f32.mrb[10].mxu0  ;;  %v1354_v53 = vpop.f32.mrb[10].mxu1 }
 0x108   :  { %v990_v26 = vadd.f32 %v1728_v29, %v919_v15  ;;  %v828_v57 = vmul.f32 %v1322_v50, %v1709_v5  ;;  %v860_v58 = vmul.f32 %v1354_v53, %v1709_v5  ;;  %v654_v62 = vpop.f32.mrb[11].mxu1 }
 0x109   :  { %v858_v3 = vmul.f32 %v1709_v5, %v654_v62 }
 0x10d   :  { %v750_v6 = vld [vmem:[%s2233_s0 + $0x20] sm:$0xff]  ;;  %v1357_v18 = vpop.f32.mrb[12].mxu1 }
 0x10e   :  { %v782_v7 = vld [vmem:[%s2233_s0 + $0x120] sm:$0xff]  ;;  %v885_v21 = vadd.f32 %v821_v59, %v750_v6 }
 0x10f   :  { %1017 = vst [vmem:[%s2235_s7 + $0x8] sm:$0xff] %v953_v60  ;;  %1049 = vst [vmem:[%s2235_s7 + $0x108] sm:$0xff] %v985_v61  ;;  %v917_v22 = vadd.f32 %v853_v8, %v782_v7  ;;  %v526_v60 = vpop.f32.mrb[11].mxu0 }
 0x110   :  { %v956_v30 = vadd.f32 %v1728_v29, %v885_v21  ;;  %v826_v2 = vmul.f32 %v1709_v5, %v526_v60 }
 0x111   :  { %v988_v31 = vadd.f32 %v1728_v29, %v917_v22 }
 0x116   :  { %v753_v10 = vld [vmem:[%s2233_s0 + $0x38] sm:$0xff]  ;;  %v751_v19 = vld [vmem:[%s2233_s0 + $0x28] sm:$0xff] }
 0x117   :  { %v785_v13 = vld [vmem:[%s2233_s0 + $0x138] sm:$0xff]  ;;  %v783_v11 = vld [vmem:[%s2233_s0 + $0x128] sm:$0xff]  ;;  %v888_v27 = vadd.f32 %v824_v16, %v753_v10  ;;  %v886_v32 = vadd.f32 %v822_v23, %v751_v19  ;;  %v1325_v16 = vpop.f32.mrb[12].mxu0  ;;  %v667_v23 = vpop.f32.mrb[13].mxu1 }
 0x118   :  { %v920_v28 = vadd.f32 %v856_v17, %v785_v13  ;;  %v918_v33 = vadd.f32 %v854_v24, %v783_v11  ;;  %1022 = vst [vmem:[%s2235_s7 + $0x30] sm:$0xff] %v958_v25  ;;  %1054 = vst [vmem:[%s2235_s7 + $0x130] sm:$0xff] %v990_v26  ;;  %v831_v20 = vmul.f32 %v1325_v16, %v1709_v5  ;;  %v539_v21 = vpop.f32.mrb[13].mxu0 }
 0x119   :  { %v959_v35 = vadd.f32 %v1728_v29, %v888_v27  ;;  %1020 = vst [vmem:[%s2235_s7 + $0x20] sm:$0xff] %v956_v30  ;;  %1052 = vst [vmem:[%s2235_s7 + $0x120] sm:$0xff] %v988_v31  ;;  %v957_v37 = vadd.f32 %v1728_v29, %v886_v32  ;;  %v863_v11 = vmul.f32 %v1357_v18, %v1709_v5  ;;  %v1326_v27 = vpop.f32.mrb[14].mxu0  ;;  %v1358_v30 = vpop.f32.mrb[14].mxu1 }
 0x11a   :  { %v991_v36 = vadd.f32 %v1728_v29, %v920_v28  ;;  %v989_v38 = vadd.f32 %v1728_v29, %v918_v33  ;;  %v829_v25 = vmul.f32 %v1709_v5, %v539_v21  ;;  %v861_v26 = vmul.f32 %v1709_v5, %v667_v23  ;;  %v670_v39 = vpop.f32.mrb[15].mxu1 }
 0x11b   :  { %v1361_v60 = vpop.f32.mrb[16].mxu1 }
 0x120   :  { %v756_v40 = vld [vmem:[%s2233_s0 + $0x50] sm:$0xff] }
 0x121   :  { %v788_v42 = vld [vmem:[%s2233_s0 + $0x150] sm:$0xff]  ;;  %v891_v55 = vadd.f32 %v827_v44, %v756_v40 }
 0x122   :  { %1023 = vst [vmem:[%s2235_s7 + $0x38] sm:$0xff] %v959_v35  ;;  %1055 = vst [vmem:[%s2235_s7 + $0x138] sm:$0xff] %v991_v36  ;;  %v923_v56 = vadd.f32 %v859_v45, %v788_v42  ;;  %v832_v35 = vmul.f32 %v1326_v27, %v1709_v5  ;;  %v864_v36 = vmul.f32 %v1358_v30, %v1709_v5 }
 0x123   :  { %v962_v4 = vadd.f32 %v1728_v29, %v891_v55  ;;  %v862_v45 = vmul.f32 %v1709_v5, %v670_v39 }
 0x124   :  { %v994_v6 = vadd.f32 %v1728_v29, %v923_v56 }
 0x129   :  { %v754_v34 = vld [vmem:[%s2233_s0 + $0x40] sm:$0xff] }
 0x12a   :  { %v786_v47 = vld [vmem:[%s2233_s0 + $0x140] sm:$0xff]  ;;  %v889_v0 = vadd.f32 %v825_v48, %v754_v34 }
 0x12b   :  { %1021 = vst [vmem:[%s2235_s7 + $0x28] sm:$0xff] %v957_v37  ;;  %1053 = vst [vmem:[%s2235_s7 + $0x128] sm:$0xff] %v989_v38  ;;  %v921_v1 = vadd.f32 %v857_v49, %v786_v47  ;;  %v542_v37 = vpop.f32.mrb[15].mxu0 }
 0x12c   :  { %v960_v59 = vadd.f32 %v1728_v29, %v889_v0  ;;  %v830_v44 = vmul.f32 %v1709_v5, %v542_v37 }
 0x12d   :  { %v992_v8 = vadd.f32 %v1728_v29, %v921_v1 }
 0x132   :  { %v757_v51 = vld [vmem:[%s2233_s0 + $0x58] sm:$0xff]  ;;  %v755_v61 = vld [vmem:[%s2233_s0 + $0x48] sm:$0xff] }
 0x133   :  { %v789_v52 = vld [vmem:[%s2233_s0 + $0x158] sm:$0xff]  ;;  %v787_v63 = vld [vmem:[%s2233_s0 + $0x148] sm:$0xff]  ;;  %v892_v54 = vadd.f32 %v828_v57, %v757_v51  ;;  %v890_v9 = vadd.f32 %v826_v2, %v755_v61  ;;  %v1329_v57 = vpop.f32.mrb[16].mxu0  ;;  %v683_v2 = vpop.f32.mrb[17].mxu1 }
 0x134   :  { %v924_v7 = vadd.f32 %v860_v58, %v789_v52  ;;  %v922_v10 = vadd.f32 %v858_v3, %v787_v63  ;;  %1026 = vst [vmem:[%s2235_s7 + $0x50] sm:$0xff] %v962_v4  ;;  %1058 = vst [vmem:[%s2235_s7 + $0x150] sm:$0xff] %v994_v6  ;;  %v835_v62 = vmul.f32 %v1329_v57, %v1709_v5  ;;  %v555_v0 = vpop.f32.mrb[17].mxu0 }
 0x135   :  { %v963_v12 = vadd.f32 %v1728_v29, %v892_v54  ;;  %1024 = vst [vmem:[%s2235_s7 + $0x40] sm:$0xff] %v960_v59  ;;  %1056 = vst [vmem:[%s2235_s7 + $0x140] sm:$0xff] %v992_v8  ;;  %v961_v14 = vadd.f32 %v1728_v29, %v890_v9  ;;  %v867_v63 = vmul.f32 %v1361_v60, %v1709_v5  ;;  %v1330_v54 = vpop.f32.mrb[18].mxu0  ;;  %v1362_v59 = vpop.f32.mrb[18].mxu1 }
 0x136   :  { %v995_v13 = vadd.f32 %v1728_v29, %v924_v7  ;;  %v993_v15 = vadd.f32 %v1728_v29, %v922_v10  ;;  %v833_v4 = vmul.f32 %v1709_v5, %v555_v0  ;;  %v865_v6 = vmul.f32 %v1709_v5, %v683_v2  ;;  %v686_v16 = vpop.f32.mrb[19].mxu1 }
 0x137   :  { %v1365_v37 = vpop.f32.mrb[20].mxu1 }
 0x13c   :  { %v760_v17 = vld [vmem:[%s2233_s0 + $0x70] sm:$0xff] }
 0x13d   :  { %v792_v19 = vld [vmem:[%s2233_s0 + $0x170] sm:$0xff]  ;;  %v895_v32 = vadd.f32 %v831_v20, %v760_v17 }
 0x13e   :  { %1027 = vst [vmem:[%s2235_s7 + $0x58] sm:$0xff] %v963_v12  ;;  %1059 = vst [vmem:[%s2235_s7 + $0x158] sm:$0xff] %v995_v13  ;;  %v927_v33 = vadd.f32 %v863_v11, %v792_v19  ;;  %v836_v12 = vmul.f32 %v1330_v54, %v1709_v5  ;;  %v868_v13 = vmul.f32 %v1362_v59, %v1709_v5 }
 0x13f   :  { %v966_v46 = vadd.f32 %v1728_v29, %v895_v32  ;;  %v866_v11 = vmul.f32 %v1709_v5, %v686_v16 }
 0x140   :  { %v998_v34 = vadd.f32 %v1728_v29, %v927_v33 }
 0x145   :  { %v758_v22 = vld [vmem:[%s2233_s0 + $0x60] sm:$0xff] }
 0x146   :  { %v790_v24 = vld [vmem:[%s2233_s0 + $0x160] sm:$0xff]  ;;  %v893_v41 = vadd.f32 %v829_v25, %v758_v22 }
 0x147   :  { %1025 = vst [vmem:[%s2235_s7 + $0x48] sm:$0xff] %v961_v14  ;;  %1057 = vst [vmem:[%s2235_s7 + $0x148] sm:$0xff] %v993_v15  ;;  %v925_v42 = vadd.f32 %v861_v26, %v790_v24  ;;  %v558_v14 = vpop.f32.mrb[19].mxu0 }
 0x148   :  { %v964_v48 = vadd.f32 %v1728_v29, %v893_v41  ;;  %v834_v20 = vmul.f32 %v1709_v5, %v558_v14 }
 0x149   :  { %v996_v49 = vadd.f32 %v1728_v29, %v925_v42 }
 0x14e   :  { %v761_v28 = vld [vmem:[%s2233_s0 + $0x78] sm:$0xff]  ;;  %v759_v38 = vld [vmem:[%s2233_s0 + $0x68] sm:$0xff] }
 0x14f   :  { %v793_v31 = vld [vmem:[%s2233_s0 + $0x178] sm:$0xff]  ;;  %v791_v40 = vld [vmem:[%s2233_s0 + $0x168] sm:$0xff]  ;;  %v896_v43 = vadd.f32 %v832_v35, %v761_v28  ;;  %v894_v50 = vadd.f32 %v830_v44, %v759_v38  ;;  %v1333_v35 = vpop.f32.mrb[20].mxu0  ;;  %v699_v44 = vpop.f32.mrb[21].mxu1 }
 0x150   :  { %v928_v47 = vadd.f32 %v864_v36, %v793_v31  ;;  %v926_v51 = vadd.f32 %v862_v45, %v791_v40  ;;  %1030 = vst [vmem:[%s2235_s7 + $0x70] sm:$0xff] %v966_v46  ;;  %1062 = vst [vmem:[%s2235_s7 + $0x170] sm:$0xff] %v998_v34  ;;  %v839_v39 = vmul.f32 %v1333_v35, %v1709_v5  ;;  %v571_v41 = vpop.f32.mrb[21].mxu0 }
 0x151   :  { %v967_v53 = vadd.f32 %v1728_v29, %v896_v43  ;;  %1028 = vst [vmem:[%s2235_s7 + $0x60] sm:$0xff] %v964_v48  ;;  %1060 = vst [vmem:[%s2235_s7 + $0x160] sm:$0xff] %v996_v49  ;;  %v965_v55 = vadd.f32 %v1728_v29, %v894_v50  ;;  %v871_v40 = vmul.f32 %v1365_v37, %v1709_v5  ;;  %v1334_v43 = vpop.f32.mrb[22].mxu0  ;;  %v1366_v48 = vpop.f32.mrb[22].mxu1 }
 0x152   :  { %v999_v52 = vadd.f32 %v1728_v29, %v928_v47  ;;  %v997_v56 = vadd.f32 %v1728_v29, %v926_v51  ;;  %v837_v46 = vmul.f32 %v1709_v5, %v571_v41  ;;  %v869_v34 = vmul.f32 %v1709_v5, %v699_v44  ;;  %v702_v57 = vpop.f32.mrb[23].mxu1 }
 0x153   :  { %v1369_v14 = vpop.f32.mrb[24].mxu1 }
 0x158   :  { %v764_v58 = vld [vmem:[%s2233_s0 + $0x90] sm:$0xff] }
 0x159   :  { %v796_v61 = vld [vmem:[%s2233_s0 + $0x190] sm:$0xff]  ;;  %v899_v9 = vadd.f32 %v835_v62, %v764_v58 }
 0x15a   :  { %1031 = vst [vmem:[%s2235_s7 + $0x78] sm:$0xff] %v967_v53  ;;  %1063 = vst [vmem:[%s2235_s7 + $0x178] sm:$0xff] %v999_v52  ;;  %v931_v10 = vadd.f32 %v867_v63, %v796_v61  ;;  %v840_v53 = vmul.f32 %v1334_v43, %v1709_v5  ;;  %v872_v52 = vmul.f32 %v1366_v48, %v1709_v5 }
 0x15b   :  { %v970_v21 = vadd.f32 %v1728_v29, %v899_v9  ;;  %v870_v63 = vmul.f32 %v1709_v5, %v702_v57 }
 0x15c   :  { %v1002_v22 = vadd.f32 %v1728_v29, %v931_v10 }
 0x161   :  { %v762_v1 = vld [vmem:[%s2233_s0 + $0x80] sm:$0xff] }
 0x162   :  { %v794_v3 = vld [vmem:[%s2233_s0 + $0x180] sm:$0xff]  ;;  %v897_v18 = vadd.f32 %v833_v4, %v762_v1 }
 0x163   :  { %1029 = vst [vmem:[%s2235_s7 + $0x68] sm:$0xff] %v965_v55  ;;  %1061 = vst [vmem:[%s2235_s7 + $0x168] sm:$0xff] %v997_v56  ;;  %v929_v19 = vadd.f32 %v865_v6, %v794_v3  ;;  %v574_v55 = vpop.f32.mrb[23].mxu0 }
 0x164   :  { %v968_v25 = vadd.f32 %v1728_v29, %v897_v18  ;;  %v838_v62 = vmul.f32 %v1709_v5, %v574_v55 }
 0x165   :  { %v1000_v26 = vadd.f32 %v1728_v29, %v929_v19 }
 0x16a   :  { %v765_v7 = vld [vmem:[%s2233_s0 + $0x98] sm:$0xff]  ;;  %v763_v15 = vld [vmem:[%s2233_s0 + $0x88] sm:$0xff] }
 0x16b   :  { %v797_v8 = vld [vmem:[%s2233_s0 + $0x198] sm:$0xff]  ;;  %v795_v17 = vld [vmem:[%s2233_s0 + $0x188] sm:$0xff]  ;;  %v900_v23 = vadd.f32 %v836_v12, %v765_v7  ;;  %v898_v27 = vadd.f32 %v834_v20, %v763_v15  ;;  %v1337_v12 = vpop.f32.mrb[24].mxu0  ;;  %v715_v20 = vpop.f32.mrb[25].mxu1 }
 0x16c   :  { %v932_v24 = vadd.f32 %v868_v13, %v797_v8  ;;  %v930_v28 = vadd.f32 %v866_v11, %v795_v17  ;;  %1034 = vst [vmem:[%s2235_s7 + $0x90] sm:$0xff] %v970_v21  ;;  %1066 = vst [vmem:[%s2235_s7 + $0x190] sm:$0xff] %v1002_v22  ;;  %v843_v16 = vmul.f32 %v1337_v12, %v1709_v5  ;;  %v587_v18 = vpop.f32.mrb[25].mxu0 }
 0x16d   :  { %v971_v30 = vadd.f32 %v1728_v29, %v900_v23  ;;  %1032 = vst [vmem:[%s2235_s7 + $0x80] sm:$0xff] %v968_v25  ;;  %1064 = vst [vmem:[%s2235_s7 + $0x180] sm:$0xff] %v1000_v26  ;;  %v969_v32 = vadd.f32 %v1728_v29, %v898_v27  ;;  %v875_v17 = vmul.f32 %v1369_v14, %v1709_v5  ;;  %v1338_v23 = vpop.f32.mrb[26].mxu0  ;;  %v1370_v25 = vpop.f32.mrb[26].mxu1 }
 0x16e   :  { %v1003_v31 = vadd.f32 %v1728_v29, %v932_v24  ;;  %v1001_v33 = vadd.f32 %v1728_v29, %v930_v28  ;;  %v841_v21 = vmul.f32 %v1709_v5, %v587_v18  ;;  %v873_v22 = vmul.f32 %v1709_v5, %v715_v20  ;;  %v718_v35 = vpop.f32.mrb[27].mxu1 }
 0x16f   :  { %v1373_v55 = vpop.f32.mrb[28].mxu1 }
 0x174   :  { %v768_v36 = vld [vmem:[%s2233_s0 + $0xb0] sm:$0xff] }
 0x175   :  { %v800_v38 = vld [vmem:[%s2233_s0 + $0x1b0] sm:$0xff]  ;;  %v903_v50 = vadd.f32 %v839_v39, %v768_v36 }
 0x176   :  { %1035 = vst [vmem:[%s2235_s7 + $0x98] sm:$0xff] %v971_v30  ;;  %1067 = vst [vmem:[%s2235_s7 + $0x198] sm:$0xff] %v1003_v31  ;;  %v935_v51 = vadd.f32 %v871_v40, %v800_v38  ;;  %v844_v30 = vmul.f32 %v1338_v23, %v1709_v5  ;;  %v876_v31 = vmul.f32 %v1370_v25, %v1709_v5 }
 0x177   :  { %v974_v0 = vadd.f32 %v1728_v29, %v903_v50  ;;  %v874_v40 = vmul.f32 %v1709_v5, %v718_v35 }
 0x178   :  { %v1006_v1 = vadd.f32 %v1728_v29, %v935_v51 }
 0x17d   :  { %v766_v42 = vld [vmem:[%s2233_s0 + $0xa0] sm:$0xff] }
 0x17e   :  { %v798_v45 = vld [vmem:[%s2233_s0 + $0x1a0] sm:$0xff]  ;;  %v901_v60 = vadd.f32 %v837_v46, %v766_v42 }
 0x17f   :  { %1033 = vst [vmem:[%s2235_s7 + $0x88] sm:$0xff] %v969_v32  ;;  %1065 = vst [vmem:[%s2235_s7 + $0x188] sm:$0xff] %v1001_v33  ;;  %v933_v61 = vadd.f32 %v869_v34, %v798_v45  ;;  %v590_v32 = vpop.f32.mrb[27].mxu0 }
 0x180   :  { %v972_v4 = vadd.f32 %v1728_v29, %v901_v60  ;;  %v842_v39 = vmul.f32 %v1709_v5, %v590_v32 }
 0x181   :  { %v1004_v6 = vadd.f32 %v1728_v29, %v933_v61 }
 0x186   :  { %v769_v47 = vld [vmem:[%s2233_s0 + $0xb8] sm:$0xff]  ;;  %v767_v56 = vld [vmem:[%s2233_s0 + $0xa8] sm:$0xff] }
 0x187   :  { %v801_v49 = vld [vmem:[%s2233_s0 + $0x1b8] sm:$0xff]  ;;  %v799_v58 = vld [vmem:[%s2233_s0 + $0x1a8] sm:$0xff]  ;;  %v904_v2 = vadd.f32 %v840_v53, %v769_v47  ;;  %v902_v54 = vadd.f32 %v838_v62, %v767_v56  ;;  %v1341_v53 = vpop.f32.mrb[28].mxu0  ;;  %v731_v62 = vpop.f32.mrb[29].mxu1 }
 0x188   :  { %v936_v3 = vadd.f32 %v872_v52, %v801_v49  ;;  %v934_v7 = vadd.f32 %v870_v63, %v799_v58  ;;  %1038 = vst [vmem:[%s2235_s7 + $0xb0] sm:$0xff] %v974_v0  ;;  %1070 = vst [vmem:[%s2235_s7 + $0x1b0] sm:$0xff] %v1006_v1  ;;  %v847_v57 = vmul.f32 %v1341_v53, %v1709_v5  ;;  %v603_v60 = vpop.f32.mrb[29].mxu0 }
 0x189   :  { %v975_v59 = vadd.f32 %v1728_v29, %v904_v2  ;;  %1036 = vst [vmem:[%s2235_s7 + $0xa0] sm:$0xff] %v972_v4  ;;  %1068 = vst [vmem:[%s2235_s7 + $0x1a0] sm:$0xff] %v1004_v6  ;;  %v973_v9 = vadd.f32 %v1728_v29, %v902_v54  ;;  %v879_v58 = vmul.f32 %v1373_v55, %v1709_v5  ;;  %v1342_v2 = vpop.f32.mrb[30].mxu0  ;;  %v1374_v4 = vpop.f32.mrb[30].mxu1 }
 0x18a   :  { %v1007_v8 = vadd.f32 %v1728_v29, %v936_v3  ;;  %v1005_v10 = vadd.f32 %v1728_v29, %v934_v7  ;;  %v845_v0 = vmul.f32 %v1709_v5, %v603_v60  ;;  %v877_v1 = vmul.f32 %v1709_v5, %v731_v62  ;;  %v734_v12 = vpop.f32.mrb[31].mxu1 }
 0x190   :  { %v772_v13 = vld [vmem:[%s2233_s0 + $0xd0] sm:$0xff] }
 0x191   :  { %v804_v15 = vld [vmem:[%s2233_s0 + $0x1d0] sm:$0xff]  ;;  %v907_v27 = vadd.f32 %v843_v16, %v772_v13 }
 0x192   :  { %1039 = vst [vmem:[%s2235_s7 + $0xb8] sm:$0xff] %v975_v59  ;;  %1071 = vst [vmem:[%s2235_s7 + $0x1b8] sm:$0xff] %v1007_v8  ;;  %v939_v28 = vadd.f32 %v875_v17, %v804_v15  ;;  %v848_v59 = vmul.f32 %v1342_v2, %v1709_v5  ;;  %v880_v8 = vmul.f32 %v1374_v4, %v1709_v5 }
 0x193   :  { %v978_v41 = vadd.f32 %v1728_v29, %v907_v27  ;;  %v878_v17 = vmul.f32 %v1709_v5, %v734_v12 }
 0x194   :  { %v1010_v42 = vadd.f32 %v1728_v29, %v939_v28 }
 0x199   :  { %v770_v19 = vld [vmem:[%s2233_s0 + $0xc0] sm:$0xff] }
 0x19a   :  { %v802_v11 = vld [vmem:[%s2233_s0 + $0x1c0] sm:$0xff]  ;;  %v905_v37 = vadd.f32 %v841_v21, %v770_v19 }
 0x19b   :  { %1037 = vst [vmem:[%s2235_s7 + $0xa8] sm:$0xff] %v973_v9  ;;  %1069 = vst [vmem:[%s2235_s7 + $0x1a8] sm:$0xff] %v1005_v10  ;;  %v937_v38 = vadd.f32 %v873_v22, %v802_v11  ;;  %v606_v9 = vpop.f32.mrb[31].mxu0 }
 0x19c   :  { %v976_v46 = vadd.f32 %v1728_v29, %v905_v37  ;;  %v846_v16 = vmul.f32 %v1709_v5, %v606_v9 }
 0x19d   :  { %v1008_v34 = vadd.f32 %v1728_v29, %v937_v38 }
 0x1a2   :  { %v773_v24 = vld [vmem:[%s2233_s0 + $0xd8] sm:$0xff]  ;;  %v771_v33 = vld [vmem:[%s2233_s0 + $0xc8] sm:$0xff] }
 0x1a3   :  { %v805_v26 = vld [vmem:[%s2233_s0 + $0x1d8] sm:$0xff]  ;;  %v803_v36 = vld [vmem:[%s2233_s0 + $0x1c8] sm:$0xff]  ;;  %v908_v44 = vadd.f32 %v844_v30, %v773_v24  ;;  %v906_v43 = vadd.f32 %v842_v39, %v771_v33 }
 0x1a4   :  { %v940_v45 = vadd.f32 %v876_v31, %v805_v26  ;;  %v938_v47 = vadd.f32 %v874_v40, %v803_v36  ;;  %1042 = vst [vmem:[%s2235_s7 + $0xd0] sm:$0xff] %v978_v41  ;;  %1074 = vst [vmem:[%s2235_s7 + $0x1d0] sm:$0xff] %v1010_v42 }
 0x1a5   :  { %v979_v48 = vadd.f32 %v1728_v29, %v908_v44  ;;  %1040 = vst [vmem:[%s2235_s7 + $0xc0] sm:$0xff] %v976_v46  ;;  %1072 = vst [vmem:[%s2235_s7 + $0x1c0] sm:$0xff] %v1008_v34  ;;  %v977_v50 = vadd.f32 %v1728_v29, %v906_v43 }
 0x1a6   :  { %v1011_v49 = vadd.f32 %v1728_v29, %v940_v45  ;;  %v1009_v51 = vadd.f32 %v1728_v29, %v938_v47 }
 0x1ac   :  { %v776_v52 = vld [vmem:[%s2233_s0 + $0xf0] sm:$0xff] }
 0x1ad   :  { %v808_v56 = vld [vmem:[%s2233_s0 + $0x1f0] sm:$0xff]  ;;  %v911_v54 = vadd.f32 %v847_v57, %v776_v52 }
 0x1ae   :  { %1043 = vst [vmem:[%s2235_s7 + $0xd8] sm:$0xff] %v979_v48  ;;  %1075 = vst [vmem:[%s2235_s7 + $0x1d8] sm:$0xff] %v1011_v49  ;;  %v943_v7 = vadd.f32 %v879_v58, %v808_v56 }
 0x1af   :  { %v982_v18 = vadd.f32 %v1728_v29, %v911_v54 }
 0x1b0   :  { %v1014_v19 = vadd.f32 %v1728_v29, %v943_v7 }
 0x1b5   :  { %v774_v61 = vld [vmem:[%s2233_s0 + $0xe0] sm:$0xff] }
 0x1b6   :  { %v806_v63 = vld [vmem:[%s2233_s0 + $0x1e0] sm:$0xff]  ;;  %v909_v14 = vadd.f32 %v845_v0, %v774_v61 }
 0x1b7   :  { %1041 = vst [vmem:[%s2235_s7 + $0xc8] sm:$0xff] %v977_v50  ;;  %1073 = vst [vmem:[%s2235_s7 + $0x1c8] sm:$0xff] %v1009_v51  ;;  %v941_v15 = vadd.f32 %v877_v1, %v806_v63 }
 0x1b8   :  { %v980_v21 = vadd.f32 %v1728_v29, %v909_v14 }
 0x1b9   :  { %v1012_v22 = vadd.f32 %v1728_v29, %v941_v15 }
 0x1be   :  { %v777_v3 = vld [vmem:[%s2233_s0 + $0xf8] sm:$0xff]  ;;  %v775_v10 = vld [vmem:[%s2233_s0 + $0xe8] sm:$0xff] }
 0x1bf   :  { %v809_v6 = vld [vmem:[%s2233_s0 + $0x1f8] sm:$0xff]  ;;  %v807_v13 = vld [vmem:[%s2233_s0 + $0x1e8] sm:$0xff]  ;;  %v912_v20 = vadd.f32 %v848_v59, %v777_v3  ;;  %v910_v23 = vadd.f32 %v846_v16, %v775_v10 }
 0x1c0   :  { %v944_v11 = vadd.f32 %v880_v8, %v809_v6  ;;  %v942_v24 = vadd.f32 %v878_v17, %v807_v13  ;;  %1046 = vst [vmem:[%s2235_s7 + $0xf0] sm:$0xff] %v982_v18  ;;  %1078 = vst [vmem:[%s2235_s7 + $0x1f0] sm:$0xff] %v1014_v19 }
 0x1c1   :  { %v983_v5 = vadd.f32 %v1728_v29, %v912_v20  ;;  %1044 = vst [vmem:[%s2235_s7 + $0xe0] sm:$0xff] %v980_v21  ;;  %1076 = vst [vmem:[%s2235_s7 + $0x1e0] sm:$0xff] %v1012_v22  ;;  %v981_v26 = vadd.f32 %v1728_v29, %v910_v23 }
 0x1c2   :  { %v1015_v25 = vadd.f32 %v1728_v29, %v944_v11  ;;  %v1013_v27 = vadd.f32 %v1728_v29, %v942_v24 }
 0x1c3   :  { %1047 = vst [vmem:[%s2235_s7 + $0xf8] sm:$0xff] %v983_v5  ;;  %1045 = vst [vmem:[%s2235_s7 + $0xe8] sm:$0xff] %v981_v26 }
 0x1c4   :  { %1079 = vst [vmem:[%s2235_s7 + $0x1f8] sm:$0xff] %v1015_v25  ;;  %1077 = vst [vmem:[%s2235_s7 + $0x1e8] sm:$0xff] %v1013_v27 }

// kernel: resblock_forward.4
= control target key start
LH: loop header
LB: loop body
LE: loop exit
PB: predicated region body
PF: predicated region fallthrough
CT: control target
= control target key end

     0   :  { %vm939_vm0 = vcmask 1040384   ;;  %s1739_s3 = inlined_call_operand.vmem [shape: bf16[128,128], index: 3, kind: input, shape index: {}]   ;;  %s1740_s0 = inlined_call_operand.vmem [shape: bf16[512,128], index: 0, kind: input, shape index: {}]   ;;  %s1741_s1 = inlined_call_operand.vmem [shape: f32[1,128], index: 1, kind: input, shape index: {}]   ;;  %s1742_s2 = inlined_call_operand.vmem [shape: f32[1,128], index: 2, kind: input, shape index: {}]   ;;  %s1743_s4 = inlined_call_operand.vmem [shape: f32[1,2,128], index: 4, kind: output, shape index: {}]  }
   0x1   :  { %v1251_v0 = vld [vmem:[%s1739_s3] sm:$0xff]   ;;  %v1252_v1 = vld [vmem:[%s1739_s3 + $0x8] sm:$0xff]   ;;  %v1253_v2 = vld [vmem:[%s1739_s3 + $0x10] sm:$0xff]  }
   0x2   :  { %1155 = vmatprep.subr.bf16.mxu0 %v1251_v0  ;;  %1235 = vmatprep.subr.bf16.mxu1 %v1251_v0  ;;  %v1254_v3 = vld [vmem:[%s1739_s3 + $0x18] sm:$0xff]   ;;  %v957_v4 = vld [vmem:[%s1740_s0] sm:$0xff]   ;;  %v1084_v8 = vld [vmem:[%s1740_s0 + $0x8] sm:$0xff]  }
   0x3   :  { %1156 = vmatpush3.bf16.msra.mxu0 %v1251_v0  ;;  %1243 = vmatpush3.bf16.msra.mxu1 %v1251_v0  ;;  %v1302_v5 = vld [vmem:[%s1741_s1] ss:$0 sm:$0xff]  ;;  %v958_v6 = vunpack.c.l.bf16 %v957_v4  ;;  %v959_v7 = vunpack.c.h.bf16 %v957_v4  ;;  %v1085_v9 = vld [vmem:[%s1740_s0 + $0x10] sm:$0xff]   ;;  %v962_v14 = vunpack.c.l.bf16 %v1084_v8  ;;  %v963_v15 = vunpack.c.h.bf16 %v1084_v8  ;;  %v1256_v22 = vld [vmem:[%s1739_s3 + $0x28] sm:$0xff]  }
   0x4   :  { %1157 = vmatprep.subr.bf16.mxu0 %v1252_v1  ;;  %1236 = vmatprep.subr.bf16.mxu1 %v1252_v1  ;;  %v1313_v10 = vld [vmem:[%s1742_s2] ss:$0 sm:$0xff]  ;;  %v966_v16 = vunpack.c.l.bf16 %v1085_v9  ;;  %v967_v19 = vunpack.c.h.bf16 %v1085_v9  ;;  %v1086_v26 = vld [vmem:[%s1740_s0 + $0x18] sm:$0xff]   ;;  %v1257_v31 = vld [vmem:[%s1739_s3 + $0x30] sm:$0xff]  }
   0x5   :  { %v153_v11 = vmul.f32 %v958_v6, %v1302_v5  ;;  %v154_v12 = vmul.f32 %v959_v7, %v1302_v5  ;;  %v1255_v13 = vld [vmem:[%s1739_s3 + $0x20] sm:$0xff]   ;;  %v155_v23 = vmul.f32 %v962_v14, %v1302_v5  ;;  %v156_v24 = vmul.f32 %v963_v15, %v1302_v5  ;;  %v1088_v38 = vld [vmem:[%s1740_s0 + $0x28] sm:$0xff]   ;;  %v1089_v41 = vld [vmem:[%s1740_s0 + $0x30] sm:$0xff]  }
   0x6   :  { %v157_v25 = vmul.f32 %v966_v16, %v1302_v5  ;;  %v158_v28 = vmul.f32 %v967_v19, %v1302_v5  ;;  %v1087_v29 = vld [vmem:[%s1740_s0 + $0x20] sm:$0xff]   ;;  %v970_v30 = vunpack.c.l.bf16 %v1086_v26  ;;  %v971_v35 = vunpack.c.h.bf16 %v1086_v26  ;;  %v1090_v42 = vld [vmem:[%s1740_s0 + $0x38] sm:$0xff]   ;;  %v1092_v63 = vld [vmem:[%s1740_s0 + $0x48] sm:$0xff]  }
   0x7   :  { %1158 = vmatpush3.bf16.msra.mxu0 %v1252_v1  ;;  %1244 = vmatpush3.bf16.msra.mxu1 %v1252_v1  ;;  %v224_v17 = vadd.f32 %v1313_v10, %v153_v11  ;;  %v225_v18 = vadd.f32 %v1313_v10, %v154_v12  ;;  %v226_v32 = vadd.f32 %v1313_v10, %v155_v23  ;;  %v974_v37 = vunpack.c.l.bf16 %v1087_v29  ;;  %v1258_v43 = vld [vmem:[%s1739_s3 + $0x38] sm:$0xff]   ;;  %v1091_v48 = vld [vmem:[%s1740_s0 + $0x40] sm:$0xff]   ;;  %v1093_v4 = vld [vmem:[%s1740_s0 + $0x50] sm:$0xff]  }
   0x8   :  { %1159 = vmatprep.subr.bf16.mxu0 %v1253_v2  ;;  %1237 = vmatprep.subr.bf16.mxu1 %v1253_v2  ;;  %v227_v33 = vadd.f32 %v1313_v10, %v156_v24  ;;  %v228_v34 = vadd.f32 %v1313_v10, %v157_v25  ;;  %v229_v36 = vadd.f32 %v1313_v10, %v158_v28  ;;  %v975_v40 = vunpack.c.h.bf16 %v1087_v29  ;;  %v1094_v23 = vld [vmem:[%s1740_s0 + $0x58] sm:$0xff]  }
   0x9   :  { %v288_v20 = vmax.f32 %v224_v17, 0.0  ;;  %v289_v21 = vmax.f32 %v225_v18, 0.0  ;;  %v159_v39 = vmul.f32 %v970_v30, %v1302_v5  ;;  %v290_v44 = vmax.f32 %v226_v32, 0.0 }
   0xa   :  { %v291_v45 = vmax.f32 %v227_v33, 0.0  ;;  %v292_v46 = vmax.f32 %v228_v34, 0.0  ;;  %v160_v47 = vmul.f32 %v971_v35, %v1302_v5  ;;  %v293_v49 = vmax.f32 %v229_v36, 0.0 }
   0xb   :  { %1160 = vmatpush3.bf16.msra.mxu0 %v1253_v2  ;;  %1245 = vmatpush3.bf16.msra.mxu1 %v1253_v2  ;;  %v352_v27 = vpack.c.bf16 %v289_v21, %v288_v20  ;;  %v161_v50 = vmul.f32 %v974_v37, %v1302_v5  ;;  %v978_v51 = vunpack.c.l.bf16 %v1088_v38  ;;  %v979_v52 = vunpack.c.h.bf16 %v1088_v38 }
   0xc   :  { %1161 = vmatprep.subr.bf16.mxu0 %v1254_v3  ;;  %1238 = vmatprep.subr.bf16.mxu1 %v1254_v3  ;;  %v982_v53 = vunpack.c.l.bf16 %v1089_v41  ;;  %v983_v54 = vunpack.c.h.bf16 %v1089_v41  ;;  %v986_v55 = vunpack.c.l.bf16 %v1090_v42  ;;  %v987_v56 = vunpack.c.h.bf16 %v1090_v42 }
   0xd   :  { %1171 = vmatprep.mubr.bf16.mxu0 %v352_v27  ;;  %v162_v57 = vmul.f32 %v975_v40, %v1302_v5  ;;  %v990_v58 = vunpack.c.l.bf16 %v1091_v48  ;;  %v991_v59 = vunpack.c.h.bf16 %v1091_v48  ;;  %v353_v60 = vpack.c.bf16 %v291_v45, %v290_v44  ;;  %v1099_v44 = vld [vmem:[%s1740_s0 + $0x80] sm:$0xff]  }
   0xe   :  { %v230_v61 = vadd.f32 %v1313_v10, %v159_v39  ;;  %v231_v62 = vadd.f32 %v1313_v10, %v160_v47  ;;  %v354_v0 = vpack.c.bf16 %v293_v49, %v292_v46  ;;  %v232_v1 = vadd.f32 %v1313_v10, %v161_v50 }
   0xf   :  { %1162 = vmatpush3.bf16.msra.mxu0 %v1254_v3  ;;  %1246 = vmatpush3.bf16.msra.mxu1 %v1254_v3  ;;  %v163_v2 = vmul.f32 %v978_v51, %v1302_v5  ;;  %v164_v3 = vmul.f32 %v979_v52, %v1302_v5  ;;  %v165_v6 = vmul.f32 %v982_v53, %v1302_v5  ;;  %v994_v14 = vunpack.c.l.bf16 %v1092_v63  ;;  %v1406_v52 = vld [vmem:[%s1740_s0 + $0x60] sm:$0xff]  }
  0x10   :  { %1163 = vmatprep.subr.bf16.mxu0 %v1255_v13  ;;  %1239 = vmatprep.subr.bf16.mxu1 %v1255_v13  ;;  %v166_v7 = vmul.f32 %v983_v54, %v1302_v5  ;;  %v167_v8 = vmul.f32 %v986_v55, %v1302_v5  ;;  %v168_v9 = vmul.f32 %v987_v56, %v1302_v5  ;;  %v294_v15 = vmax.f32 %v230_v61, 0.0 }
  0x11   :  { %v233_v11 = vadd.f32 %v1313_v10, %v162_v57  ;;  %v169_v12 = vmul.f32 %v990_v58, %v1302_v5  ;;  %v295_v16 = vmax.f32 %v231_v62, 0.0  ;;  %v995_v17 = vunpack.c.h.bf16 %v1092_v63 }
  0x12   :  { %v998_v18 = vunpack.c.l.bf16 %v1093_v4  ;;  %v296_v19 = vmax.f32 %v232_v1, 0.0  ;;  %v234_v20 = vadd.f32 %v1313_v10, %v163_v2  ;;  %v235_v21 = vadd.f32 %v1313_v10, %v164_v3 }
  0x13   :  { %1164 = vmatpush3.bf16.msra.mxu0 %v1255_v13  ;;  %1247 = vmatpush3.bf16.msra.mxu1 %v1255_v13  ;;  %v170_v13 = vmul.f32 %v991_v59, %v1302_v5  ;;  %v236_v24 = vadd.f32 %v1313_v10, %v165_v6  ;;  %v237_v25 = vadd.f32 %v1313_v10, %v166_v7  ;;  %v297_v28 = vmax.f32 %v233_v11, 0.0  ;;  %v1100_v59 = vld [vmem:[%s1740_s0 + $0x88] sm:$0xff]   ;;  %v1102_v11 = vld [vmem:[%s1740_s0 + $0x98] sm:$0xff]  }
  0x14   :  { %1165 = vmatprep.subr.bf16.mxu0 %v1256_v22  ;;  %1240 = vmatprep.subr.bf16.mxu1 %v1256_v22  ;;  %v238_v26 = vadd.f32 %v1313_v10, %v167_v8  ;;  %v239_v27 = vadd.f32 %v1313_v10, %v168_v9  ;;  %v240_v29 = vadd.f32 %v1313_v10, %v169_v12  ;;  %v1002_v35 = vunpack.c.l.bf16 %v1094_v23 }
  0x15   :  { %v241_v30 = vadd.f32 %v1313_v10, %v170_v13  ;;  %v355_v32 = vpack.c.bf16 %v295_v16, %v294_v15  ;;  %v172_v33 = vmul.f32 %v995_v17, %v1302_v5  ;;  %v173_v34 = vmul.f32 %v998_v18, %v1302_v5 }
  0x16   :  { %v298_v36 = vmax.f32 %v234_v20, 0.0  ;;  %v299_v37 = vmax.f32 %v235_v21, 0.0  ;;  %v1003_v39 = vunpack.c.h.bf16 %v1094_v23  ;;  %v300_v40 = vmax.f32 %v236_v24, 0.0  ;;  %v1103_v24 = vld [vmem:[%s1740_s0 + $0xa0] sm:$0xff]  }
  0x17   :  { %1166 = vmatpush3.bf16.msra.mxu0 %v1256_v22  ;;  %1248 = vmatpush3.bf16.msra.mxu1 %v1256_v22  ;;  %v999_v22 = vunpack.c.h.bf16 %v1093_v4  ;;  %v301_v41 = vmax.f32 %v237_v25, 0.0  ;;  %v302_v42 = vmax.f32 %v238_v26, 0.0  ;;  %v356_v45 = vpack.c.bf16 %v297_v28, %v296_v19 }
  0x18   :  { %1167 = vmatprep.subr.bf16.mxu0 %v1257_v31  ;;  %1241 = vmatprep.subr.bf16.mxu1 %v1257_v31  ;;  %v304_v46 = vmax.f32 %v240_v29, 0.0  ;;  %v305_v47 = vmax.f32 %v241_v30, 0.0  ;;  %v243_v49 = vadd.f32 %v1313_v10, %v172_v33  ;;  %v1400_v50 = vadd.f32 %v1313_v10, %v173_v34  ;;  %v1104_v33 = vld [vmem:[%s1740_s0 + $0xa8] sm:$0xff]  }
  0x19   :  { %v174_v38 = vmul.f32 %v999_v22, %v1302_v5  ;;  %v175_v51 = vmul.f32 %v1002_v35, %v1302_v5  ;;  %v176_v54 = vmul.f32 %v1003_v39, %v1302_v5  ;;  %v1022_v55 = vunpack.c.l.bf16 %v1099_v44 }
  0x1a   :  { %v357_v56 = vpack.c.bf16 %v299_v37, %v298_v36  ;;  %v358_v57 = vpack.c.bf16 %v301_v41, %v300_v40  ;;  %v1006_v62 = vunpack.c.l.bf16 %v1406_v52  ;;  %v1023_v63 = vunpack.c.h.bf16 %v1099_v44 }
  0x1b   :  { %1168 = vmatpush3.bf16.msra.mxu0 %v1257_v31  ;;  %1249 = vmatpush3.bf16.msra.mxu1 %v1257_v31  ;;  %v171_v31 = vmul.f32 %v994_v14, %v1302_v5  ;;  %v1409_v53 = vadd.f32 %v1313_v10, %v174_v38  ;;  %v307_v1 = vmax.f32 %v243_v49, 0.0  ;;  %v308_v2 = vmax.f32 %v1400_v50, 0.0 }
  0x1c   :  { %1169 = vmatprep.subr.bf16.mxu0 %v1258_v43  ;;  %1242 = vmatprep.subr.bf16.mxu1 %v1258_v43  ;;  %v1425_v3 = vadd.f32 %v1313_v10, %v175_v51  ;;  %v185_v4 = vmul.f32 %v1022_v55, %v1302_v5  ;;  %v1430_v7 = vadd.f32 %v1313_v10, %v176_v54  ;;  %v1026_v9 = vunpack.c.l.bf16 %v1100_v59 }
  0x1d   :  { %v242_v48 = vadd.f32 %v1313_v10, %v171_v31  ;;  %v309_v6 = vmax.f32 %v1409_v53, 0.0  ;;  %v186_v8 = vmul.f32 %v1023_v63, %v1302_v5  ;;  %v1007_v12 = vunpack.c.h.bf16 %v1406_v52 }
  0x1e   :  { %v256_v13 = vadd.f32 %v1313_v10, %v185_v4  ;;  %v1027_v14 = vunpack.c.h.bf16 %v1100_v59  ;;  %v1439_v16 = vmul.f32 %v1006_v62, %v1302_v5  ;;  %v187_v18 = vmul.f32 %v1026_v9, %v1302_v5 }
  0x1f   :  { %1170 = vmatpush3.bf16.msra.mxu0 %v1258_v43  ;;  %1250 = vmatpush3.bf16.msra.mxu1 %v1258_v43  ;;  %v303_v43 = vmax.f32 %v239_v27, 0.0  ;;  %v306_v61 = vmax.f32 %v242_v48, 0.0  ;;  %v257_v17 = vadd.f32 %v1313_v10, %v186_v8  ;;  %v1034_v23 = vunpack.c.l.bf16 %v1102_v11 }
  0x20   :  { %v320_v20 = vmax.f32 %v256_v13, 0.0  ;;  %v188_v21 = vmul.f32 %v1027_v14, %v1302_v5  ;;  %v258_v27 = vadd.f32 %v1313_v10, %v187_v18  ;;  %v1035_v31 = vunpack.c.h.bf16 %v1102_v11  ;;  %v1107_v18 = vld [vmem:[%s1740_s0 + $0xc0] sm:$0xff]  }
  0x21   :  { %v1412_v58 = vpack.c.bf16 %v303_v43, %v302_v42  ;;  %v1448_v25 = vpack.c.bf16 %v307_v1, %v306_v61  ;;  %v321_v26 = vmax.f32 %v257_v17, 0.0  ;;  %v1038_v37 = vunpack.c.l.bf16 %v1103_v24  ;;  %v1106_v1 = vld [vmem:[%s1740_s0 + $0xb8] sm:$0xff]  }
  0x22   :  { %1172 = vmatmul.mubr.bf16.vlgmr.msra.gmra.mrb[0].mxu0 %v353_v60  ;;  %v1417_v60 = vpack.c.bf16 %v305_v47, %v304_v46  ;;  %v259_v29 = vadd.f32 %v1313_v10, %v188_v21  ;;  %v322_v35 = vmax.f32 %v258_v27, 0.0  ;;  %v192_v40 = vmul.f32 %v1035_v31, %v1302_v5  ;;  %v1105_v46 = vld [vmem:[%s1740_s0 + $0xb0] sm:$0xff]   ;;  %v1096_v47 = vld [vmem:[%s1740_s0 + $0x68] sm:$0xff]  }
  0x23   :  { %1175 = vmatprep.mubr.bf16.mxu0 %v354_v0  ;;  %v1101_v0 = vld [vmem:[%s1740_s0 + $0x90] sm:$0xff]   ;;  %v368_v34 = vpack.c.bf16 %v321_v26, %v320_v20  ;;  %v1039_v43 = vunpack.c.h.bf16 %v1103_v24  ;;  %v193_v44 = vmul.f32 %v1038_v37, %v1302_v5  ;;  %v1043_v54 = vunpack.c.h.bf16 %v1104_v33 }
  0x24   :  { %v1030_v15 = vunpack.c.l.bf16 %v1101_v0  ;;  %v1031_v19 = vunpack.c.h.bf16 %v1101_v0  ;;  %v323_v38 = vmax.f32 %v259_v29, 0.0  ;;  %v263_v49 = vadd.f32 %v1313_v10, %v192_v40  ;;  %v1109_v40 = vld [vmem:[%s1740_s0 + $0xd0] sm:$0xff]  }
  0x25   :  { %1203 = vmatprep.mubr.bf16.mxu1 %v368_v34  ;;  %v196_v62 = vmul.f32 %v1043_v54, %v1302_v5  ;;  %v1046_v63 = vunpack.c.l.bf16 %v1105_v46  ;;  %v1047_v0 = vunpack.c.h.bf16 %v1105_v46  ;;  %v310_v4 = vmax.f32 %v1425_v3, 0.0 }
  0x26   :  { %v189_v22 = vmul.f32 %v1030_v15, %v1302_v5  ;;  %v190_v28 = vmul.f32 %v1031_v19, %v1302_v5  ;;  %v369_v48 = vpack.c.bf16 %v323_v38, %v322_v35  ;;  %v327_v61 = vmax.f32 %v263_v49, 0.0 }
  0x27   :  { %v1010_v8 = vunpack.c.l.bf16 %v1096_v47  ;;  %v311_v13 = vmax.f32 %v1430_v7, 0.0  ;;  %v1011_v14 = vunpack.c.h.bf16 %v1096_v47  ;;  %v197_v15 = vmul.f32 %v1046_v63, %v1302_v5 }
  0x28   :  { %v260_v30 = vadd.f32 %v1313_v10, %v189_v22  ;;  %v261_v36 = vadd.f32 %v1313_v10, %v190_v28  ;;  %1204 = vmatmul.mubr.bf16.vlgmr.msra.gmra.mrb[0].mxu1 %v369_v48  ;;  %v198_v17 = vmul.f32 %v1047_v0, %v1302_v5  ;;  %v178_v3 = vmul.f32 %v1007_v12, %v1302_v5 }
  0x29   :  { %v1050_v19 = vunpack.c.l.bf16 %v1106_v1  ;;  %v1051_v20 = vunpack.c.h.bf16 %v1106_v1  ;;  %v268_v24 = vadd.f32 %v1313_v10, %v197_v15  ;;  %v1054_v27 = vunpack.c.l.bf16 %v1107_v18  ;;  %v1110_v15 = vld [vmem:[%s1740_s0 + $0xd8] sm:$0xff]  }
  0x2a   :  { %1176 = vmatmul.mubr.bf16.gmra.mrb[4].mxu0 %v355_v32  ;;  %v191_v32 = vmul.f32 %v1034_v23, %v1302_v5  ;;  %v324_v39 = vmax.f32 %v260_v30, 0.0  ;;  %v325_v42 = vmax.f32 %v261_v36, 0.0  ;;  %v267_v23 = vadd.f32 %v1313_v10, %v196_v62 }
  0x2b   :  { %1179 = vmatprep.mubr.bf16.mxu0 %v356_v45  ;;  %v1042_v45 = vunpack.c.l.bf16 %v1104_v33  ;;  %v1055_v52 = vunpack.c.h.bf16 %v1107_v18  ;;  %v362_v12 = vpack.c.bf16 %v309_v6, %v308_v2  ;;  %v248_v28 = vadd.f32 %v1313_v10, %v1439_v16  ;;  %v1098_v33 = vld [vmem:[%s1740_s0 + $0x78] sm:$0xff]   ;;  %v1108_v16 = vld [vmem:[%s1740_s0 + $0xc8] sm:$0xff]  }
  0x2c   :  { %v262_v41 = vadd.f32 %v1313_v10, %v191_v32  ;;  %v370_v55 = vpack.c.bf16 %v325_v42, %v324_v39  ;;  %v249_v31 = vadd.f32 %v1313_v10, %v178_v3  ;;  %v179_v32 = vmul.f32 %v1010_v8, %v1302_v5 }
  0x2d   :  { %v195_v59 = vmul.f32 %v1042_v45, %v1302_v5  ;;  %v199_v34 = vmul.f32 %v1050_v19, %v1302_v5  ;;  %v200_v50 = vmul.f32 %v1051_v20, %v1302_v5  ;;  %v363_v35 = vpack.c.bf16 %v311_v13, %v310_v4 }
  0x2e   :  { %v326_v51 = vmax.f32 %v262_v41, 0.0  ;;  %1207 = vmatprep.mubr.bf16.mxu1 %v370_v55  ;;  %v180_v53 = vmul.f32 %v1011_v14, %v1302_v5  ;;  %v331_v6 = vmax.f32 %v267_v23, 0.0  ;;  %v332_v36 = vmax.f32 %v268_v24, 0.0 }
  0x2f   :  { %v266_v22 = vadd.f32 %v1313_v10, %v195_v59  ;;  %v201_v38 = vmul.f32 %v1054_v27, %v1302_v5  ;;  %v202_v39 = vmul.f32 %v1055_v52, %v1302_v5  ;;  %v312_v41 = vmax.f32 %v248_v28, 0.0 }
  0x30   :  { %v371_v21 = vpack.c.bf16 %v327_v61, %v326_v51  ;;  %v313_v45 = vmax.f32 %v249_v31, 0.0  ;;  %v270_v46 = vadd.f32 %v1313_v10, %v199_v34  ;;  %v271_v47 = vadd.f32 %v1313_v10, %v200_v50 }
  0x31   :  { %v330_v2 = vmax.f32 %v266_v22, 0.0  ;;  %v1058_v48 = vunpack.c.l.bf16 %v1108_v16  ;;  %v1059_v51 = vunpack.c.h.bf16 %v1108_v16  ;;  %v1062_v54 = vunpack.c.l.bf16 %v1109_v40 }
  0x32   :  { %1180 = vmatmul.mubr.bf16.gmra.mrb[8].mxu0 %v357_v56  ;;  %v194_v56 = vmul.f32 %v1039_v43, %v1302_v5  ;;  %1208 = vmatmul.mubr.bf16.gmra.mrb[4].mxu1 %v371_v21  ;;  %v1063_v55 = vunpack.c.h.bf16 %v1109_v40  ;;  %v273_v59 = vadd.f32 %v1313_v10, %v202_v39  ;;  %v251_v61 = vadd.f32 %v1313_v10, %v180_v53  ;;  %v1111_v21 = vld [vmem:[%s1740_s0 + $0xe0] sm:$0xff]  }
  0x33   :  { %1183 = vmatprep.mubr.bf16.mxu0 %v358_v57  ;;  %v264_v57 = vadd.f32 %v1313_v10, %v193_v44  ;;  %v1018_v44 = vunpack.c.l.bf16 %v1098_v33  ;;  %v373_v49 = vpack.c.bf16 %v331_v6, %v330_v2  ;;  %v1019_v0 = vunpack.c.h.bf16 %v1098_v33 }
  0x34   :  { %v265_v9 = vadd.f32 %v1313_v10, %v194_v56  ;;  %v250_v56 = vadd.f32 %v1313_v10, %v179_v32  ;;  %v364_v1 = vpack.c.bf16 %v313_v45, %v312_v41  ;;  %v334_v4 = vmax.f32 %v270_v46, 0.0  ;;  %v1113_v41 = vld [vmem:[%s1740_s0 + $0xf0] sm:$0xff]  }
  0x35   :  { %v328_v11 = vmax.f32 %v264_v57, 0.0  ;;  %v272_v57 = vadd.f32 %v1313_v10, %v201_v38  ;;  %v335_v8 = vmax.f32 %v271_v47, 0.0  ;;  %v205_v13 = vmul.f32 %v1062_v54, %v1302_v5 }
  0x36   :  { %v329_v7 = vmax.f32 %v265_v9, 0.0  ;;  %v203_v9 = vmul.f32 %v1058_v48, %v1302_v5  ;;  %v206_v14 = vmul.f32 %v1063_v55, %v1302_v5  ;;  %v337_v3 = vmax.f32 %v273_v59, 0.0 }
  0x37   :  { %v336_v18 = vmax.f32 %v272_v57, 0.0  ;;  %v184_v20 = vmul.f32 %v1019_v0, %v1302_v5  ;;  %v375_v23 = vpack.c.bf16 %v335_v8, %v334_v4  ;;  %v276_v27 = vadd.f32 %v1313_v10, %v205_v13 }
  0x38   :  { %v372_v26 = vpack.c.bf16 %v329_v7, %v328_v11  ;;  %v204_v11 = vmul.f32 %v1059_v51, %v1302_v5  ;;  %v315_v7 = vmax.f32 %v251_v61, 0.0  ;;  %v274_v24 = vadd.f32 %v1313_v10, %v203_v9 }
  0x39   :  { %v277_v52 = vadd.f32 %v1313_v10, %v206_v14  ;;  %v376_v28 = vpack.c.bf16 %v337_v3, %v336_v18  ;;  %v255_v33 = vadd.f32 %v1313_v10, %v184_v20  ;;  %v340_v2 = vmax.f32 %v276_v27, 0.0 }
  0x3a   :  { %1184 = vmatmul.mubr.bf16.gmra.mrb[12].mxu0 %v1412_v58  ;;  %v1097_v58 = vld [vmem:[%s1740_s0 + $0x70] sm:$0xff]   ;;  %1211 = vmatprep.mubr.bf16.mxu1 %v372_v26  ;;  %v1066_v26 = vunpack.c.l.bf16 %v1110_v15  ;;  %v338_v50 = vmax.f32 %v274_v24, 0.0  ;;  %v1078_v51 = vunpack.c.l.bf16 %v1113_v41  ;;  %v1079_v54 = vunpack.c.h.bf16 %v1113_v41 }
  0x3b   :  { %1187 = vmatprep.mubr.bf16.mxu0 %v1417_v60  ;;  %v269_v60 = vadd.f32 %v1313_v10, %v198_v17  ;;  %v1014_v29 = vunpack.c.l.bf16 %v1097_v58  ;;  %v1015_v30 = vunpack.c.h.bf16 %v1097_v58  ;;  %1212 = vmatmul.mubr.bf16.gmra.mrb[8].mxu1 %v373_v49  ;;  %v183_v17 = vmul.f32 %v1018_v44, %v1302_v5 }
  0x3c   :  { %v314_v58 = vmax.f32 %v250_v56, 0.0  ;;  %v341_v6 = vmax.f32 %v277_v52, 0.0  ;;  %v319_v40 = vmax.f32 %v255_v33, 0.0  ;;  %v214_v0 = vmul.f32 %v1079_v54, %v1302_v5 }
  0x3d   :  { %v333_v37 = vmax.f32 %v269_v60, 0.0  ;;  %v181_v42 = vmul.f32 %v1014_v29, %v1302_v5  ;;  %v182_v43 = vmul.f32 %v1015_v30, %v1302_v5  ;;  %v275_v60 = vadd.f32 %v1313_v10, %v204_v11 }
  0x3e   :  { %v1070_v29 = vunpack.c.l.bf16 %v1111_v21  ;;  %v1071_v30 = vunpack.c.h.bf16 %v1111_v21  ;;  %v365_v31 = vpack.c.bf16 %v315_v7, %v314_v58  ;;  %v254_v32 = vadd.f32 %v1313_v10, %v183_v17 }
  0x3f   :  { %v252_v62 = vadd.f32 %v1313_v10, %v181_v42  ;;  %v253_v63 = vadd.f32 %v1313_v10, %v182_v43  ;;  %v339_v53 = vmax.f32 %v275_v60, 0.0  ;;  %v378_v45 = vpack.c.bf16 %v341_v6, %v340_v2 }
  0x40   :  { %v210_v38 = vmul.f32 %v1071_v30, %v1302_v5  ;;  %v318_v39 = vmax.f32 %v254_v32, 0.0  ;;  %v285_v17 = vadd.f32 %v1313_v10, %v214_v0 }
  0x41   :  { %v316_v19 = vmax.f32 %v252_v62, 0.0  ;;  %v317_v22 = vmax.f32 %v253_v63, 0.0  ;;  %v377_v44 = vpack.c.bf16 %v339_v53, %v338_v50  ;;  %v213_v63 = vmul.f32 %v1078_v51, %v1302_v5 }
  0x42   :  { %1188 = vmatmul.mubr.bf16.gmra.mrb[16].mxu0 %v1448_v25  ;;  %v374_v25 = vpack.c.bf16 %v333_v37, %v332_v36  ;;  %v1112_v36 = vld [vmem:[%s1740_s0 + $0xe8] sm:$0xff]   ;;  %v209_v37 = vmul.f32 %v1070_v29, %v1302_v5  ;;  %v281_v49 = vadd.f32 %v1313_v10, %v210_v38  ;;  %v367_v55 = vpack.c.bf16 %v319_v40, %v318_v39 }
  0x43   :  { %1191 = vmatprep.mubr.bf16.mxu0 %v362_v12  ;;  %v1067_v12 = vunpack.c.h.bf16 %v1110_v15  ;;  %v366_v34 = vpack.c.bf16 %v317_v22, %v316_v19  ;;  %v1074_v43 = vunpack.c.l.bf16 %v1112_v36  ;;  %v1075_v47 = vunpack.c.h.bf16 %v1112_v36 }
  0x44   :  { %1215 = vmatprep.mubr.bf16.mxu1 %v374_v25  ;;  %v280_v48 = vadd.f32 %v1313_v10, %v209_v37  ;;  %v345_v62 = vmax.f32 %v281_v49, 0.0  ;;  %v284_v15 = vadd.f32 %v1313_v10, %v213_v63  ;;  %v349_v20 = vmax.f32 %v285_v17, 0.0 }
  0x45   :  { %1216 = vmatmul.mubr.bf16.gmra.mrb[12].mxu1 %v375_v23  ;;  %v208_v16 = vmul.f32 %v1067_v12, %v1302_v5  ;;  %v211_v56 = vmul.f32 %v1074_v43, %v1302_v5  ;;  %v212_v59 = vmul.f32 %v1075_v47, %v1302_v5 }
  0x46   :  { %1219 = vmatprep.mubr.bf16.mxu1 %v376_v28  ;;  %v344_v61 = vmax.f32 %v280_v48, 0.0  ;;  %v348_v19 = vmax.f32 %v284_v15, 0.0 }
  0x47   :  { %v279_v46 = vadd.f32 %v1313_v10, %v208_v16  ;;  %v282_v4 = vadd.f32 %v1313_v10, %v211_v56  ;;  %v283_v9 = vadd.f32 %v1313_v10, %v212_v59 }
  0x48   :  { %v380_v14 = vpack.c.bf16 %v345_v62, %v344_v61  ;;  %v382_v24 = vpack.c.bf16 %v349_v20, %v348_v19 }
  0x49   :  { %v343_v57 = vmax.f32 %v279_v46, 0.0  ;;  %v346_v18 = vmax.f32 %v282_v4, 0.0  ;;  %v347_v3 = vmax.f32 %v283_v9, 0.0 }
  0x4a   :  { %1192 = vmatmul.mubr.bf16.gmra.mrb[20].mxu0 %v363_v35  ;;  %v207_v35 = vmul.f32 %v1066_v26, %v1302_v5 }
  0x4b   :  { %1195 = vmatprep.mubr.bf16.mxu0 %v364_v1  ;;  %v1114_v1 = vld [vmem:[%s1740_s0 + $0xf8] sm:$0xff]   ;;  %v381_v21 = vpack.c.bf16 %v347_v3, %v346_v18 }
  0x4c   :  { %v278_v42 = vadd.f32 %v1313_v10, %v207_v35  ;;  %v1082_v11 = vunpack.c.l.bf16 %v1114_v1  ;;  %v1083_v13 = vunpack.c.h.bf16 %v1114_v1 }
  0x4d   :  { %1220 = vmatmul.mubr.bf16.gmra.mrb[16].mxu1 %v377_v44 }
  0x4e   :  { %v342_v25 = vmax.f32 %v278_v42, 0.0  ;;  %1223 = vmatprep.mubr.bf16.mxu1 %v378_v45  ;;  %v215_v58 = vmul.f32 %v1082_v11, %v1302_v5  ;;  %v216_v7 = vmul.f32 %v1083_v13, %v1302_v5 }
  0x50   :  { %v379_v8 = vpack.c.bf16 %v343_v57, %v342_v25  ;;  %v286_v22 = vadd.f32 %v1313_v10, %v215_v58  ;;  %v287_v23 = vadd.f32 %v1313_v10, %v216_v7 }
  0x52   :  { %1196 = vmatmul.mubr.bf16.gmra.mrb[24].mxu0 %v365_v31  ;;  %v350_v26 = vmax.f32 %v286_v22, 0.0  ;;  %v351_v60 = vmax.f32 %v287_v23, 0.0 }
  0x53   :  { %1199 = vmatprep.mubr.bf16.mxu0 %v366_v34 }
  0x54   :  { %v383_v27 = vpack.c.bf16 %v351_v60, %v350_v26 }
  0x55   :  { %1224 = vmatmul.mubr.bf16.gmra.mrb[20].mxu1 %v379_v8 }
  0x56   :  { %1227 = vmatprep.mubr.bf16.mxu1 %v380_v14 }
  0x5a   :  { %1200 = vmatmul.mubr.bf16.gmra.mrb[28].mxu0 %v367_v55 }
  0x5d   :  { %1228 = vmatmul.mubr.bf16.gmra.mrb[24].mxu1 %v381_v21 }
  0x5e   :  { %1231 = vmatprep.mubr.bf16.mxu1 %v382_v24 }
  0x65   :  { %1232 = vmatmul.mubr.bf16.gmra.mrb[28].mxu1 %v383_v27 }
  0xf5   :  { %v1173_v52 = vpop.f32.mrb[0].mxu0 }
  0xf6   :  { %v482_v12 = vpop.f32.mrb[1].mxu0  ;;  %v808_v32 = vmul.f32 %v1173_v52, %v1173_v52 }
  0xf7   :  { %v1174_v28 = vpop.f32.mrb[2].mxu0  ;;  %v806_v5 = vmul.f32 %v482_v12, %v482_v12 }
  0xf8   :  { %v485_v29 = vpop.f32.mrb[3].mxu0  ;;  %v809_v50 = vmul.f32 %v1174_v28, %v1174_v28 }
  0xf9   :  { %v737_v30 = vadd.f32 %v485_v29, %v482_v12  ;;  %v807_v31 = vmul.f32 %v485_v29, %v485_v29 }
  0xfb   :  { %v738_v33 = vadd.f32 %v1173_v52, %v737_v30  ;;  %v870_v34 = vadd.f32 %v807_v31, %v806_v5  ;;  %v1576_v1 = vpop.f32.mrb[0].mxu1 }
  0xfc   :  { %v1578_v4 = vpop.f32.mrb[1].mxu1 }
  0xfd   :  { %v871_v35 = vadd.f32 %v870_v34, %v808_v32  ;;  %v1177_v10 = vpop.f32.mrb[4].mxu0  ;;  %v739_v53 = vadd.f32 %v1174_v28, %v738_v33  ;;  %v1580_v14 = vpop.f32.mrb[2].mxu1 }
  0xfe   :  { %v498_v2 = vpop.f32.mrb[5].mxu0  ;;  %v812_v42 = vmul.f32 %v1177_v10, %v1177_v10  ;;  %v1582_v17 = vpop.f32.mrb[3].mxu1 }
  0xff   :  { %v740_v6 = vadd.f32 %v739_v53, %v498_v2  ;;  %v810_v16 = vmul.f32 %v498_v2, %v498_v2  ;;  %v872_v36 = vadd.f32 %v871_v35, %v809_v50  ;;  %v1178_v37 = vpop.f32.mrb[6].mxu0 }
 0x100   :  { %v501_v38 = vpop.f32.mrb[7].mxu0  ;;  %v813_v45 = vmul.f32 %v1178_v37, %v1178_v37 }
 0x101   :  { %v873_v39 = vadd.f32 %v872_v36, %v810_v16  ;;  %v741_v40 = vadd.f32 %v740_v6, %v501_v38  ;;  %v811_v41 = vmul.f32 %v501_v38, %v501_v38 }
 0x103   :  { %v742_v43 = vadd.f32 %v1177_v10, %v741_v40  ;;  %v874_v44 = vadd.f32 %v873_v39, %v811_v41 }
 0x105   :  { %v875_v46 = vadd.f32 %v874_v44, %v812_v42  ;;  %v1181_v47 = vpop.f32.mrb[8].mxu0  ;;  %v743_v48 = vadd.f32 %v1178_v37, %v742_v43  ;;  %v1584_v60 = vpop.f32.mrb[4].mxu1 }
 0x106   :  { %v514_v49 = vpop.f32.mrb[9].mxu0  ;;  %v816_v62 = vmul.f32 %v1181_v47, %v1181_v47  ;;  %v1586_v27 = vpop.f32.mrb[5].mxu1 }
 0x107   :  { %v744_v51 = vadd.f32 %v743_v48, %v514_v49  ;;  %v814_v54 = vmul.f32 %v514_v49, %v514_v49  ;;  %v876_v55 = vadd.f32 %v875_v46, %v813_v45  ;;  %v1182_v56 = vpop.f32.mrb[10].mxu0  ;;  %v1588_v5 = vpop.f32.mrb[6].mxu1 }
 0x108   :  { %v517_v25 = vpop.f32.mrb[11].mxu0  ;;  %v817_v8 = vmul.f32 %v1182_v56, %v1182_v56  ;;  %v1590_v31 = vpop.f32.mrb[7].mxu1 }
 0x109   :  { %v877_v57 = vadd.f32 %v876_v55, %v814_v54  ;;  %v745_v59 = vadd.f32 %v744_v51, %v517_v25  ;;  %v815_v61 = vmul.f32 %v517_v25, %v517_v25 }
 0x10b   :  { %v746_v63 = vadd.f32 %v1181_v47, %v745_v59  ;;  %v878_v0 = vadd.f32 %v877_v57, %v815_v61 }
 0x10d   :  { %v879_v9 = vadd.f32 %v878_v0, %v816_v62  ;;  %v1185_v11 = vpop.f32.mrb[12].mxu0  ;;  %v747_v13 = vadd.f32 %v1182_v56, %v746_v63 }
 0x10e   :  { %v530_v15 = vpop.f32.mrb[13].mxu0  ;;  %v820_v23 = vmul.f32 %v1185_v11, %v1185_v11  ;;  %v1592_v37 = vpop.f32.mrb[8].mxu1 }
 0x10f   :  { %v748_v18 = vadd.f32 %v747_v13, %v530_v15  ;;  %v818_v3 = vmul.f32 %v530_v15, %v530_v15  ;;  %v880_v58 = vadd.f32 %v879_v9, %v817_v8  ;;  %v1186_v7 = vpop.f32.mrb[14].mxu0  ;;  %v1594_v38 = vpop.f32.mrb[9].mxu1 }
 0x110   :  { %v533_v19 = vpop.f32.mrb[15].mxu0  ;;  %v821_v52 = vmul.f32 %v1186_v7, %v1186_v7  ;;  %v1596_v43 = vpop.f32.mrb[10].mxu1 }
 0x111   :  { %v881_v20 = vadd.f32 %v880_v58, %v818_v3  ;;  %v749_v21 = vadd.f32 %v748_v18, %v533_v19  ;;  %v819_v22 = vmul.f32 %v533_v19, %v533_v19  ;;  %v1598_v45 = vpop.f32.mrb[11].mxu1 }
 0x113   :  { %v750_v24 = vadd.f32 %v1185_v11, %v749_v21  ;;  %v882_v26 = vadd.f32 %v881_v20, %v819_v22 }
 0x115   :  { %v883_v12 = vadd.f32 %v882_v26, %v820_v23  ;;  %v1189_v28 = vpop.f32.mrb[16].mxu0  ;;  %v751_v29 = vadd.f32 %v1186_v7, %v750_v24 }
 0x116   :  { %v546_v30 = vpop.f32.mrb[17].mxu0  ;;  %v824_v6 = vmul.f32 %v1189_v28, %v1189_v28 }
 0x117   :  { %v752_v32 = vadd.f32 %v751_v29, %v546_v30  ;;  %v822_v33 = vmul.f32 %v546_v30, %v546_v30  ;;  %v884_v34 = vadd.f32 %v883_v12, %v821_v52  ;;  %v1190_v50 = vpop.f32.mrb[18].mxu0 }
 0x118   :  { %v549_v35 = vpop.f32.mrb[19].mxu0  ;;  %v825_v39 = vmul.f32 %v1190_v50, %v1190_v50  ;;  %v1600_v61 = vpop.f32.mrb[12].mxu1 }
 0x119   :  { %v885_v10 = vadd.f32 %v884_v34, %v822_v33  ;;  %v753_v53 = vadd.f32 %v752_v32, %v549_v35  ;;  %v823_v2 = vmul.f32 %v549_v35, %v549_v35  ;;  %v1602_v62 = vpop.f32.mrb[13].mxu1 }
 0x11a   :  { %v1604_v11 = vpop.f32.mrb[14].mxu1 }
 0x11b   :  { %v754_v16 = vadd.f32 %v1189_v28, %v753_v53  ;;  %v886_v36 = vadd.f32 %v885_v10, %v823_v2  ;;  %v1606_v15 = vpop.f32.mrb[15].mxu1 }
 0x11d   :  { %v887_v40 = vadd.f32 %v886_v36, %v824_v6  ;;  %v1193_v41 = vpop.f32.mrb[20].mxu0  ;;  %v755_v42 = vadd.f32 %v1190_v50, %v754_v16 }
 0x11e   :  { %v562_v44 = vpop.f32.mrb[21].mxu0  ;;  %v828_v25 = vmul.f32 %v1193_v41, %v1193_v41 }
 0x11f   :  { %v756_v46 = vadd.f32 %v755_v42, %v562_v44  ;;  %v826_v47 = vmul.f32 %v562_v44, %v562_v44  ;;  %v888_v48 = vadd.f32 %v887_v40, %v825_v39  ;;  %v1194_v49 = vpop.f32.mrb[22].mxu0 }
 0x120   :  { %v565_v51 = vpop.f32.mrb[23].mxu0  ;;  %v829_v63 = vmul.f32 %v1194_v49, %v1194_v49  ;;  %v1608_v52 = vpop.f32.mrb[16].mxu1 }
 0x121   :  { %v889_v54 = vadd.f32 %v888_v48, %v826_v47  ;;  %v757_v55 = vadd.f32 %v756_v46, %v565_v51  ;;  %v827_v56 = vmul.f32 %v565_v51, %v565_v51  ;;  %v1610_v12 = vpop.f32.mrb[17].mxu1  ;;  %v838_v51 = vmul.f32 %v1578_v4, %v1578_v4 }
 0x122   :  { %v1612_v33 = vpop.f32.mrb[18].mxu1 }
 0x123   :  { %v758_v57 = vadd.f32 %v1193_v41, %v757_v55  ;;  %v890_v59 = vadd.f32 %v889_v54, %v827_v56  ;;  %v1614_v50 = vpop.f32.mrb[19].mxu1 }
 0x125   :  { %v891_v0 = vadd.f32 %v890_v59, %v828_v25  ;;  %v1197_v8 = vpop.f32.mrb[24].mxu0  ;;  %v759_v9 = vadd.f32 %v1194_v49, %v758_v57 }
 0x126   :  { %v578_v13 = vpop.f32.mrb[25].mxu0  ;;  %v832_v23 = vmul.f32 %v1197_v8, %v1197_v8 }
 0x127   :  { %v760_v18 = vadd.f32 %v759_v9, %v578_v13  ;;  %v830_v3 = vmul.f32 %v578_v13, %v578_v13  ;;  %v892_v58 = vadd.f32 %v891_v0, %v829_v63  ;;  %v1198_v7 = vpop.f32.mrb[26].mxu0  ;;  %v839_v63 = vmul.f32 %v1582_v17, %v1582_v17 }
 0x128   :  { %v581_v19 = vpop.f32.mrb[27].mxu0  ;;  %v833_v28 = vmul.f32 %v1198_v7, %v1198_v7  ;;  %v1616_v44 = vpop.f32.mrb[20].mxu1  ;;  %v840_v0 = vmul.f32 %v1576_v1, %v1576_v1 }
 0x129   :  { %v893_v20 = vadd.f32 %v892_v58, %v830_v3  ;;  %v761_v21 = vadd.f32 %v760_v18, %v581_v19  ;;  %v831_v22 = vmul.f32 %v581_v19, %v581_v19  ;;  %v1618_v46 = vpop.f32.mrb[21].mxu1 }
 0x12a   :  { %v1622_v54 = vpop.f32.mrb[22].mxu1 }
 0x12b   :  { %v762_v24 = vadd.f32 %v1197_v8, %v761_v21  ;;  %v894_v26 = vadd.f32 %v893_v20, %v831_v22  ;;  %v1624_v55 = vpop.f32.mrb[23].mxu1 }
 0x12d   :  { %v895_v29 = vadd.f32 %v894_v26, %v832_v23  ;;  %v1201_v30 = vpop.f32.mrb[28].mxu0  ;;  %v763_v32 = vadd.f32 %v1198_v7, %v762_v24  ;;  %v842_v7 = vmul.f32 %v1586_v27, %v1586_v27  ;;  %v843_v23 = vmul.f32 %v1590_v31, %v1590_v31 }
 0x12e   :  { %v594_v34 = vpop.f32.mrb[29].mxu0  ;;  %v836_v40 = vmul.f32 %v1201_v30, %v1201_v30  ;;  %v844_v24 = vmul.f32 %v1584_v60, %v1584_v60 }
 0x12f   :  { %v764_v35 = vadd.f32 %v763_v32, %v594_v34  ;;  %v834_v10 = vmul.f32 %v594_v34, %v594_v34  ;;  %v896_v53 = vadd.f32 %v895_v29, %v833_v28  ;;  %v1202_v2 = vpop.f32.mrb[30].mxu0  ;;  %v846_v34 = vmul.f32 %v1594_v38, %v1594_v38 }
 0x130   :  { %v597_v6 = vpop.f32.mrb[31].mxu0  ;;  %v837_v47 = vmul.f32 %v1202_v2, %v1202_v2  ;;  %v1633_v13 = vpop.f32.mrb[24].mxu1 }
 0x131   :  { %v897_v16 = vadd.f32 %v896_v53, %v834_v10  ;;  %v765_v36 = vadd.f32 %v764_v35, %v597_v6  ;;  %v835_v39 = vmul.f32 %v597_v6, %v597_v6  ;;  %v1635_v18 = vpop.f32.mrb[25].mxu1  ;;  %v847_v6 = vmul.f32 %v1598_v45, %v1598_v45 }
 0x133   :  { %v766_v41 = vadd.f32 %v1201_v30, %v765_v36  ;;  %v898_v42 = vadd.f32 %v897_v16, %v835_v39  ;;  %v848_v16 = vmul.f32 %v1592_v37, %v1592_v37  ;;  %v849_v39 = vmul.f32 %v1596_v43, %v1596_v43 }
 0x135   :  { %v899_v48 = vadd.f32 %v898_v42, %v836_v40  ;;  %v767_v49 = vadd.f32 %v1202_v2, %v766_v41 }
 0x137   :  { %v768_v56 = vadd.f32 %v767_v49, %v1578_v4  ;;  %v900_v25 = vadd.f32 %v899_v48, %v837_v47  ;;  %v841_v4 = vmul.f32 %v1580_v14, %v1580_v14  ;;  %v851_v49 = vmul.f32 %v1606_v15, %v1606_v15 }
 0x139   :  { %v901_v57 = vadd.f32 %v900_v25, %v838_v51  ;;  %v769_v59 = vadd.f32 %v768_v56, %v1582_v17  ;;  %v1642_v17 = vpop.f32.mrb[26].mxu1 }
 0x13a   :  { %v1644_v19 = vpop.f32.mrb[27].mxu1 }
 0x13b   :  { %v770_v8 = vadd.f32 %v1576_v1, %v769_v59  ;;  %v902_v9 = vadd.f32 %v901_v57, %v839_v63  ;;  %v1653_v28 = vpop.f32.mrb[28].mxu1 }
 0x13c   :  { %v1655_v29 = vpop.f32.mrb[29].mxu1 }
 0x13d   :  { %v903_v3 = vadd.f32 %v902_v9, %v840_v0  ;;  %v771_v58 = vadd.f32 %v1580_v14, %v770_v8  ;;  %v855_v8 = vmul.f32 %v1614_v50, %v1614_v50 }
 0x13f   :  { %v772_v1 = vadd.f32 %v771_v58, %v1586_v27  ;;  %v904_v20 = vadd.f32 %v903_v3, %v841_v4  ;;  %v845_v27 = vmul.f32 %v1588_v5, %v1588_v5 }
 0x141   :  { %v905_v21 = vadd.f32 %v904_v20, %v842_v7  ;;  %v773_v22 = vadd.f32 %v772_v1, %v1590_v31  ;;  %v1662_v31 = vpop.f32.mrb[30].mxu1 }
 0x142   :  { %v1664_v35 = vpop.f32.mrb[31].mxu1 }
 0x143   :  { %v774_v14 = vadd.f32 %v1584_v60, %v773_v22  ;;  %v906_v26 = vadd.f32 %v905_v21, %v843_v23  ;;  %v859_v21 = vmul.f32 %v1624_v55, %v1624_v55 }
 0x145   :  { %v907_v30 = vadd.f32 %v906_v26, %v844_v24  ;;  %v775_v32 = vadd.f32 %v1588_v5, %v774_v14 }
 0x147   :  { %v776_v60 = vadd.f32 %v775_v32, %v1594_v38  ;;  %v908_v10 = vadd.f32 %v907_v30, %v845_v27  ;;  %v850_v38 = vmul.f32 %v1602_v62, %v1602_v62  ;;  %v863_v32 = vmul.f32 %v1644_v19, %v1644_v19 }
 0x149   :  { %v909_v53 = vadd.f32 %v908_v10, %v846_v34  ;;  %v777_v2 = vadd.f32 %v776_v60, %v1598_v45 }
 0x14b   :  { %v778_v5 = vadd.f32 %v1592_v37, %v777_v2  ;;  %v910_v36 = vadd.f32 %v909_v53, %v847_v6  ;;  %v852_v37 = vmul.f32 %v1600_v61, %v1600_v61 }
 0x14d   :  { %v911_v40 = vadd.f32 %v910_v36, %v848_v16  ;;  %v779_v41 = vadd.f32 %v1596_v43, %v778_v5  ;;  %v853_v43 = vmul.f32 %v1604_v11, %v1604_v11  ;;  %v867_v5 = vmul.f32 %v1664_v35, %v1664_v35 }
 0x14f   :  { %v780_v42 = vadd.f32 %v779_v41, %v1602_v62  ;;  %v912_v47 = vadd.f32 %v911_v40, %v849_v39  ;;  %v854_v62 = vmul.f32 %v1610_v12, %v1610_v12 }
 0x151   :  { %v913_v48 = vadd.f32 %v912_v47, %v850_v38  ;;  %v781_v45 = vadd.f32 %v780_v42, %v1606_v15 }
 0x153   :  { %v782_v51 = vadd.f32 %v1600_v61, %v781_v45  ;;  %v914_v56 = vadd.f32 %v913_v48, %v851_v49  ;;  %v856_v61 = vmul.f32 %v1608_v52, %v1608_v52 }
 0x155   :  { %v915_v25 = vadd.f32 %v914_v56, %v852_v37  ;;  %v783_v57 = vadd.f32 %v1604_v11, %v782_v51  ;;  %v857_v11 = vmul.f32 %v1612_v33, %v1612_v33 }
 0x157   :  { %v784_v59 = vadd.f32 %v783_v57, %v1610_v12  ;;  %v916_v63 = vadd.f32 %v915_v25, %v853_v43  ;;  %v858_v12 = vmul.f32 %v1618_v46, %v1618_v46 }
 0x159   :  { %v917_v0 = vadd.f32 %v916_v63, %v854_v62  ;;  %v785_v15 = vadd.f32 %v784_v59, %v1614_v50 }
 0x15b   :  { %v786_v9 = vadd.f32 %v1608_v52, %v785_v15  ;;  %v918_v4 = vadd.f32 %v917_v0, %v855_v8  ;;  %v860_v52 = vmul.f32 %v1616_v44, %v1616_v44 }
 0x15d   :  { %v919_v3 = vadd.f32 %v918_v4, %v856_v61  ;;  %v787_v58 = vadd.f32 %v1612_v33, %v786_v9  ;;  %v861_v33 = vmul.f32 %v1622_v54, %v1622_v54 }
 0x15f   :  { %v788_v7 = vadd.f32 %v787_v58, %v1618_v46  ;;  %v920_v1 = vadd.f32 %v919_v3, %v857_v11  ;;  %v862_v46 = vmul.f32 %v1635_v18, %v1635_v18 }
 0x161   :  { %v921_v20 = vadd.f32 %v920_v1, %v858_v12  ;;  %v789_v50 = vadd.f32 %v788_v7, %v1624_v55 }
 0x163   :  { %v790_v22 = vadd.f32 %v1616_v44, %v789_v50  ;;  %v922_v23 = vadd.f32 %v921_v20, %v859_v21  ;;  %v864_v44 = vmul.f32 %v1633_v13, %v1633_v13 }
 0x165   :  { %v923_v24 = vadd.f32 %v922_v23, %v860_v52  ;;  %v791_v14 = vadd.f32 %v1622_v54, %v790_v22  ;;  %v865_v54 = vmul.f32 %v1642_v17, %v1642_v17 }
 0x167   :  { %v792_v26 = vadd.f32 %v791_v14, %v1635_v18  ;;  %v924_v27 = vadd.f32 %v923_v24, %v861_v33  ;;  %v866_v18 = vmul.f32 %v1655_v29, %v1655_v29 }
 0x169   :  { %v925_v30 = vadd.f32 %v924_v27, %v862_v46  ;;  %v793_v55 = vadd.f32 %v792_v26, %v1644_v19 }
 0x16b   :  { %v794_v34 = vadd.f32 %v1633_v13, %v793_v55  ;;  %v926_v60 = vadd.f32 %v925_v30, %v863_v32  ;;  %v868_v13 = vmul.f32 %v1653_v28, %v1653_v28 }
 0x16d   :  { %v927_v10 = vadd.f32 %v926_v60, %v864_v44  ;;  %v795_v53 = vadd.f32 %v1642_v17, %v794_v34  ;;  %v869_v17 = vmul.f32 %v1662_v31, %v1662_v31 }
 0x16f   :  { %v796_v2 = vadd.f32 %v795_v53, %v1655_v29  ;;  %v928_v6 = vadd.f32 %v927_v10, %v865_v54 }
 0x171   :  { %v929_v16 = vadd.f32 %v928_v6, %v866_v18  ;;  %v797_v19 = vadd.f32 %v796_v2, %v1664_v35 }
 0x173   :  { %v798_v36 = vadd.f32 %v1653_v28, %v797_v19  ;;  %v930_v39 = vadd.f32 %v929_v16, %v867_v5 }
 0x175   :  { %v799_v40 = vadd.f32 %v1662_v31, %v798_v36  ;;  %v931_v41 = vadd.f32 %v930_v39, %v868_v13 }
 0x177   :  { %v800_v29 = vrot.slane %v799_v40, 4  ;;  %v932_v38 = vadd.f32 %v931_v41, %v869_v17 }
 0x179   :  { %v801_v42 = vadd.f32 %v800_v29, %v799_v40  ;;  %v933_v47 = vrot.slane %v932_v38, 4 }
 0x17b   :  { %v802_v48 = vrot.slane %v801_v42, 2  ;;  %v934_v45 = vadd.f32 %v933_v47, %v932_v38 }
 0x17d   :  { %v803_v49 = vadd.f32 %v802_v48, %v801_v42  ;;  %v935_v35 = vrot.slane %v934_v45, 2 }
 0x17f   :  { %v804_v37 = vrot.slane %v803_v49, 1  ;;  %v936_v51 = vadd.f32 %v935_v35, %v934_v45 }
 0x181   :  { %v937_v56 = vrot.slane %v936_v51, 1  ;;  %v805_v28 = vadd.f32 %v804_v37, %v803_v49 }
 0x183   :  { %v938_v43 = vadd.f32 %v937_v56, %v936_v51 }
 0x185   :  { %v940_v25 = vsel %vm939_vm0, %v805_v28, %v938_v43 }
 0x186   :  { %941 = vst [vmem:[%s1743_s4] sm:$0x3] %v940_v25 }

// kernel: resblock_forward.3
= control target key start
LH: loop header
LB: loop body
LE: loop exit
PB: predicated region body
PF: predicated region fallthrough
CT: control target
= control target key end

     0   :  { %s4092_s12 = smov 0   ;;  %s5175_s0 = inlined_call_operand.vmem [shape: f32[2,16,16,128], index: 0, kind: input, shape index: {}]   ;;  %s5176_s1 = inlined_call_operand.vmem [shape: bf16[3,384,128], index: 1, kind: input, shape index: {}]   ;;  %s5177_s2 = inlined_call_operand.vmem [shape: bf16[512,128], index: 2, kind: output, shape index: {0}]   ;;  %s5178_s3 = inlined_call_operand.vmem [shape: f32[2,2,128], index: 3, kind: output, shape index: {1}]  }
   0x1 LB: > { %s4098_s13 = sadd.s32 4294967295, %s4069_s12   ;;  %p2918_p0 = scmp.ge.s32.totalorder %s4069_s12, 1  ;;  %s4069_s12 = sphi %s4092_s12, %s14_s12  }
   0x2   : > { %p140_p1 = scmp.lt.s32.totalorder %s4069_s12, 3 }
   0x4   : > { %p141_p2 = pnand %p2918_p0, %p140_p1 }
   0x6   : > { %144 = sbr.rel (%p141_p2) target bundleno = 569 (0x239), region = 28 }
   0xd   : > { %v3991_v0 = vld [vmem:[%s5176_s1 + $0x40] sm:$0xff]   ;;  %v4071_v2 = vmov 0   ;;  %v3994_v4 = vld [vmem:[%s5176_s1 + $0x48] sm:$0xff]   ;;  %v3997_v7 = vld [vmem:[%s5176_s1 + $0x50] sm:$0xff]   ;;  %p168_p3 = scmp.lt.s32.totalorder %s4098_s13, 1  ;;  %vm546_vm0 = vcmask 1047552  }
   0xe   : > { %v4108_v1 = vld [vmem:[%s5176_s1 + $0x80] sm:$0xff]   ;;  %853 = vmatprep.mubr.bf16.mxu0 %v4071_v2  ;;  %3254 = vmatprep.subr.bf16.mxu0 %v3991_v0  ;;  %v4122_v5 = vld [vmem:[%s5176_s1 + $0x88] sm:$0xff]   ;;  %v4134_v8 = vld [vmem:[%s5176_s1 + $0x90] sm:$0xff]   ;;  %vm547_vm1 = vsmask.f32 7424  ;;  %vm446_vm3 = vcmask 1040384  }
   0xf   : > { %v3993_v3 = vld [vmem:[%s5176_s1] sm:$0xff]   ;;  %3806 = vmatprep.subr.bf16.mxu1 %v4108_v1  ;;  %v3996_v6 = vld [vmem:[%s5176_s1 + $0x8] sm:$0xff]   ;;  %v3999_v9 = vld [vmem:[%s5176_s1 + $0x10] sm:$0xff]   ;;  %s4164_s17 = scalar_select %p168_p3, %s4098_s13, 1  ;;  %vm447_vm4 = vsmask.f32 256 }
  0x10   : > { %3255 = vmatpush3.bf16.msra.mxu0 %v3993_v3  ;;  %3814 = vmatpush3.bf16.msra.mxu1 %v4108_v1  ;;  %v4000_v10 = vld [vmem:[%s5176_s1 + $0x58] sm:$0xff]   ;;  %v4003_v13 = vld [vmem:[%s5176_s1 + $0x60] sm:$0xff]   ;;  %v4006_v16 = vld [vmem:[%s5176_s1 + $0x68] sm:$0xff]   ;;  %s2921_s20 = sshll.u32 %s4098_s13, 5 }
  0x11   : > { %3256 = vmatprep.subr.bf16.mxu0 %v3994_v4  ;;  %3807 = vmatprep.subr.bf16.mxu1 %v4122_v5  ;;  %v4147_v11 = vld [vmem:[%s5176_s1 + $0x98] sm:$0xff]   ;;  %v4161_v14 = vld [vmem:[%s5176_s1 + $0xa0] sm:$0xff]   ;;  %v4177_v17 = vld [vmem:[%s5176_s1 + $0xa8] sm:$0xff]   ;;  %s3126_s24 = sshll.u32 %s4164_s17, 8  ;;  %p174_p4 = scmp.lt.s32.totalorder %s2921_s20, 63 }
  0x12   : > { %v4002_v12 = vld [vmem:[%s5176_s1 + $0x18] sm:$0xff]   ;;  %v4005_v15 = vld [vmem:[%s5176_s1 + $0x20] sm:$0xff]   ;;  %v4008_v18 = vld [vmem:[%s5176_s1 + $0x28] sm:$0xff]   ;;  %s4196_s6 = scalar_lea.vmem %s5175_s0, %s3126_s24  ;;  %s2923_s24 = sshll.u32 %s4164_s17, 1 }
  0x13   : > { %v4009_v19 = vld [vmem:[%s5176_s1 + $0x70] sm:$0xff]   ;;  %v4012_v22 = vld [vmem:[%s5176_s1 + $0x78] sm:$0xff]   ;;  %v200_v26 = vld [vmem:[%s4196_s6 + $0x80] sm:$0xff]  ;;  %s5186_s20 = smov (!%p174_p4, %s2921_s20), 63  ;;  %s182_s27 = scalar_lea.vmem %s5178_s3, %s2923_s24 }
  0x14   : > { %3257 = vmatpush3.bf16.msra.mxu0 %v3996_v6  ;;  %3815 = vmatpush3.bf16.msra.mxu1 %v4122_v5  ;;  %v4191_v20 = vld [vmem:[%s5176_s1 + $0xb0] sm:$0xff]   ;;  %v4207_v23 = vld [vmem:[%s5176_s1 + $0xb8] sm:$0xff]   ;;  %v201_v29 = vld [vmem:[%s4196_s6 + $0x88] sm:$0xff]  ;;  %v232_v30 = vmax.f32 %v200_v26, 0.0  ;;  %s2922_s13 = sshll.u32 %s5186_s20, 2 }
  0x15   : > { %3258 = vmatprep.subr.bf16.mxu0 %v3997_v7  ;;  %3808 = vmatprep.subr.bf16.mxu1 %v4134_v8  ;;  %v4011_v21 = vld [vmem:[%s5176_s1 + $0x30] sm:$0xff]   ;;  %v199_v25 = vld [vmem:[%s4196_s6 + $0x78] sm:$0xff]  ;;  %v233_v31 = vmax.f32 %v201_v29, 0.0  ;;  %v4015_v37 = vld [vmem:[%s5176_s1 + $0x100] sm:$0xff]   ;;  %s5105_s23 = scalar_lea.vmem %s5177_s2, %s2922_s13 }
  0x16   : > { %v198_v24 = vld [vmem:[%s4196_s6 + $0x70] sm:$0xff]  ;;  %v231_v28 = vmax.f32 %v199_v25, 0.0  ;;  %v4014_v32 = vld [vmem:[%s5176_s1 + $0x38] sm:$0xff]   ;;  %v184_v38 = vld [vmem:[%s4196_s6] sm:$0xff] }
  0x17   : > { %v230_v27 = vmax.f32 %v198_v24, 0.0  ;;  %v4221_v34 = vpack.c.bf16 %v233_v31, %v232_v30  ;;  %v185_v41 = vld [vmem:[%s4196_s6 + $0x8] sm:$0xff]  ;;  %v216_v42 = vmax.f32 %v184_v38, 0.0  ;;  %v202_v43 = vld [vmem:[%s4196_s6 + $0x90] sm:$0xff]  ;;  %v203_v44 = vld [vmem:[%s4196_s6 + $0x98] sm:$0xff] }
  0x18   : > { %3259 = vmatpush3.bf16.msra.mxu0 %v3999_v9  ;;  %3816 = vmatpush3.bf16.msra.mxu1 %v4134_v8  ;;  %v217_v46 = vmax.f32 %v185_v41, 0.0  ;;  %v234_v47 = vmax.f32 %v202_v43, 0.0  ;;  %v235_v48 = vmax.f32 %v203_v44, 0.0  ;;  %v204_v49 = vld [vmem:[%s4196_s6 + $0xa0] sm:$0xff]  ;;  %v205_v50 = vld [vmem:[%s4196_s6 + $0xa8] sm:$0xff]  ;;  %vm4242_vm2 = vmand %vm546_vm0, %vm547_vm1 }
  0x19   : > { %3260 = vmatprep.subr.bf16.mxu0 %v4000_v10  ;;  %3809 = vmatprep.subr.bf16.mxu1 %v4147_v11  ;;  %v4218_v33 = vpack.c.bf16 %v231_v28, %v230_v27  ;;  %v375_v39 = vshrl.u32 %v4221_v34, 16  ;;  %v378_v40 = vshll.u32 %v4221_v34, 16  ;;  %v4016_v53 = vld [vmem:[%s5176_s1 + $0xc0] sm:$0xff]   ;;  %v236_v54 = vmax.f32 %v204_v49, 0.0  ;;  %v4017_v60 = vld [vmem:[%s5176_s1 + $0x108] sm:$0xff]   ;;  %vm4287_vm5 = vmand %vm446_vm3, %vm447_vm4 }
  0x1a   : > { %v237_v55 = vmax.f32 %v205_v50, 0.0  ;;  %v4252_v57 = vpack.c.bf16 %v217_v46, %v216_v42  ;;  %v4254_v58 = vpack.c.bf16 %v235_v48, %v234_v47  ;;  %v4018_v7 = vld [vmem:[%s5176_s1 + $0xc8] sm:$0xff]   ;;  %v187_v24 = vld [vmem:[%s4196_s6 + $0x18] sm:$0xff]  ;;  %v206_v29 = vld [vmem:[%s4196_s6 + $0xb0] sm:$0xff] }
  0x1b   : > { %v368_v35 = vshrl.u32 %v4218_v33, 16  ;;  %v371_v36 = vshll.u32 %v4218_v33, 16  ;;  %v514_v52 = vrot.slane %v378_v40, 1  ;;  %v377_v62 = vrot.slane %v375_v39, 7  ;;  %v207_v30 = vld [vmem:[%s4196_s6 + $0xb8] sm:$0xff]  ;;  %v208_v31 = vld [vmem:[%s4196_s6 + $0xc0] sm:$0xff] }
  0x1c   : > { %3261 = vmatpush3.bf16.msra.mxu0 %v4002_v12  ;;  %3817 = vmatpush3.bf16.msra.mxu1 %v4147_v11  ;;  %v4259_v61 = vpack.c.bf16 %v237_v55, %v236_v54  ;;  %v382_v0 = vshrl.u32 %v4254_v58, 16  ;;  %v385_v3 = vshll.u32 %v4254_v58, 16  ;;  %v319_v4 = vshrl.u32 %v4252_v57, 16  ;;  %v4020_v43 = vld [vmem:[%s5176_s1 + $0xd0] sm:$0xff]   ;;  %v4021_v46 = vld [vmem:[%s5176_s1 + $0x118] sm:$0xff]  }
  0x1d   : > { %3262 = vmatprep.subr.bf16.mxu0 %v4003_v13  ;;  %3810 = vmatprep.subr.bf16.mxu1 %v4161_v14  ;;  %v512_v45 = vrot.slane %v371_v36, 1  ;;  %v515_v59 = vor.u32 %v514_v52, %v375_v39  ;;  %v322_v9 = vshll.u32 %v4252_v57, 16  ;;  %v219_v28 = vmax.f32 %v187_v24, 0.0  ;;  %v209_v39 = vld [vmem:[%s4196_s6 + $0xc8] sm:$0xff] }
  0x1e   : > { %v389_v10 = vshrl.u32 %v4259_v61, 16  ;;  %v392_v12 = vshll.u32 %v4259_v61, 16  ;;  %v516_v13 = vrot.slane %v385_v3, 1  ;;  %v239_v38 = vmax.f32 %v207_v30, 0.0  ;;  %v213_v24 = vld [vmem:[%s4196_s6 + $0xe8] sm:$0xff] }
  0x1f   : > { %v513_v56 = vor.u32 %v512_v45, %v368_v35  ;;  %v4272_v6 = vsel %vm4242_vm2, %v515_v59, 0  ;;  %v241_v45 = vmax.f32 %v209_v39, 0.0 }
  0x20   : > { %3263 = vmatpush3.bf16.msra.mxu0 %v4005_v15  ;;  %3818 = vmatpush3.bf16.msra.mxu1 %v4161_v14  ;;  %v517_v25 = vor.u32 %v516_v13, %v382_v0  ;;  %v211_v13 = vld [vmem:[%s4196_s6 + $0xd8] sm:$0xff]  ;;  %v4056_v15 = vld [vmem:[%s5176_s1 + $0x208] sm:$0xff]  }
  0x21   : > { %3264 = vmatprep.subr.bf16.mxu0 %v4006_v16  ;;  %3811 = vmatprep.subr.bf16.mxu1 %v4177_v17  ;;  %v4263_v63 = vsel %vm4242_vm2, %v513_v56, 0  ;;  %v4019_v16 = vld [vmem:[%s5176_s1 + $0x110] sm:$0xff]  }
  0x22   : > { %3694 = vmatprep.mubr.bf16.mxu1 %v4263_v63  ;;  %v4312_v41 = vsel %vm4242_vm2, %v517_v25, 0 }
  0x24   : > { %3265 = vmatpush3.bf16.msra.mxu0 %v4008_v18  ;;  %3819 = vmatpush3.bf16.msra.mxu1 %v4177_v17  ;;  %v4294_v18 = vor.u32 %v378_v40, %v377_v62  ;;  %v240_v40 = vmax.f32 %v208_v31, 0.0  ;;  %v188_v62 = vld [vmem:[%s4196_s6 + $0x20] sm:$0xff] }
  0x25   : > { %3266 = vmatprep.subr.bf16.mxu0 %v4009_v19  ;;  %3812 = vmatprep.subr.bf16.mxu1 %v4191_v20  ;;  %v498_v19 = vrot.slane %v322_v9, 1 }
  0x26   : > { %v4339_v52 = vpack.c.bf16 %v241_v45, %v240_v40 }
  0x27   : > { %v4334_v48 = vor.u32 %v498_v19, %v319_v4 }
  0x28   : > { %3267 = vmatpush3.bf16.msra.mxu0 %v4011_v21  ;;  %3820 = vmatpush3.bf16.msra.mxu1 %v4191_v20  ;;  %v518_v21 = vrot.slane %v392_v12, 1  ;;  %v403_v59 = vshrl.u32 %v4339_v52, 16 }
  0x29   : > { %3268 = vmatprep.subr.bf16.mxu0 %v4012_v22  ;;  %3813 = vmatprep.subr.bf16.mxu1 %v4207_v23  ;;  %v186_v22 = vld [vmem:[%s4196_s6 + $0x10] sm:$0xff] }
  0x2a   : > { %v218_v27 = vmax.f32 %v186_v22, 0.0  ;;  %v212_v22 = vld [vmem:[%s4196_s6 + $0xe0] sm:$0xff] }
  0x2c   : > { %3269 = vmatpush3.bf16.msra.mxu0 %v4014_v32  ;;  %3821 = vmatpush3.bf16.msra.mxu1 %v4207_v23  ;;  %v519_v32 = vor.u32 %v518_v21, %v389_v10  ;;  %v4321_v44 = vpack.c.bf16 %v219_v28, %v218_v27  ;;  %v243_v27 = vmax.f32 %v211_v13, 0.0  ;;  %v244_v28 = vmax.f32 %v212_v22, 0.0  ;;  %v191_v13 = vld [vmem:[%s4196_s6 + $0x38] sm:$0xff] }
  0x2d   : > { %3662 = vmatprep.subr.bf16.mxu0 %v4108_v1  ;;  %3390 = vmatprep.subr.bf16.mxu1 %v4015_v37  ;;  %v238_v37 = vmax.f32 %v206_v29, 0.0  ;;  %v245_v29 = vmax.f32 %v213_v24, 0.0  ;;  %v223_v22 = vmax.f32 %v191_v13, 0.0  ;;  %v192_v24 = vld [vmem:[%s4196_s6 + $0x40] sm:$0xff]  ;;  %v4028_v13 = vld [vmem:[%s5176_s1 + $0xf0] sm:$0xff]  }
  0x2e   : > { %v326_v49 = vshrl.u32 %v4321_v44, 16  ;;  %v329_v50 = vshll.u32 %v4321_v44, 16 }
  0x2f   : > { %854 = vmatmul.mubr.bf16.vlgmr.msra.gmra.mrb[0].mxu0 %v4071_v2  ;;  %3695 = vmatmul.mubr.bf16.vlgmr.msra.gmra.mrb[0].mxu1 %v4272_v6  ;;  %v4332_v47 = vpack.c.bf16 %v239_v38, %v238_v37  ;;  %v4025_v38 = vld [vmem:[%s5176_s1 + $0x128] sm:$0xff]   ;;  %v4393_v40 = vpack.c.bf16 %v245_v29, %v244_v28  ;;  %v4433_v28 = vsel %vm4287_vm5, 0, %v4294_v18 }
  0x30   : > { %3663 = vmatpush3.bf16.msra.mxu0 %v4108_v1  ;;  %861 = vmatprep.mubr.bf16.mxu0 %v4252_v57  ;;  %v321_v1 = vrot.slane %v319_v4, 7  ;;  %v328_v56 = vrot.slane %v326_v49, 7 }
  0x31   : > { %3391 = vmatpush3.bf16.msra.mxu1 %v4016_v53  ;;  %3664 = vmatprep.subr.bf16.mxu0 %v4122_v5  ;;  %v4022_v53 = vld [vmem:[%s5176_s1 + $0xd8] sm:$0xff]   ;;  %v396_v54 = vshrl.u32 %v4332_v47, 16  ;;  %v399_v55 = vshll.u32 %v4332_v47, 16 }
  0x32   : > { %3392 = vmatprep.subr.bf16.mxu1 %v4017_v60  ;;  %v324_v26 = vor.u32 %v322_v9, %v321_v1  ;;  %3698 = vmatprep.mubr.bf16.mxu1 %v4312_v41  ;;  %v406_v60 = vshll.u32 %v4339_v52, 16  ;;  %v210_v9 = vld [vmem:[%s4196_s6 + $0xd0] sm:$0xff]  ;;  %v331_v1 = vor.u32 %v329_v50, %v328_v56 }
  0x33   : > { %v520_v4 = vrot.slane %v399_v55, 1  ;;  %v242_v21 = vmax.f32 %v210_v9, 0.0 }
  0x34   : > { %3665 = vmatpush3.bf16.msra.mxu0 %v4122_v5  ;;  %v4316_v42 = vsel %vm4287_vm5, 0, %v324_v26  ;;  %v4327_v5 = vsel %vm4242_vm2, %v519_v32, 0  ;;  %v4023_v26 = vld [vmem:[%s5176_s1 + $0x120] sm:$0xff]   ;;  %v4374_v30 = vsel %vm4287_vm5, 0, %v331_v1 }
  0x35   : > { %3666 = vmatprep.subr.bf16.mxu0 %v4134_v8  ;;  %3393 = vmatpush3.bf16.msra.mxu1 %v4018_v7  ;;  %v189_v7 = vld [vmem:[%s4196_s6 + $0x28] sm:$0xff]  ;;  %v521_v25 = vor.u32 %v520_v4, %v396_v54  ;;  %v4024_v32 = vld [vmem:[%s5176_s1 + $0xe0] sm:$0xff]   ;;  %v4391_v39 = vpack.c.bf16 %v243_v27, %v242_v21  ;;  %v417_v4 = vshrl.u32 %v4393_v40, 16  ;;  %v4027_v21 = vld [vmem:[%s5176_s1 + $0x130] sm:$0xff]  }
  0x36   : > { %3394 = vmatprep.subr.bf16.mxu1 %v4019_v16  ;;  %v522_v16 = vrot.slane %v406_v60, 1  ;;  %v221_v19 = vmax.f32 %v189_v7, 0.0  ;;  %v420_v7 = vshll.u32 %v4393_v40, 16  ;;  %v194_v27 = vld [vmem:[%s4196_s6 + $0x50] sm:$0xff] }
  0x37   : > { %862 = vmatmul.mubr.bf16.gmra.mrb[4].mxu0 %v4316_v42  ;;  %3699 = vmatmul.mubr.bf16.gmra.mrb[4].mxu1 %v4327_v5  ;;  %v410_v56 = vshrl.u32 %v4391_v39, 16  ;;  %v226_v18 = vmax.f32 %v194_v27, 0.0 }
  0x38   : > { %869 = vmatprep.mubr.bf16.mxu0 %v4321_v44  ;;  %3667 = vmatpush3.bf16.msra.mxu0 %v4134_v8  ;;  %v220_v8 = vmax.f32 %v188_v62, 0.0  ;;  %v523_v31 = vor.u32 %v522_v16, %v403_v59  ;;  %v413_v62 = vshll.u32 %v4391_v39, 16 }
  0x39   : > { %3668 = vmatprep.subr.bf16.mxu0 %v4147_v11  ;;  %3395 = vmatpush3.bf16.msra.mxu1 %v4020_v43 }
  0x3a   : > { %3396 = vmatprep.subr.bf16.mxu1 %v4021_v46  ;;  %v4381_v37 = vpack.c.bf16 %v221_v19, %v220_v8  ;;  %v4399_v43 = vsel %vm4242_vm2, %v523_v31, 0  ;;  %v4026_v8 = vld [vmem:[%s5176_s1 + $0xe8] sm:$0xff]   ;;  %v524_v16 = vrot.slane %v413_v62, 1  ;;  %v526_v19 = vrot.slane %v420_v7, 1 }
  0x3c   : > { %3669 = vmatpush3.bf16.msra.mxu0 %v4147_v11  ;;  %v4386_v11 = vsel %vm4242_vm2, %v521_v25, 0  ;;  %v333_v45 = vshrl.u32 %v4381_v37, 16  ;;  %v336_v46 = vshll.u32 %v4381_v37, 16  ;;  %v193_v25 = vld [vmem:[%s4196_s6 + $0x48] sm:$0xff]  ;;  %v525_v29 = vor.u32 %v524_v16, %v410_v56 }
  0x3d   : > { %3670 = vmatprep.subr.bf16.mxu0 %v4161_v14  ;;  %3397 = vmatpush3.bf16.msra.mxu1 %v4022_v53  ;;  %v190_v53 = vld [vmem:[%s4196_s6 + $0x30] sm:$0xff]  ;;  %v527_v31 = vor.u32 %v526_v19, %v417_v4 }
  0x3e   : > { %3702 = vmatprep.mubr.bf16.mxu1 %v4386_v11  ;;  %3398 = vmatprep.subr.bf16.mxu1 %v4023_v26  ;;  %v335_v9 = vrot.slane %v333_v45, 7  ;;  %v222_v1 = vmax.f32 %v190_v53, 0.0  ;;  %v224_v26 = vmax.f32 %v192_v24, 0.0  ;;  %v195_v53 = vld [vmem:[%s4196_s6 + $0x58] sm:$0xff]  ;;  %v4452_v16 = vsel %vm4242_vm2, %v525_v29, 0 }
  0x3f   : > { %870 = vmatmul.mubr.bf16.gmra.mrb[8].mxu0 %v4374_v30  ;;  %3703 = vmatmul.mubr.bf16.gmra.mrb[8].mxu1 %v4399_v43  ;;  %v227_v24 = vmax.f32 %v195_v53, 0.0 }
  0x40   : > { %877 = vmatprep.mubr.bf16.mxu0 %v4381_v37  ;;  %3671 = vmatpush3.bf16.msra.mxu0 %v4161_v14  ;;  %v338_v14 = vor.u32 %v336_v46, %v335_v9 }
  0x41   : > { %3399 = vmatpush3.bf16.msra.mxu1 %v4024_v32  ;;  %3672 = vmatprep.subr.bf16.mxu0 %v4177_v17  ;;  %v4439_v32 = vpack.c.bf16 %v223_v22, %v222_v1  ;;  %v4456_v1 = vsel %vm4242_vm2, %v527_v31, 0  ;;  %v4482_v29 = vpack.c.bf16 %v227_v24, %v226_v18  ;;  %v4031_v31 = vld [vmem:[%s5176_s1 + $0x140] sm:$0xff]   ;;  %v197_v18 = vld [vmem:[%s4196_s6 + $0x68] sm:$0xff] }
  0x42   : > { %3400 = vmatprep.subr.bf16.mxu1 %v4025_v38  ;;  %v225_v38 = vmax.f32 %v193_v25, 0.0  ;;  %v4444_v9 = vsel %vm4287_vm5, 0, %v338_v14  ;;  %3706 = vmatprep.mubr.bf16.mxu1 %v4452_v16  ;;  %v384_v25 = vrot.slane %v382_v0, 7 }
  0x43   : > { %v340_v19 = vshrl.u32 %v4439_v32, 16  ;;  %v343_v22 = vshll.u32 %v4439_v32, 16 }
  0x44   : > { %3673 = vmatpush3.bf16.msra.mxu0 %v4177_v17  ;;  %v4029_v17 = vld [vmem:[%s5176_s1 + $0x138] sm:$0xff]   ;;  %v387_v0 = vor.u32 %v385_v3, %v384_v25 }
  0x45   : > { %3401 = vmatpush3.bf16.msra.mxu1 %v4026_v8  ;;  %3674 = vmatprep.subr.bf16.mxu0 %v4191_v20  ;;  %v4466_v8 = vpack.c.bf16 %v225_v38, %v224_v26  ;;  %v342_v14 = vrot.slane %v340_v19, 7  ;;  %v398_v38 = vrot.slane %v396_v54, 7  ;;  %v4032_v54 = vld [vmem:[%s5176_s1 + $0x148] sm:$0xff]  }
  0x46   : > { %3402 = vmatprep.subr.bf16.mxu1 %v4027_v21  ;;  %v4030_v21 = vld [vmem:[%s5176_s1 + $0xf8] sm:$0xff]   ;;  %v4507_v24 = vsel %vm4287_vm5, 0, %v387_v0  ;;  %v419_v0 = vrot.slane %v417_v4, 7 }
  0x47   : > { %878 = vmatmul.mubr.bf16.gmra.mrb[12].mxu0 %v4444_v9  ;;  %3707 = vmatmul.mubr.bf16.gmra.mrb[12].mxu1 %v4456_v1  ;;  %v347_v27 = vshrl.u32 %v4466_v8, 16  ;;  %v345_v26 = vor.u32 %v343_v22, %v342_v14  ;;  %v354_v14 = vshrl.u32 %v4482_v29, 16 }
  0x48   : > { %885 = vmatprep.mubr.bf16.mxu0 %v4439_v32  ;;  %3675 = vmatpush3.bf16.msra.mxu0 %v4191_v20  ;;  %v391_v20 = vrot.slane %v389_v10, 7  ;;  %v350_v10 = vshll.u32 %v4466_v8, 16 }
  0x49   : > { %3403 = vmatpush3.bf16.msra.mxu1 %v4028_v13  ;;  %1448 = vmatprep.mubr.bf16.mxu1 %v4252_v57  ;;  %v405_v57 = vrot.slane %v403_v59, 7  ;;  %v4498_v53 = vsel %vm4287_vm5, 0, %v345_v26  ;;  %v349_v3 = vrot.slane %v347_v27, 7  ;;  %v196_v13 = vld [vmem:[%s4196_s6 + $0x60] sm:$0xff]  ;;  %v412_v26 = vrot.slane %v410_v56, 7 }
  0x4a   : > { %3404 = vmatprep.subr.bf16.mxu1 %v4029_v17  ;;  %3676 = vmatprep.subr.bf16.mxu0 %v4207_v23  ;;  %v394_v59 = vor.u32 %v392_v12, %v391_v20  ;;  %v401_v17 = vor.u32 %v399_v55, %v398_v38  ;;  %v4038_v12 = vld [vmem:[%s5176_s1 + $0x1c0] sm:$0xff]   ;;  %v229_v55 = vmax.f32 %v197_v18, 0.0  ;;  %v422_v38 = vor.u32 %v420_v7, %v419_v0 }
  0x4b   : > { %v408_v25 = vor.u32 %v406_v60, %v405_v57  ;;  %v352_v56 = vor.u32 %v350_v10, %v349_v3  ;;  %v415_v20 = vor.u32 %v413_v62, %v412_v26  ;;  %v4033_v57 = vld [vmem:[%s5176_s1 + $0x150] sm:$0xff]   ;;  %v356_v3 = vrot.slane %v354_v14, 7 }
  0x4c   : > { %3677 = vmatpush3.bf16.msra.mxu0 %v4207_v23  ;;  %v228_v23 = vmax.f32 %v196_v13, 0.0  ;;  %v4534_v60 = vsel %vm4287_vm5, 0, %v401_v17  ;;  %v357_v13 = vshll.u32 %v4482_v29, 16  ;;  %v4557_v62 = vsel %vm4287_vm5, 0, %v422_v38  ;;  %v4037_v38 = vld [vmem:[%s5176_s1 + $0x170] sm:$0xff]  }
  0x4d   : > { %3405 = vmatpush3.bf16.msra.mxu1 %v4030_v21  ;;  %v4530_v21 = vsel %vm4287_vm5, 0, %v394_v59  ;;  %v4539_v4 = vsel %vm4287_vm5, 0, %v408_v25  ;;  %3526 = vmatprep.subr.bf16.mxu0 %v4038_v12  ;;  %v4553_v18 = vsel %vm4287_vm5, 0, %v415_v20  ;;  %v502_v7 = vrot.slane %v336_v46, 1 }
  0x4e   : > { %3710 = vmatprep.subr.bf16.mxu1 %v4031_v31  ;;  %v4567_v59 = vpack.c.bf16 %v229_v55, %v228_v23  ;;  %v504_v17 = vrot.slane %v343_v22, 1  ;;  %v508_v0 = vrot.slane %v357_v13, 1  ;;  %v4034_v22 = vld [vmem:[%s5176_s1 + $0x158] sm:$0xff]  }
  0x4f   : > { %886 = vmatmul.mubr.bf16.gmra.mrb[16].mxu0 %v4498_v53  ;;  %v4577_v26 = vor.u32 %v502_v7, %v333_v45  ;;  %v359_v45 = vor.u32 %v357_v13, %v356_v3  ;;  %v370_v3 = vrot.slane %v368_v35, 7  ;;  %v4046_v13 = vld [vmem:[%s5176_s1 + $0x178] sm:$0xff]   ;;  %v4635_v35 = vld [vmem:[%s5176_s1 + $0x200] sm:$0xff]  }
  0x50   : > { %893 = vmatprep.mubr.bf16.mxu0 %v4466_v8  ;;  %1449 = vmatmul.mubr.bf16.vlgmr.msra.gmra.mrb[16].mxu1 %v4316_v42  ;;  %v500_v42 = vrot.slane %v329_v50, 1  ;;  %v506_v50 = vrot.slane %v350_v10, 1  ;;  %v4581_v46 = vor.u32 %v504_v17, %v340_v19  ;;  %v361_v10 = vshrl.u32 %v4567_v59, 16  ;;  %v4039_v17 = vld [vmem:[%s5176_s1 + $0x180] sm:$0xff]  }
  0x51   : > { %3711 = vmatpush3.bf16.msra.mxu1 %v4031_v31  ;;  %1456 = vmatprep.mubr.bf16.mxu1 %v4321_v44  ;;  %v4565_v31 = vsel %vm4287_vm5, 0, %v352_v56  ;;  %v364_v19 = vshll.u32 %v4567_v59, 16  ;;  %v4603_v12 = vsel %vm4287_vm5, 0, %v359_v45  ;;  %v4036_v56 = vld [vmem:[%s5176_s1 + $0x168] sm:$0xff]   ;;  %v215_v45 = vld [vmem:[%s4196_s6 + $0xf8] sm:$0xff] }
  0x52   : > { %3712 = vmatprep.subr.bf16.mxu1 %v4032_v54  ;;  %v4573_v25 = vor.u32 %v500_v42, %v326_v49  ;;  %v4589_v49 = vor.u32 %v506_v50, %v347_v27  ;;  %v4035_v27 = vld [vmem:[%s5176_s1 + $0x160] sm:$0xff]   ;;  %v363_v23 = vrot.slane %v361_v10, 7  ;;  %v373_v42 = vor.u32 %v371_v36, %v370_v3  ;;  %v4040_v50 = vld [vmem:[%s5176_s1 + $0x1c8] sm:$0xff]  }
  0x53   : > { %v510_v55 = vrot.slane %v364_v19, 1  ;;  %v549_v36 = vsel %vm4242_vm2, %v4334_v48, 0  ;;  %v4041_v48 = vld [vmem:[%s5176_s1 + $0x188] sm:$0xff]  }
  0x54   : > { %v366_v20 = vor.u32 %v364_v19, %v363_v23  ;;  %v4639_v7 = vsel %vm4287_vm5, 0, %v373_v42  ;;  %v247_v19 = vmax.f32 %v215_v45, 0.0  ;;  %v4043_v23 = vld [vmem:[%s5176_s1 + $0x190] sm:$0xff]   ;;  %v4731_v3 = vsel %vm4242_vm2, %v4589_v49, 0  ;;  %v4049_v42 = vld [vmem:[%s5176_s1 + $0x1e8] sm:$0xff]  }
  0x55   : > { %3713 = vmatpush3.bf16.msra.mxu1 %v4032_v54  ;;  %v4593_v54 = vor.u32 %v508_v0, %v354_v14  ;;  %v4605_v14 = vor.u32 %v510_v55, %v361_v10  ;;  %v4686_v0 = vsel %vm4242_vm2, %v4573_v25, 0  ;;  %v4042_v10 = vld [vmem:[%s5176_s1 + $0x1d0] sm:$0xff]   ;;  %v4044_v55 = vld [vmem:[%s5176_s1 + $0x1d8] sm:$0xff]  }
  0x56   : > { %3714 = vmatprep.subr.bf16.mxu1 %v4033_v57 }
  0x57   : > { %894 = vmatmul.mubr.bf16.gmra.mrb[20].mxu0 %v4565_v31 }
  0x58   : > { %901 = vmatprep.mubr.bf16.mxu0 %v4482_v29  ;;  %1457 = vmatmul.mubr.bf16.gmra.mrb[20].mxu1 %v4374_v30 }
  0x59   : > { %1464 = vmatprep.mubr.bf16.mxu1 %v4381_v37  ;;  %3715 = vmatpush3.bf16.msra.mxu1 %v4033_v57  ;;  %v4619_v57 = vsel %vm4287_vm5, 0, %v366_v20 }
  0x5a   : > { %3716 = vmatprep.subr.bf16.mxu1 %v4034_v22 }
  0x5d   : > { %3717 = vmatpush3.bf16.msra.mxu1 %v4034_v22  ;;  %v214_v22 = vld [vmem:[%s4196_s6 + $0xf0] sm:$0xff] }
  0x5e   : > { %3718 = vmatprep.subr.bf16.mxu1 %v4035_v27  ;;  %v246_v25 = vmax.f32 %v214_v22, 0.0  ;;  %v4050_v22 = vld [vmem:[%s5176_s1 + $0x1a8] sm:$0xff]  }
  0x5f   : > { %902 = vmatmul.mubr.bf16.gmra.mrb[24].mxu0 %v4603_v12 }
  0x60   : > { %909 = vmatprep.mubr.bf16.mxu0 %v4567_v59  ;;  %1465 = vmatmul.mubr.bf16.gmra.mrb[24].mxu1 %v4444_v9  ;;  %v4715_v20 = vpack.c.bf16 %v247_v19, %v246_v25  ;;  %v4053_v25 = vld [vmem:[%s5176_s1 + $0x1f8] sm:$0xff]  }
  0x61   : > { %1472 = vmatprep.mubr.bf16.mxu1 %v4439_v32  ;;  %3719 = vmatpush3.bf16.msra.mxu1 %v4035_v27  ;;  %v4702_v27 = vsel %vm4242_vm2, %v4577_v26, 0  ;;  %v4045_v26 = vld [vmem:[%s5176_s1 + $0x198] sm:$0xff]  }
  0x62   : > { %3720 = vmatprep.subr.bf16.mxu1 %v4036_v56  ;;  %v427_v49 = vshll.u32 %v4715_v20, 16 }
  0x65   : > { %3721 = vmatpush3.bf16.msra.mxu1 %v4036_v56  ;;  %v4713_v56 = vsel %vm4242_vm2, %v4581_v46, 0  ;;  %v424_v46 = vshrl.u32 %v4715_v20, 16 }
  0x66   : > { %3722 = vmatprep.subr.bf16.mxu1 %v4037_v38 }
  0x67   : > { %910 = vmatmul.mubr.bf16.gmra.mrb[28].mxu0 %v4619_v57 }
  0x68   : > { %917 = vmatprep.mubr.bf16.mxu0 %v4218_v33  ;;  %1473 = vmatmul.mubr.bf16.gmra.mrb[28].mxu1 %v4498_v53 }
  0x69   : > { %1480 = vmatprep.mubr.bf16.mxu1 %v4466_v8  ;;  %3723 = vmatpush3.bf16.msra.mxu1 %v4037_v38  ;;  %v4047_v38 = vld [vmem:[%s5176_s1 + $0x1e0] sm:$0xff]  }
  0x6a   : > { %3724 = vmatprep.subr.bf16.mxu1 %v4046_v13 }
  0x6d   : > { %3725 = vmatpush3.bf16.msra.mxu1 %v4046_v13  ;;  %v4048_v13 = vld [vmem:[%s5176_s1 + $0x1a0] sm:$0xff]  }
  0x6e   : > { %3758 = vmatprep.subr.bf16.mxu1 %v4635_v35 }
  0x6f   : > { %918 = vmatmul.mubr.bf16.gmra.mrb[32].mxu0 %v4639_v7 }
  0x70   : > { %925 = vmatprep.mubr.bf16.mxu0 %v4221_v34  ;;  %1481 = vmatmul.mubr.bf16.gmra.mrb[32].mxu1 %v4565_v31 }
  0x71   : > { %1488 = vmatprep.mubr.bf16.mxu1 %v4482_v29 }
  0x77   : > { %926 = vmatmul.mubr.bf16.gmra.mrb[36].mxu0 %v4433_v28 }
  0x78   : > { %933 = vmatprep.mubr.bf16.mxu0 %v4254_v58  ;;  %1489 = vmatmul.mubr.bf16.gmra.mrb[36].mxu1 %v4603_v12 }
  0x79   : > { %1496 = vmatprep.mubr.bf16.mxu1 %v4567_v59 }
  0x7f   : > { %934 = vmatmul.mubr.bf16.gmra.mrb[40].mxu0 %v4507_v24 }
  0x80   : > { %941 = vmatprep.mubr.bf16.mxu0 %v4259_v61  ;;  %1497 = vmatmul.mubr.bf16.gmra.mrb[40].mxu1 %v4619_v57 }
  0x81   : > { %1504 = vmatprep.mubr.bf16.mxu1 %v4218_v33 }
  0x87   : > { %942 = vmatmul.mubr.bf16.gmra.mrb[44].mxu0 %v4530_v21 }
  0x88   : > { %949 = vmatprep.mubr.bf16.mxu0 %v4332_v47  ;;  %1505 = vmatmul.mubr.bf16.gmra.mrb[44].mxu1 %v4639_v7 }
  0x89   : > { %1512 = vmatprep.mubr.bf16.mxu1 %v4221_v34 }
  0x8f   : > { %950 = vmatmul.mubr.bf16.gmra.mrb[48].mxu0 %v4534_v60 }
  0x90   : > { %957 = vmatprep.mubr.bf16.mxu0 %v4339_v52  ;;  %1513 = vmatmul.mubr.bf16.gmra.mrb[48].mxu1 %v4433_v28 }
  0x91   : > { %1520 = vmatprep.mubr.bf16.mxu1 %v4254_v58 }
  0x97   : > { %958 = vmatmul.mubr.bf16.gmra.mrb[52].mxu0 %v4539_v4 }
  0x98   : > { %965 = vmatprep.mubr.bf16.mxu0 %v4391_v39  ;;  %1521 = vmatmul.mubr.bf16.gmra.mrb[52].mxu1 %v4507_v24 }
  0x99   : > { %1528 = vmatprep.mubr.bf16.mxu1 %v4259_v61 }
  0x9f   : > { %966 = vmatmul.mubr.bf16.gmra.mrb[56].mxu0 %v4553_v18 }
  0xa0   : > { %973 = vmatprep.mubr.bf16.mxu0 %v4393_v40  ;;  %1529 = vmatmul.mubr.bf16.gmra.mrb[56].mxu1 %v4530_v21 }
  0xa1   : > { %1536 = vmatprep.mubr.bf16.mxu1 %v4332_v47 }
  0xa7   : > { %974 = vmatmul.mubr.bf16.gmra.mrb[60].mxu0 %v4557_v62 }
  0xa8   : > { %3678 = vmatprep.mubr.bf16.mxu0 %v4071_v2  ;;  %1537 = vmatmul.mubr.bf16.gmra.mrb[60].mxu1 %v4534_v60 }
  0xa9   : > { %1544 = vmatprep.mubr.bf16.mxu1 %v4339_v52 }
  0xaf   : > { %3679 = vmatmul.mubr.bf16.vlgmr.msra.gmra.mrb[64].mxu0 %v549_v36 }
  0xb0   : > { %3527 = vmatpush3.bf16.msra.mxu0 %v4039_v17  ;;  %3682 = vmatprep.mubr.bf16.mxu0 %v4686_v0  ;;  %v4742_v17 = vsel %vm4242_vm2, %v4593_v54, 0  ;;  %v4051_v54 = vld [vmem:[%s5176_s1 + $0x1f0] sm:$0xff]  }
  0xb1   : > { %1545 = vmatmul.mubr.bf16.gmra.mrb[64].mxu1 %v4539_v4  ;;  %3528 = vmatprep.subr.bf16.mxu0 %v4040_v50  ;;  %v426_v50 = vrot.slane %v424_v46, 7 }
  0xb2   : > { %1552 = vmatprep.mubr.bf16.mxu1 %v4391_v39 }
  0xb3   : > { %v429_v45 = vor.u32 %v427_v49, %v426_v50 }
  0xb4   : > { %3529 = vmatpush3.bf16.msra.mxu0 %v4041_v48  ;;  %v4762_v48 = vsel %vm4242_vm2, %v4605_v14, 0  ;;  %v4054_v14 = vld [vmem:[%s5176_s1 + $0x1b8] sm:$0xff]  }
  0xb5   : > { %3530 = vmatprep.subr.bf16.mxu0 %v4042_v10  ;;  %v4052_v10 = vld [vmem:[%s5176_s1 + $0x1b0] sm:$0xff]   ;;  %v4772_v19 = vsel %vm4287_vm5, 0, %v429_v45 }
  0xb7   : > { %3683 = vmatmul.mubr.bf16.gmra.mrb[68].mxu0 %v4702_v27 }
  0xb8   : > { %3531 = vmatpush3.bf16.msra.mxu0 %v4043_v23  ;;  %3686 = vmatprep.mubr.bf16.mxu0 %v4713_v56 }
  0xb9   : > { %1553 = vmatmul.mubr.bf16.gmra.mrb[68].mxu1 %v4553_v18  ;;  %3532 = vmatprep.subr.bf16.mxu0 %v4044_v55 }
  0xba   : > { %1560 = vmatprep.mubr.bf16.mxu1 %v4393_v40 }
  0xbc   : > { %3533 = vmatpush3.bf16.msra.mxu0 %v4045_v26 }
  0xbd   : > { %3534 = vmatprep.subr.bf16.mxu0 %v4047_v38 }
  0xbf   : > { %3687 = vmatmul.mubr.bf16.gmra.mrb[72].mxu0 %v4731_v3 }
  0xc0   : > { %3535 = vmatpush3.bf16.msra.mxu0 %v4048_v13  ;;  %3690 = vmatprep.mubr.bf16.mxu0 %v4742_v17 }
  0xc1   : > { %1561 = vmatmul.mubr.bf16.gmra.mrb[72].mxu1 %v4557_v62  ;;  %3536 = vmatprep.subr.bf16.mxu0 %v4049_v42 }
  0xc2   : > { %1568 = vmatprep.mubr.bf16.mxu1 %v4715_v20 }
  0xc4   : > { %3537 = vmatpush3.bf16.msra.mxu0 %v4050_v22 }
  0xc5   : > { %3538 = vmatprep.subr.bf16.mxu0 %v4051_v54 }
  0xc7   : > { %3691 = vmatmul.mubr.bf16.gmra.mrb[76].mxu0 %v4762_v48 }
  0xc8   : > { %3539 = vmatpush3.bf16.msra.mxu0 %v4052_v10  ;;  %2108 = vmatprep.mubr.bf16.mxu0 %v4321_v44  ;;  %v4057_v44 = vld [vmem:[%s5176_s1 + $0x210] sm:$0xff]  }
  0xc9   : > { %1569 = vmatmul.mubr.bf16.gmra.mrb[76].mxu1 %v4772_v19  ;;  %3540 = vmatprep.subr.bf16.mxu0 %v4053_v25 }
  0xca   : > { %3726 = vmatprep.mubr.bf16.mxu1 %v549_v36 }
  0xcc   : > { %3541 = vmatpush3.bf16.msra.mxu0 %v4054_v14 }
  0xcf   : > { %2109 = vmatmul.mubr.bf16.vlgmr.msra.gmra.mrb[80].mxu0 %v4374_v30  ;;  %v4058_v30 = vld [vmem:[%s5176_s1 + $0x218] sm:$0xff]  }
  0xd0   : > { %2116 = vmatprep.mubr.bf16.mxu0 %v4381_v37  ;;  %v4059_v37 = vld [vmem:[%s5176_s1 + $0x220] sm:$0xff]  }
  0xd1   : > { %3727 = vmatmul.mubr.bf16.vlgmr.msra.gmra.mrb[80].mxu1 %v4686_v0 }
  0xd2   : > { %3759 = vmatpush3.bf16.msra.mxu1 %v4635_v35  ;;  %3730 = vmatprep.mubr.bf16.mxu1 %v4702_v27 }
  0xd3   : > { %3760 = vmatprep.subr.bf16.mxu1 %v4056_v15 }
  0xd6   : > { %3761 = vmatpush3.bf16.msra.mxu1 %v4056_v15 }
  0xd7   : > { %2117 = vmatmul.mubr.bf16.gmra.mrb[84].mxu0 %v4444_v9  ;;  %3762 = vmatprep.subr.bf16.mxu1 %v4057_v44  ;;  %v4060_v9 = vld [vmem:[%s5176_s1 + $0x228] sm:$0xff]  }
  0xd8   : > { %2124 = vmatprep.mubr.bf16.mxu0 %v4439_v32  ;;  %v4061_v32 = vld [vmem:[%s5176_s1 + $0x230] sm:$0xff]  }
  0xd9   : > { %3731 = vmatmul.mubr.bf16.gmra.mrb[84].mxu1 %v4713_v56 }
  0xda   : > { %3734 = vmatprep.mubr.bf16.mxu1 %v4731_v3  ;;  %3763 = vmatpush3.bf16.msra.mxu1 %v4057_v44 }
  0xdb   : > { %3764 = vmatprep.subr.bf16.mxu1 %v4058_v30 }
  0xde   : > { %3765 = vmatpush3.bf16.msra.mxu1 %v4058_v30 }
  0xdf   : > { %2125 = vmatmul.mubr.bf16.gmra.mrb[88].mxu0 %v4498_v53  ;;  %3766 = vmatprep.subr.bf16.mxu1 %v4059_v37  ;;  %v4062_v53 = vld [vmem:[%s5176_s1 + $0x238] sm:$0xff]  }
  0xe0   : > { %2132 = vmatprep.mubr.bf16.mxu0 %v4466_v8  ;;  %v528_v8 = vrot.slane %v427_v49, 1 }
  0xe1   : > { %3735 = vmatmul.mubr.bf16.gmra.mrb[88].mxu1 %v4742_v17 }
  0xe2   : > { %3738 = vmatprep.mubr.bf16.mxu1 %v4762_v48  ;;  %3767 = vmatpush3.bf16.msra.mxu1 %v4059_v37 }
  0xe3   : > { %3768 = vmatprep.subr.bf16.mxu1 %v4060_v9 }
  0xe6   : > { %3769 = vmatpush3.bf16.msra.mxu1 %v4060_v9 }
  0xe7   : > { %2133 = vmatmul.mubr.bf16.gmra.mrb[92].mxu0 %v4565_v31  ;;  %3770 = vmatprep.subr.bf16.mxu1 %v4061_v32  ;;  %v529_v31 = vor.u32 %v528_v8, %v424_v46 }
  0xe8   : > { %2140 = vmatprep.mubr.bf16.mxu0 %v4482_v29 }
  0xe9   : > { %3739 = vmatmul.mubr.bf16.gmra.mrb[92].mxu1 %v4263_v63 }
  0xea   : > { %3742 = vmatprep.mubr.bf16.mxu1 %v4272_v6  ;;  %3771 = vmatpush3.bf16.msra.mxu1 %v4061_v32 }
  0xeb   : > { %3772 = vmatprep.subr.bf16.mxu1 %v4062_v53 }
  0xee   : > { %3773 = vmatpush3.bf16.msra.mxu1 %v4062_v53 }
  0xef   : > { %2141 = vmatmul.mubr.bf16.gmra.mrb[96].mxu0 %v4603_v12 }
  0xf0   : > { %2148 = vmatprep.mubr.bf16.mxu0 %v4567_v59 }
  0xf1   : > { %3743 = vmatmul.mubr.bf16.gmra.mrb[0].mxu1 %v4312_v41 }
  0xf2   : > { %3746 = vmatprep.mubr.bf16.mxu1 %v4327_v5 }
  0xf7   : > { %2149 = vmatmul.mubr.bf16.gmra.mrb[100].mxu0 %v4619_v57 }
  0xf8   : > { %2156 = vmatprep.mubr.bf16.mxu0 %v4218_v33 }
  0xf9   : > { %3747 = vmatmul.mubr.bf16.gmra.mrb[4].mxu1 %v4386_v11 }
  0xfa   : > { %3750 = vmatprep.mubr.bf16.mxu1 %v4399_v43 }
  0xff   : > { %2157 = vmatmul.mubr.bf16.gmra.mrb[104].mxu0 %v4639_v7  ;;  %v4840_v7 = vsel %vm4242_vm2, %v529_v31, 0 }
 0x100   : > { %2164 = vmatprep.mubr.bf16.mxu0 %v4221_v34 }
 0x101   : > { %3751 = vmatmul.mubr.bf16.gmra.mrb[8].mxu1 %v4452_v16 }
 0x102   : > { %v3270_v29 = vpop.f32.mrb[0].mxu0  ;;  %3754 = vmatprep.mubr.bf16.mxu1 %v4456_v1 }
 0x103   : > { %v3271_v33 = vpop.f32.mrb[1].mxu0 }
 0x104   : > { %v4834_v59 = vadd.f32 %v3271_v33, %v3270_v29  ;;  %v3273_v12 = vpop.f32.mrb[2].mxu0 }
 0x105   : > { %v3274_v57 = vpop.f32.mrb[3].mxu0 }
 0x106   : > { %v4836_v35 = vadd.f32 %v3274_v57, %v3273_v12 }
 0x107   : > { %2165 = vmatmul.mubr.bf16.gmra.mrb[108].mxu0 %v4433_v28 }
 0x108   : > { %2172 = vmatprep.mubr.bf16.mxu0 %v4254_v58 }
 0x109   : > { %3755 = vmatmul.mubr.bf16.gmra.mrb[12].mxu1 %v4840_v7 }
 0x10a   : > { %v3276_v34 = vpop.f32.mrb[4].mxu0  ;;  %3774 = vmatprep.mubr.bf16.mxu1 %v4686_v0 }
 0x10b   : > { %v3277_v36 = vpop.f32.mrb[5].mxu0 }
 0x10c   : > { %v4846_v23 = vadd.f32 %v3277_v36, %v3276_v34  ;;  %v3279_v55 = vpop.f32.mrb[6].mxu0 }
 0x10d   : > { %v3280_v26 = vpop.f32.mrb[7].mxu0 }
 0x10e   : > { %v4848_v38 = vadd.f32 %v3280_v26, %v3279_v55 }
 0x10f   : > { %2173 = vmatmul.mubr.bf16.gmra.mrb[112].mxu0 %v4507_v24 }
 0x110   : > { %2180 = vmatprep.mubr.bf16.mxu0 %v4259_v61 }
 0x111   : > { %3775 = vmatmul.mubr.bf16.vlgmr.msra.gmra.mrb[80].mxu1 %v4702_v27 }
 0x112   : > { %v3282_v51 = vpop.f32.mrb[8].mxu0  ;;  %3778 = vmatprep.mubr.bf16.mxu1 %v4713_v56 }
 0x113   : > { %v3283_v58 = vpop.f32.mrb[9].mxu0 }
 0x114   : > { %v4854_v28 = vadd.f32 %v3283_v58, %v3282_v51  ;;  %v3285_v0 = vpop.f32.mrb[10].mxu0 }
 0x115   : > { %v3286_v46 = vpop.f32.mrb[11].mxu0 }
 0x116   : > { %v4856_v13 = vadd.f32 %v3286_v46, %v3285_v0 }
 0x117   : > { %2181 = vmatmul.mubr.bf16.gmra.mrb[116].mxu0 %v4530_v21 }
 0x118   : > { %2188 = vmatprep.mubr.bf16.mxu0 %v4332_v47 }
 0x119   : > { %3779 = vmatmul.mubr.bf16.gmra.mrb[84].mxu1 %v4731_v3 }
 0x11a   : > { %v3288_v24 = vpop.f32.mrb[12].mxu0  ;;  %3782 = vmatprep.mubr.bf16.mxu1 %v4742_v17 }
 0x11b   : > { %v3289_v61 = vpop.f32.mrb[13].mxu0 }
 0x11c   : > { %v4862_v27 = vadd.f32 %v3289_v61, %v3288_v24  ;;  %v3291_v56 = vpop.f32.mrb[14].mxu0 }
 0x11d   : > { %v3292_v42 = vpop.f32.mrb[15].mxu0 }
 0x11e   : > { %v4864_v50 = vadd.f32 %v3292_v42, %v3291_v56 }
 0x11f   : > { %2189 = vmatmul.mubr.bf16.gmra.mrb[120].mxu0 %v4534_v60 }
 0x120   : > { %2196 = vmatprep.mubr.bf16.mxu0 %v4339_v52 }
 0x121   : > { %3783 = vmatmul.mubr.bf16.gmra.mrb[88].mxu1 %v4762_v48 }
 0x122   : > { %v3294_v21 = vpop.f32.mrb[16].mxu0  ;;  %3786 = vmatprep.mubr.bf16.mxu1 %v4263_v63 }
 0x123   : > { %v3295_v47 = vpop.f32.mrb[17].mxu0  ;;  %v3406_v3 = vpop.f32.mrb[16].mxu1 }
 0x124   : > { %v4870_v49 = vadd.f32 %v3295_v47, %v3294_v21  ;;  %v3297_v17 = vpop.f32.mrb[18].mxu0  ;;  %v3407_v22 = vpop.f32.mrb[17].mxu1 }
 0x125   : > { %v3298_v54 = vpop.f32.mrb[19].mxu0  ;;  %v4872_v45 = vadd.f32 %v3407_v22, %v3406_v3  ;;  %v3409_v10 = vpop.f32.mrb[18].mxu1 }
 0x126   : > { %v4874_v25 = vadd.f32 %v3298_v54, %v3297_v17  ;;  %v3410_v60 = vpop.f32.mrb[19].mxu1 }
 0x127   : > { %2197 = vmatmul.mubr.bf16.gmra.mrb[124].mxu0 %v4539_v4  ;;  %v4877_v52 = vadd.f32 %v3410_v60, %v3409_v10 }
 0x128   : > { %2204 = vmatprep.mubr.bf16.mxu0 %v4391_v39 }
 0x129   : > { %3787 = vmatmul.mubr.bf16.gmra.mrb[92].mxu1 %v4272_v6 }
 0x12a   : > { %v3300_v63 = vpop.f32.mrb[20].mxu0  ;;  %3790 = vmatprep.mubr.bf16.mxu1 %v4312_v41 }
 0x12b   : > { %v3301_v48 = vpop.f32.mrb[21].mxu0  ;;  %v3412_v14 = vpop.f32.mrb[20].mxu1 }
 0x12c   : > { %v4882_v15 = vadd.f32 %v3301_v48, %v3300_v63  ;;  %v3303_v44 = vpop.f32.mrb[22].mxu0  ;;  %v3413_v30 = vpop.f32.mrb[21].mxu1 }
 0x12d   : > { %v3304_v37 = vpop.f32.mrb[23].mxu0  ;;  %v4884_v9 = vadd.f32 %v3413_v30, %v3412_v14  ;;  %v3415_v32 = vpop.f32.mrb[22].mxu1 }
 0x12e   : > { %v4886_v4 = vadd.f32 %v3304_v37, %v3303_v44  ;;  %v3416_v53 = vpop.f32.mrb[23].mxu1 }
 0x12f   : > { %2205 = vmatmul.mubr.bf16.gmra.mrb[128].mxu0 %v4553_v18  ;;  %v4889_v39 = vadd.f32 %v3416_v53, %v3415_v32 }
 0x130   : > { %2212 = vmatprep.mubr.bf16.mxu0 %v4393_v40 }
 0x131   : > { %3791 = vmatmul.mubr.bf16.gmra.mrb[0].mxu1 %v4327_v5 }
 0x132   : > { %v3306_v6 = vpop.f32.mrb[24].mxu0  ;;  %3794 = vmatprep.mubr.bf16.mxu1 %v4386_v11 }
 0x133   : > { %v3307_v41 = vpop.f32.mrb[25].mxu0  ;;  %v3418_v8 = vpop.f32.mrb[24].mxu1 }
 0x134   : > { %v4894_v29 = vadd.f32 %v3307_v41, %v3306_v6  ;;  %v3309_v31 = vpop.f32.mrb[26].mxu0  ;;  %v3419_v33 = vpop.f32.mrb[25].mxu1 }
 0x135   : > { %v3310_v12 = vpop.f32.mrb[27].mxu0  ;;  %v4896_v57 = vadd.f32 %v3419_v33, %v3418_v8  ;;  %v3421_v34 = vpop.f32.mrb[26].mxu1 }
 0x136   : > { %v4898_v18 = vadd.f32 %v3310_v12, %v3309_v31  ;;  %v3422_v36 = vpop.f32.mrb[27].mxu1 }
 0x137   : > { %2213 = vmatmul.mubr.bf16.gmra.mrb[132].mxu0 %v4557_v62  ;;  %v4901_v40 = vadd.f32 %v3422_v36, %v3421_v34 }
 0x138   : > { %2220 = vmatprep.mubr.bf16.mxu0 %v4715_v20 }
 0x139   : > { %3795 = vmatmul.mubr.bf16.gmra.mrb[4].mxu1 %v4399_v43 }
 0x13a   : > { %v3312_v5 = vpop.f32.mrb[28].mxu0  ;;  %3798 = vmatprep.mubr.bf16.mxu1 %v4452_v16 }
 0x13b   : > { %v3313_v11 = vpop.f32.mrb[29].mxu0  ;;  %v3424_v55 = vpop.f32.mrb[28].mxu1 }
 0x13c   : > { %v4906_v26 = vadd.f32 %v3313_v11, %v3312_v5  ;;  %v3315_v51 = vpop.f32.mrb[30].mxu0  ;;  %v3425_v58 = vpop.f32.mrb[29].mxu1 }
 0x13d   : > { %v3316_v0 = vpop.f32.mrb[31].mxu0  ;;  %v4908_v46 = vadd.f32 %v3425_v58, %v3424_v55  ;;  %v3427_v24 = vpop.f32.mrb[30].mxu1 }
 0x13e   : > { %v4910_v62 = vadd.f32 %v3316_v0, %v3315_v51  ;;  %v3428_v61 = vpop.f32.mrb[31].mxu1 }
 0x13f   : > { %2221 = vmatmul.mubr.bf16.gmra.mrb[136].mxu0 %v4772_v19  ;;  %v4913_v20 = vadd.f32 %v3428_v61, %v3427_v24 }
 0x140   : > { %2228 = vmatprep.mubr.bf16.mxu0 %v4071_v2 }
 0x141   : > { %3799 = vmatmul.mubr.bf16.gmra.mrb[8].mxu1 %v4456_v1 }
 0x142   : > { %v3318_v43 = vpop.f32.mrb[32].mxu0  ;;  %3802 = vmatprep.mubr.bf16.mxu1 %v4840_v7 }
 0x143   : > { %v3319_v16 = vpop.f32.mrb[33].mxu0  ;;  %v3430_v56 = vpop.f32.mrb[32].mxu1 }
 0x144   : > { %v3320_v42 = vadd.f32 %v3319_v16, %v3318_v43  ;;  %v3321_v21 = vpop.f32.mrb[34].mxu0  ;;  %v3431_v47 = vpop.f32.mrb[33].mxu1 }
 0x145   : > { %v3322_v3 = vpop.f32.mrb[35].mxu0  ;;  %v4918_v17 = vadd.f32 %v3431_v47, %v3430_v56  ;;  %v3433_v22 = vpop.f32.mrb[34].mxu1 }
 0x146   : > { %v3323_v54 = vadd.f32 %v3322_v3, %v3321_v21  ;;  %v3434_v19 = vpop.f32.mrb[35].mxu1 }
 0x147   : > { %2229 = vmatmul.mubr.bf16.gmra.mrb[140].mxu0 %v4071_v2  ;;  %v4921_v10 = vadd.f32 %v3434_v19, %v3433_v22 }
 0x149   : > { %3803 = vmatmul.mubr.bf16.gmra.mrb[12].mxu1 %v4071_v2 }
 0x14a   : > { %v3324_v1 = vpop.f32.mrb[36].mxu0 }
 0x14b   : > { %v3325_v60 = vpop.f32.mrb[37].mxu0  ;;  %v3436_v7 = vpop.f32.mrb[36].mxu1 }
 0x14c   : > { %v3326_v63 = vadd.f32 %v3325_v60, %v3324_v1  ;;  %v3327_v48 = vpop.f32.mrb[38].mxu0  ;;  %v3437_v14 = vpop.f32.mrb[37].mxu1 }
 0x14d   : > { %v3328_v44 = vpop.f32.mrb[39].mxu0  ;;  %v4924_v30 = vadd.f32 %v3437_v14, %v3436_v7  ;;  %v3439_v37 = vpop.f32.mrb[38].mxu1 }
 0x14e   : > { %v3329_v32 = vadd.f32 %v3328_v44, %v3327_v48  ;;  %v3440_v53 = vpop.f32.mrb[39].mxu1 }
 0x14f   : > { %v4926_v6 = vadd.f32 %v3440_v53, %v3439_v37 }
 0x152   : > { %v3330_v41 = vpop.f32.mrb[40].mxu0 }
 0x153   : > { %v3331_v8 = vpop.f32.mrb[41].mxu0  ;;  %v3442_v31 = vpop.f32.mrb[40].mxu1 }
 0x154   : > { %v3332_v33 = vadd.f32 %v3331_v8, %v3330_v41  ;;  %v3333_v12 = vpop.f32.mrb[42].mxu0  ;;  %v3443_v2 = vpop.f32.mrb[41].mxu1 }
 0x155   : > { %v3334_v34 = vpop.f32.mrb[43].mxu0  ;;  %v4928_v36 = vadd.f32 %v3443_v2, %v3442_v31  ;;  %v3445_v5 = vpop.f32.mrb[42].mxu1 }
 0x156   : > { %v3335_v11 = vadd.f32 %v3334_v34, %v3333_v12  ;;  %v3446_v55 = vpop.f32.mrb[43].mxu1 }
 0x157   : > { %v4930_v51 = vadd.f32 %v3446_v55, %v3445_v5 }
 0x15a   : > { %v3336_v58 = vpop.f32.mrb[44].mxu0 }
 0x15b   : > { %v3337_v0 = vpop.f32.mrb[45].mxu0  ;;  %v3448_v24 = vpop.f32.mrb[44].mxu1 }
 0x15c   : > { %v3338_v61 = vadd.f32 %v3337_v0, %v3336_v58  ;;  %v3339_v43 = vpop.f32.mrb[46].mxu0  ;;  %v3449_v16 = vpop.f32.mrb[45].mxu1 }
 0x15d   : > { %v3340_v56 = vpop.f32.mrb[47].mxu0  ;;  %v4932_v21 = vadd.f32 %v3449_v16, %v3448_v24  ;;  %v3451_v47 = vpop.f32.mrb[46].mxu1 }
 0x15e   : > { %v3341_v3 = vadd.f32 %v3340_v56, %v3339_v43  ;;  %v3452_v22 = vpop.f32.mrb[47].mxu1 }
 0x15f   : > { %v4934_v19 = vadd.f32 %v3452_v22, %v3451_v47 }
 0x162   : > { %v3342_v1 = vpop.f32.mrb[48].mxu0 }
 0x163   : > { %v3343_v60 = vpop.f32.mrb[49].mxu0  ;;  %v3454_v7 = vpop.f32.mrb[48].mxu1 }
 0x164   : > { %v4936_v48 = vadd.f32 %v3343_v60, %v3342_v1  ;;  %v3345_v14 = vpop.f32.mrb[50].mxu0  ;;  %v3455_v44 = vpop.f32.mrb[49].mxu1 }
 0x165   : > { %v3346_v37 = vpop.f32.mrb[51].mxu0  ;;  %v3456_v53 = vadd.f32 %v3455_v44, %v3454_v7  ;;  %v3457_v41 = vpop.f32.mrb[50].mxu1 }
 0x166   : > { %v4938_v8 = vadd.f32 %v3346_v37, %v3345_v14  ;;  %v3458_v31 = vpop.f32.mrb[51].mxu1 }
 0x167   : > { %v4940_v12 = vadd.f32 %v3456_v53, %v3320_v42  ;;  %v3459_v2 = vadd.f32 %v3458_v31, %v3457_v41 }
 0x169   : > { %v4942_v34 = vadd.f32 %v3459_v2, %v3323_v54 }
 0x16a   : > { %v3348_v5 = vpop.f32.mrb[52].mxu0 }
 0x16b   : > { %v3349_v55 = vpop.f32.mrb[53].mxu0  ;;  %v3460_v58 = vpop.f32.mrb[52].mxu1 }
 0x16c   : > { %v4944_v0 = vadd.f32 %v3349_v55, %v3348_v5  ;;  %v3351_v24 = vpop.f32.mrb[54].mxu0  ;;  %v3461_v43 = vpop.f32.mrb[53].mxu1 }
 0x16d   : > { %v3352_v16 = vpop.f32.mrb[55].mxu0  ;;  %v3462_v56 = vadd.f32 %v3461_v43, %v3460_v58  ;;  %v3463_v47 = vpop.f32.mrb[54].mxu1 }
 0x16e   : > { %v4946_v22 = vadd.f32 %v3352_v16, %v3351_v24  ;;  %v3464_v1 = vpop.f32.mrb[55].mxu1 }
 0x16f   : > { %v4948_v60 = vadd.f32 %v3462_v56, %v3326_v63  ;;  %v3465_v42 = vadd.f32 %v3464_v1, %v3463_v47 }
 0x171   : > { %v4950_v7 = vadd.f32 %v3465_v42, %v3329_v32 }
 0x172   : > { %v3354_v54 = vpop.f32.mrb[56].mxu0 }
 0x173   : > { %5183 = vst [vmem:[#allocation4_spill] sm:$0xff] %v4950_v7  ;;  %v3355_v14 = vpop.f32.mrb[57].mxu0  ;;  %v3466_v44 = vpop.f32.mrb[56].mxu1 }
 0x174   : > { %v4952_v37 = vadd.f32 %v3355_v14, %v3354_v54  ;;  %v3357_v53 = vpop.f32.mrb[58].mxu0  ;;  %v3467_v41 = vpop.f32.mrb[57].mxu1 }
 0x175   : > { %v3358_v31 = vpop.f32.mrb[59].mxu0  ;;  %v3468_v2 = vadd.f32 %v3467_v41, %v3466_v44  ;;  %v3469_v5 = vpop.f32.mrb[58].mxu1 }
 0x176   : > { %v4954_v55 = vadd.f32 %v3358_v31, %v3357_v53  ;;  %v3470_v58 = vpop.f32.mrb[59].mxu1 }
 0x177   : > { %v4956_v24 = vadd.f32 %v3468_v2, %v3332_v33  ;;  %v3471_v63 = vadd.f32 %v3470_v58, %v3469_v5 }
 0x179   : > { %v4958_v43 = vadd.f32 %v3471_v63, %v3335_v11 }
 0x17a   : > { %v3360_v32 = vpop.f32.mrb[60].mxu0 }
 0x17b   : > { %v3361_v16 = vpop.f32.mrb[61].mxu0  ;;  %v3472_v56 = vpop.f32.mrb[60].mxu1 }
 0x17c   : > { %v4960_v47 = vadd.f32 %v3361_v16, %v3360_v32  ;;  %v3363_v1 = vpop.f32.mrb[62].mxu0  ;;  %v3473_v42 = vpop.f32.mrb[61].mxu1 }
 0x17d   : > { %v3364_v54 = vpop.f32.mrb[63].mxu0  ;;  %v3474_v14 = vadd.f32 %v3473_v42, %v3472_v56  ;;  %v3475_v7 = vpop.f32.mrb[62].mxu1 }
 0x17e   : > { %v4962_v44 = vadd.f32 %v3364_v54, %v3363_v1  ;;  %v3476_v53 = vpop.f32.mrb[63].mxu1 }
 0x17f   : > { %v4964_v41 = vadd.f32 %v3474_v14, %v3338_v61  ;;  %v3477_v33 = vadd.f32 %v3476_v53, %v3475_v7 }
 0x181   : > { %v4966_v31 = vadd.f32 %v3477_v33, %v3341_v3 }
 0x182   : > { %v3680_v11 = vpop.f32.mrb[64].mxu0 }
 0x183   : > { %v1025_v2 = vadd.f32 %v3680_v11, %v4846_v23  ;;  %v1016_v5 = vpop.f32.mrb[65].mxu0 }
 0x184   : > { %v3478_v58 = vpop.f32.mrb[64].mxu1  ;;  %v1017_v63 = vadd.f32 %v4834_v59, %v1016_v5  ;;  %v3681_v32 = vpop.f32.mrb[66].mxu0 }
 0x185   : > { %v4971_v16 = vadd.f32 %v4884_v9, %v1025_v2  ;;  %v3479_v56 = vpop.f32.mrb[65].mxu1  ;;  %v1028_v1 = vadd.f32 %v3681_v32, %v4848_v38  ;;  %v1019_v42 = vpop.f32.mrb[67].mxu0 }
 0x186   : > { %v4975_v61 = vadd.f32 %v4872_v45, %v1017_v63  ;;  %v3480_v3 = vadd.f32 %v3479_v56, %v3478_v58  ;;  %v3481_v7 = vpop.f32.mrb[66].mxu1  ;;  %v1020_v54 = vadd.f32 %v4836_v35, %v1019_v42 }
 0x187   : > { %v4979_v23 = vadd.f32 %v4889_v39, %v1028_v1  ;;  %v3482_v14 = vpop.f32.mrb[67].mxu1 }
 0x188   : > { %v4982_v59 = vadd.f32 %v3480_v3, %v4936_v48  ;;  %v4985_v9 = vadd.f32 %v4877_v52, %v1020_v54  ;;  %v3483_v53 = vadd.f32 %v3482_v14, %v3481_v7 }
 0x18a   : > { %v4988_v38 = vadd.f32 %v3483_v53, %v4938_v8  ;;  %v3684_v45 = vpop.f32.mrb[68].mxu0 }
 0x18b   : > { %v1041_v33 = vadd.f32 %v3684_v45, %v4862_v27  ;;  %v1032_v11 = vpop.f32.mrb[69].mxu0 }
 0x18c   : > { %v3484_v2 = vpop.f32.mrb[68].mxu1  ;;  %v1033_v35 = vadd.f32 %v4854_v28, %v1032_v11  ;;  %v3685_v39 = vpop.f32.mrb[70].mxu0 }
 0x18d   : > { %v4993_v5 = vadd.f32 %v4908_v46, %v1041_v33  ;;  %v3485_v48 = vpop.f32.mrb[69].mxu1  ;;  %v1044_v58 = vadd.f32 %v3685_v39, %v4864_v50  ;;  %v1035_v52 = vpop.f32.mrb[71].mxu0 }
 0x18e   : > { %v4997_v63 = vadd.f32 %v4896_v57, %v1033_v35  ;;  %v3486_v8 = vadd.f32 %v3485_v48, %v3484_v2  ;;  %v3487_v32 = vpop.f32.mrb[70].mxu1  ;;  %v1036_v56 = vadd.f32 %v4856_v13, %v1035_v52 }
 0x18f   : > { %v5001_v27 = vadd.f32 %v4913_v20, %v1044_v58  ;;  %v3488_v1 = vpop.f32.mrb[71].mxu1 }
 0x190   : > { %v5004_v28 = vadd.f32 %v3486_v8, %v4944_v0  ;;  %v5007_v46 = vadd.f32 %v4901_v40, %v1036_v56  ;;  %v3489_v42 = vadd.f32 %v3488_v1, %v3487_v32 }
 0x192   : > { %v5010_v50 = vadd.f32 %v3489_v42, %v4946_v22  ;;  %v3688_v57 = vpop.f32.mrb[72].mxu0 }
 0x193   : > { %v1057_v3 = vadd.f32 %v3688_v57, %v4882_v15  ;;  %v1048_v7 = vpop.f32.mrb[73].mxu0 }
 0x194   : > { %v3490_v54 = vpop.f32.mrb[72].mxu1  ;;  %v1049_v13 = vadd.f32 %v4870_v49, %v1048_v7  ;;  %v3689_v20 = vpop.f32.mrb[74].mxu0 }
 0x195   : > { %v5015_v14 = vadd.f32 %v4924_v30, %v1057_v3  ;;  %v3491_v0 = vpop.f32.mrb[73].mxu1  ;;  %v1060_v53 = vadd.f32 %v3689_v20, %v4886_v4  ;;  %v1051_v40 = vpop.f32.mrb[75].mxu0 }
 0x196   : > { %v5019_v45 = vadd.f32 %v4918_v17, %v1049_v13  ;;  %v3492_v22 = vadd.f32 %v3491_v0, %v3490_v54  ;;  %v3493_v33 = vpop.f32.mrb[74].mxu1  ;;  %v1052_v11 = vadd.f32 %v4874_v25, %v1051_v40 }
 0x197   : > { %v5023_v15 = vadd.f32 %v4926_v6, %v1060_v53  ;;  %v3494_v2 = vpop.f32.mrb[75].mxu1 }
 0x198   : > { %v5026_v49 = vadd.f32 %v3492_v22, %v4952_v37  ;;  %v3867_v30 = vadd.f32 %v4921_v10, %v1052_v11  ;;  %v3495_v35 = vadd.f32 %v3494_v2, %v3493_v33 }
 0x19a   : > { %v5030_v4 = vadd.f32 %v3495_v35, %v4954_v55  ;;  %v3692_v39 = vpop.f32.mrb[76].mxu0 }
 0x19b   : > { %v1073_v17 = vadd.f32 %v3692_v39, %v4906_v26  ;;  %v1064_v48 = vpop.f32.mrb[77].mxu0 }
 0x19c   : > { %v3496_v58 = vpop.f32.mrb[76].mxu1  ;;  %v1065_v25 = vadd.f32 %v4894_v29, %v1064_v48  ;;  %v3693_v52 = vpop.f32.mrb[78].mxu0 }
 0x19d   : > { %v5035_v6 = vadd.f32 %v4932_v21, %v1073_v17  ;;  %v3497_v8 = vpop.f32.mrb[77].mxu1  ;;  %v1076_v37 = vadd.f32 %v3693_v52, %v4910_v62  ;;  %v1067_v32 = vpop.f32.mrb[79].mxu0 }
 0x19e   : > { %v5039_v10 = vadd.f32 %v4928_v36, %v1065_v25  ;;  %v3498_v55 = vadd.f32 %v3497_v8, %v3496_v58  ;;  %v3499_v56 = vpop.f32.mrb[78].mxu1  ;;  %v1068_v1 = vadd.f32 %v4898_v18, %v1067_v32 }
 0x19f   : > { %v5043_v26 = vadd.f32 %v4934_v19, %v1076_v37  ;;  %v3500_v42 = vpop.f32.mrb[79].mxu1 }
 0x1a0   : > { %v5046_v29 = vadd.f32 %v3498_v55, %v4960_v47  ;;  %v3883_v21 = vadd.f32 %v4930_v51, %v1068_v1  ;;  %v3501_v57 = vadd.f32 %v3500_v42, %v3499_v56 }
 0x1a2   : > { %v5050_v62 = vadd.f32 %v3501_v57, %v4962_v44  ;;  %v3542_v3 = vpop.f32.mrb[80].mxu0 }
 0x1a3   : > { %v3543_v36 = vpop.f32.mrb[81].mxu0 }
 0x1a4   : > { %v3544_v7 = vadd.f32 %v3543_v36, %v3542_v3  ;;  %v3545_v54 = vpop.f32.mrb[82].mxu0 }
 0x1a5   : > { %v3546_v13 = vpop.f32.mrb[83].mxu0 }
 0x1a6   : > { %v3547_v20 = vadd.f32 %v3546_v13, %v3545_v54  ;;  %v5053_v18 = vadd.f32 %v4975_v61, %v3544_v7 }
 0x1a8   : > { %v5056_v19 = vadd.f32 %v4985_v9, %v3547_v20 }
 0x1aa   : > { %v3548_v47 = vpop.f32.mrb[84].mxu0 }
 0x1ab   : > { %v3549_v0 = vpop.f32.mrb[85].mxu0 }
 0x1ac   : > { %v3550_v53 = vadd.f32 %v3549_v0, %v3548_v47  ;;  %v3551_v51 = vpop.f32.mrb[86].mxu0 }
 0x1ad   : > { %v3552_v40 = vpop.f32.mrb[87].mxu0 }
 0x1ae   : > { %v3553_v22 = vadd.f32 %v3552_v40, %v3551_v51  ;;  %v3824_v44 = vadd.f32 %v4971_v16, %v3550_v53 }
 0x1b0   : > { %v5060_v33 = vadd.f32 %v4979_v23, %v3553_v22 }
 0x1b2   : > { %v3554_v11 = vpop.f32.mrb[88].mxu0 }
 0x1b3   : > { %v3555_v2 = vpop.f32.mrb[89].mxu0 }
 0x1b4   : > { %v3556_v35 = vadd.f32 %v3555_v2, %v3554_v11  ;;  %v3557_v39 = vpop.f32.mrb[90].mxu0 }
 0x1b5   : > { %v3558_v61 = vpop.f32.mrb[91].mxu0 }
 0x1b6   : > { %v3559_v17 = vadd.f32 %v3558_v61, %v3557_v39  ;;  %v5063_v9 = vadd.f32 %v4997_v63, %v3556_v35 }
 0x1b8   : > { %v5066_v48 = vadd.f32 %v5007_v46, %v3559_v17 }
 0x1ba   : > { %v3560_v58 = vpop.f32.mrb[92].mxu0 }
 0x1bb   : > { %v3561_v25 = vpop.f32.mrb[93].mxu0 }
 0x1bc   : > { %v3562_v52 = vadd.f32 %v3561_v25, %v3560_v58  ;;  %v3563_v8 = vpop.f32.mrb[94].mxu0 }
 0x1bd   : > { %v3564_v16 = vpop.f32.mrb[95].mxu0 }
 0x1be   : > { %v3565_v37 = vadd.f32 %v3564_v16, %v3563_v8  ;;  %v5069_v23 = vadd.f32 %v4993_v5, %v3562_v52 }
 0x1c0   : > { %v5072_v32 = vadd.f32 %v5001_v27, %v3565_v37 }
 0x1c2   : > { %v3566_v55 = vpop.f32.mrb[96].mxu0 }
 0x1c3   : > { %v3567_v56 = vpop.f32.mrb[97].mxu0 }
 0x1c4   : > { %v3568_v1 = vadd.f32 %v3567_v56, %v3566_v55  ;;  %v3569_v63 = vpop.f32.mrb[98].mxu0 }
 0x1c5   : > { %v3570_v42 = vpop.f32.mrb[99].mxu0 }
 0x1c6   : > { %v3571_v57 = vadd.f32 %v3570_v42, %v3569_v63  ;;  %v5075_v46 = vadd.f32 %v5019_v45, %v3568_v1 }
 0x1c8   : > { %v5077_v3 = vadd.f32 %v3867_v30, %v3571_v57 }
 0x1ca   : > { %v3572_v36 = vpop.f32.mrb[100].mxu0 }
 0x1cb   : > { %v3573_v7 = vpop.f32.mrb[101].mxu0 }
 0x1cc   : > { %v3574_v54 = vadd.f32 %v3573_v7, %v3572_v36  ;;  %v3575_v5 = vpop.f32.mrb[102].mxu0 }
 0x1cd   : > { %v3576_v13 = vpop.f32.mrb[103].mxu0 }
 0x1ce   : > { %v3577_v20 = vadd.f32 %v3576_v13, %v3575_v5  ;;  %v5080_v27 = vadd.f32 %v5015_v14, %v3574_v54 }
 0x1d0   : > { %v5083_v47 = vadd.f32 %v5023_v15, %v3577_v20 }
 0x1d2   : > { %v3578_v0 = vpop.f32.mrb[104].mxu0 }
 0x1d3   : > { %v3579_v53 = vpop.f32.mrb[105].mxu0 }
 0x1d4   : > { %v3580_v51 = vadd.f32 %v3579_v53, %v3578_v0  ;;  %v3581_v45 = vpop.f32.mrb[106].mxu0 }
 0x1d5   : > { %v3582_v40 = vpop.f32.mrb[107].mxu0 }
 0x1d6   : > { %v3583_v30 = vadd.f32 %v3582_v40, %v3581_v45  ;;  %v5086_v22 = vadd.f32 %v5039_v10, %v3580_v51 }
 0x1d8   : > { %v5088_v11 = vadd.f32 %v3883_v21, %v3583_v30 }
 0x1da   : > { %v3584_v2 = vpop.f32.mrb[108].mxu0 }
 0x1db   : > { %v3585_v35 = vpop.f32.mrb[109].mxu0 }
 0x1dc   : > { %v3586_v39 = vadd.f32 %v3585_v35, %v3584_v2  ;;  %v3587_v14 = vpop.f32.mrb[110].mxu0 }
 0x1dd   : > { %v3588_v61 = vpop.f32.mrb[111].mxu0 }
 0x1de   : > { %v3589_v15 = vadd.f32 %v3588_v61, %v3587_v14  ;;  %v5092_v17 = vadd.f32 %v5035_v6, %v3586_v39 }
 0x1e0   : > { %v5095_v58 = vadd.f32 %v5043_v26, %v3589_v15 }
 0x1e2   : > { %v3590_v25 = vpop.f32.mrb[112].mxu0 }
 0x1e3   : > { %v3591_v10 = vpop.f32.mrb[113].mxu0 }
 0x1e4   : > { %v3776_v52 = vpop.f32.mrb[80].mxu1  ;;  %v3592_v21 = vadd.f32 %v3591_v10, %v3590_v25  ;;  %v3593_v8 = vpop.f32.mrb[114].mxu0 }
 0x1e5   : > { %v3825_v16 = vadd.f32 %v3824_v44, %v3776_v52  ;;  %v2271_v37 = vpop.f32.mrb[81].mxu1  ;;  %v3594_v55 = vpop.f32.mrb[115].mxu0 }
 0x1e6   : > { %v3829_v56 = vadd.f32 %v5053_v18, %v2271_v37  ;;  %v3777_v1 = vpop.f32.mrb[82].mxu1  ;;  %v3595_v63 = vadd.f32 %v3594_v55, %v3593_v8  ;;  %v5099_v6 = vadd.f32 %v4940_v12, %v3592_v21  ;;  %v5184_v37 = vld [vmem:[#allocation4_spill] sm:$0xff] }
 0x1e7   : > { %v3833_v26 = vadd.f32 %v5060_v33, %v3777_v1  ;;  %v2274_v42 = vpop.f32.mrb[83].mxu1  ;;  %v2757_v13 = vmul.f32 %v3825_v16, %v3825_v16 }
 0x1e8   : > { %v3837_v44 = vadd.f32 %v5056_v19, %v2274_v42  ;;  %v5109_v57 = vadd.f32 %v4942_v34, %v3595_v63  ;;  %v2755_v36 = vmul.f32 %v3829_v56, %v3829_v56 }
 0x1e9   : > { %v3167_v18 = vpack.c.bf16 %v3833_v26, %v3825_v16  ;;  %v2758_v40 = vmul.f32 %v3833_v26, %v3833_v26 }
 0x1ea   : > { %v3162_v7 = vpack.c.bf16 %v3837_v44, %v3829_v56  ;;  %v2718_v12 = vadd.f32 %v3837_v44, %v3829_v56  ;;  %v2756_v54 = vmul.f32 %v3837_v44, %v3837_v44  ;;  %v3596_v5 = vpop.f32.mrb[116].mxu0 }
 0x1eb   : > { %3239 = vst [vmem:[%s5105_s23 + $0x8] sm:$0xff] %v3167_v18   ;;  %v3597_v33 = vpop.f32.mrb[117].mxu0 }
 0x1ec   : > { %3163 = vst [vmem:[%s5105_s23] sm:$0xff] %v3162_v7   ;;  %v2719_v20 = vadd.f32 %v3825_v16, %v2718_v12  ;;  %v2787_v0 = vadd.f32 %v2756_v54, %v2755_v36  ;;  %v3780_v53 = vpop.f32.mrb[84].mxu1  ;;  %v3598_v51 = vadd.f32 %v3597_v33, %v3596_v5  ;;  %v3599_v45 = vpop.f32.mrb[118].mxu0 }
 0x1ed   : > { %v3841_v19 = vadd.f32 %v5069_v23, %v3780_v53  ;;  %v2287_v34 = vpop.f32.mrb[85].mxu1  ;;  %v3600_v30 = vpop.f32.mrb[119].mxu0 }
 0x1ee   : > { %v2788_v2 = vadd.f32 %v2787_v0, %v2757_v13  ;;  %v3845_v35 = vadd.f32 %v5063_v9, %v2287_v34  ;;  %v2720_v39 = vadd.f32 %v3833_v26, %v2719_v20  ;;  %v3781_v14 = vpop.f32.mrb[86].mxu1  ;;  %v3601_v61 = vadd.f32 %v3600_v30, %v3599_v45 }
 0x1ef   : > { %v3849_v15 = vadd.f32 %v5072_v32, %v3781_v14  ;;  %v2290_v25 = vpop.f32.mrb[87].mxu1  ;;  %v5117_v10 = vadd.f32 %v4948_v60, %v3598_v51  ;;  %v2761_v42 = vmul.f32 %v3841_v19, %v3841_v19 }
 0x1f0   : > { %v2721_v52 = vadd.f32 %v3845_v35, %v2720_v39  ;;  %v2759_v21 = vmul.f32 %v3845_v35, %v3845_v35  ;;  %v2789_v8 = vadd.f32 %v2788_v2, %v2758_v40  ;;  %v3853_v23 = vadd.f32 %v5066_v48, %v2290_v25 }
 0x1f1   : > { %v3177_v16 = vpack.c.bf16 %v3849_v15, %v3841_v19  ;;  %v5121_v55 = vadd.f32 %v5184_v37, %v3601_v61  ;;  %v2762_v12 = vmul.f32 %v3849_v15, %v3849_v15 }
 0x1f2   : > { %v2790_v9 = vadd.f32 %v2789_v8, %v2759_v21  ;;  %v3172_v56 = vpack.c.bf16 %v3853_v23, %v3845_v35  ;;  %v2722_v1 = vadd.f32 %v3853_v23, %v2721_v52  ;;  %v2760_v63 = vmul.f32 %v3853_v23, %v3853_v23  ;;  %v3602_v26 = vpop.f32.mrb[120].mxu0 }
 0x1f3   : > { %3241 = vst [vmem:[%s5105_s23 + $0x18] sm:$0xff] %v3177_v16   ;;  %v3603_v32 = vpop.f32.mrb[121].mxu0 }
 0x1f4   : > { %3240 = vst [vmem:[%s5105_s23 + $0x10] sm:$0xff] %v3172_v56   ;;  %v2723_v60 = vadd.f32 %v3841_v19, %v2722_v1  ;;  %v2791_v44 = vadd.f32 %v2790_v9, %v2760_v63  ;;  %v3784_v18 = vpop.f32.mrb[88].mxu1  ;;  %v3604_v36 = vadd.f32 %v3603_v32, %v3602_v26  ;;  %v3605_v7 = vpop.f32.mrb[122].mxu0 }
 0x1f5   : > { %v3857_v48 = vadd.f32 %v5080_v27, %v3784_v18  ;;  %v2303_v54 = vpop.f32.mrb[89].mxu1  ;;  %v3606_v5 = vpop.f32.mrb[123].mxu0 }
 0x1f6   : > { %v2792_v33 = vadd.f32 %v2791_v44, %v2761_v42  ;;  %v3861_v13 = vadd.f32 %v5075_v46, %v2303_v54  ;;  %v2724_v20 = vadd.f32 %v3849_v15, %v2723_v60  ;;  %v3785_v0 = vpop.f32.mrb[90].mxu1  ;;  %v3607_v53 = vadd.f32 %v3606_v5, %v3605_v7 }
 0x1f7   : > { %v3865_v51 = vadd.f32 %v5083_v47, %v3785_v0  ;;  %v2306_v45 = vpop.f32.mrb[91].mxu1  ;;  %v5129_v40 = vadd.f32 %v4956_v24, %v3604_v36  ;;  %v2765_v25 = vmul.f32 %v3857_v48, %v3857_v48 }
 0x1f8   : > { %v2725_v19 = vadd.f32 %v3861_v13, %v2724_v20  ;;  %v2763_v34 = vmul.f32 %v3861_v13, %v3861_v13  ;;  %v2793_v30 = vadd.f32 %v2792_v33, %v2762_v12  ;;  %v3869_v27 = vadd.f32 %v5077_v3, %v2306_v45 }
 0x1f9   : > { %v3187_v2 = vpack.c.bf16 %v3865_v51, %v3857_v48  ;;  %v5133_v35 = vadd.f32 %v4958_v43, %v3607_v53  ;;  %v2766_v16 = vmul.f32 %v3865_v51, %v3865_v51 }
 0x1fa   : > { %v2794_v46 = vadd.f32 %v2793_v30, %v2763_v34  ;;  %v3182_v39 = vpack.c.bf16 %v3869_v27, %v3861_v13  ;;  %v2726_v14 = vadd.f32 %v3869_v27, %v2725_v19  ;;  %v2764_v61 = vmul.f32 %v3869_v27, %v3869_v27  ;;  %v3608_v15 = vpop.f32.mrb[124].mxu0 }
 0x1fb   : > { %3243 = vst [vmem:[%s5105_s23 + $0x28] sm:$0xff] %v3187_v2   ;;  %v3609_v47 = vpop.f32.mrb[125].mxu0 }
 0x1fc   : > { %3242 = vst [vmem:[%s5105_s23 + $0x20] sm:$0xff] %v3182_v39   ;;  %v2727_v24 = vadd.f32 %v3857_v48, %v2726_v14  ;;  %v2795_v52 = vadd.f32 %v2794_v46, %v2764_v61  ;;  %v3788_v21 = vpop.f32.mrb[92].mxu1  ;;  %v3610_v8 = vadd.f32 %v3609_v47, %v3608_v15  ;;  %v3611_v23 = vpop.f32.mrb[126].mxu0 }
 0x1fd   : > { %v3873_v3 = vadd.f32 %v5092_v17, %v3788_v21  ;;  %v2319_v37 = vpop.f32.mrb[93].mxu1  ;;  %v3612_v43 = vpop.f32.mrb[127].mxu0 }
 0x1fe   : > { %v2796_v9 = vadd.f32 %v2795_v52, %v2765_v25  ;;  %v3877_v56 = vadd.f32 %v5086_v22, %v2319_v37  ;;  %v2728_v1 = vadd.f32 %v3865_v51, %v2727_v24  ;;  %v3789_v63 = vpop.f32.mrb[94].mxu1  ;;  %v3613_v26 = vadd.f32 %v3612_v43, %v3611_v23 }
 0x1ff   : > { %v3881_v32 = vadd.f32 %v5095_v58, %v3789_v63  ;;  %v2322_v42 = vpop.f32.mrb[95].mxu1  ;;  %v3899_v60 = vadd.f32 %v4964_v41, %v3610_v8  ;;  %v2769_v58 = vmul.f32 %v3873_v3, %v3873_v3 }
 0x200   : > { %v2729_v44 = vadd.f32 %v3877_v56, %v2728_v1  ;;  %v2767_v18 = vmul.f32 %v3877_v56, %v3877_v56  ;;  %v2797_v36 = vadd.f32 %v2796_v9, %v2766_v16  ;;  %v3885_v17 = vadd.f32 %v5088_v11, %v2322_v42 }
 0x201   : > { %v3197_v7 = vpack.c.bf16 %v3881_v32, %v3873_v3  ;;  %v3905_v12 = vadd.f32 %v4966_v31, %v3613_v26  ;;  %v2770_v45 = vmul.f32 %v3881_v32, %v3881_v32 }
 0x202   : > { %v2798_v48 = vadd.f32 %v2797_v36, %v2767_v18  ;;  %v3192_v22 = vpack.c.bf16 %v3885_v17, %v3877_v56  ;;  %v2730_v54 = vadd.f32 %v3885_v17, %v2729_v44  ;;  %v2768_v5 = vmul.f32 %v3885_v17, %v3885_v17  ;;  %v3614_v33 = vpop.f32.mrb[128].mxu0 }
 0x203   : > { %3245 = vst [vmem:[%s5105_s23 + $0x38] sm:$0xff] %v3197_v7   ;;  %v3615_v13 = vpop.f32.mrb[129].mxu0 }
 0x204   : > { %3244 = vst [vmem:[%s5105_s23 + $0x30] sm:$0xff] %v3192_v22   ;;  %v2731_v20 = vadd.f32 %v3873_v3, %v2730_v54  ;;  %v2799_v0 = vadd.f32 %v2798_v48, %v2768_v5  ;;  %v3792_v41 = vpop.f32.mrb[0].mxu1  ;;  %v3616_v53 = vadd.f32 %v3615_v13, %v3614_v33  ;;  %v3617_v51 = vpop.f32.mrb[130].mxu0 }
 0x205   : > { %v3888_v11 = vadd.f32 %v5117_v10, %v3792_v41  ;;  %v2335_v19 = vpop.f32.mrb[1].mxu1  ;;  %v3618_v34 = vpop.f32.mrb[131].mxu0 }
 0x206   : > { %v2800_v31 = vadd.f32 %v2799_v0, %v2769_v58  ;;  %v3891_v30 = vadd.f32 %v5099_v6, %v2335_v19  ;;  %v2732_v27 = vadd.f32 %v3881_v32, %v2731_v20  ;;  %v3793_v2 = vpop.f32.mrb[2].mxu1  ;;  %v3619_v46 = vadd.f32 %v3618_v34, %v3617_v51 }
 0x207   : > { %v3894_v39 = vadd.f32 %v5121_v55, %v3793_v2  ;;  %v2338_v14 = vpop.f32.mrb[3].mxu1  ;;  %v3914_v61 = vadd.f32 %v4982_v59, %v3616_v53  ;;  %v2773_v55 = vmul.f32 %v3888_v11, %v3888_v11 }
 0x208   : > { %v2733_v15 = vadd.f32 %v3891_v30, %v2732_v27  ;;  %v2771_v47 = vmul.f32 %v3891_v30, %v3891_v30  ;;  %v2801_v25 = vadd.f32 %v2800_v31, %v2770_v45  ;;  %v3897_v10 = vadd.f32 %v5109_v57, %v2338_v14 }
 0x209   : > { %v3207_v24 = vpack.c.bf16 %v3894_v39, %v3888_v11  ;;  %v3920_v52 = vadd.f32 %v4988_v38, %v3619_v46  ;;  %v2774_v1 = vmul.f32 %v3894_v39, %v3894_v39 }
 0x20a   : > { %v2802_v21 = vadd.f32 %v2801_v25, %v2771_v47  ;;  %v3202_v6 = vpack.c.bf16 %v3897_v10, %v3891_v30  ;;  %v2734_v8 = vadd.f32 %v3897_v10, %v2733_v15  ;;  %v2772_v23 = vmul.f32 %v3897_v10, %v3897_v10  ;;  %v3620_v16 = vpop.f32.mrb[132].mxu0 }
 0x20b   : > { %3247 = vst [vmem:[%s5105_s23 + $0x48] sm:$0xff] %v3207_v24   ;;  %v3621_v3 = vpop.f32.mrb[133].mxu0 }
 0x20c   : > { %3246 = vst [vmem:[%s5105_s23 + $0x40] sm:$0xff] %v3202_v6   ;;  %v2735_v37 = vadd.f32 %v3888_v11, %v2734_v8  ;;  %v2803_v43 = vadd.f32 %v2802_v21, %v2772_v23  ;;  %v3796_v59 = vpop.f32.mrb[4].mxu1  ;;  %v3622_v9 = vadd.f32 %v3621_v3, %v3620_v16  ;;  %v3623_v56 = vpop.f32.mrb[134].mxu0 }
 0x20d   : > { %v3900_v63 = vadd.f32 %v3899_v60, %v3796_v59  ;;  %v2351_v57 = vpop.f32.mrb[5].mxu1  ;;  %v3624_v26 = vpop.f32.mrb[135].mxu0 }
 0x20e   : > { %v2804_v32 = vadd.f32 %v2803_v43, %v2773_v55  ;;  %v3903_v38 = vadd.f32 %v5129_v40, %v2351_v57  ;;  %v2736_v42 = vadd.f32 %v3894_v39, %v2735_v37  ;;  %v3797_v44 = vpop.f32.mrb[6].mxu1  ;;  %v3625_v18 = vadd.f32 %v3624_v26, %v3623_v56 }
 0x20f   : > { %v3906_v36 = vadd.f32 %v3905_v12, %v3797_v44  ;;  %v2354_v17 = vpop.f32.mrb[7].mxu1  ;;  %v3911_v7 = vadd.f32 %v5004_v28, %v3622_v9  ;;  %v2777_v12 = vmul.f32 %v3900_v63, %v3900_v63 }
 0x210   : > { %v2737_v48 = vadd.f32 %v3903_v38, %v2736_v42  ;;  %v2775_v22 = vmul.f32 %v3903_v38, %v3903_v38  ;;  %v2805_v54 = vadd.f32 %v2804_v32, %v2774_v1  ;;  %v3909_v5 = vadd.f32 %v5133_v35, %v2354_v17 }
 0x211   : > { %v3217_v60 = vpack.c.bf16 %v3906_v36, %v3900_v63  ;;  %v3917_v33 = vadd.f32 %v5010_v50, %v3625_v18  ;;  %v2778_v19 = vmul.f32 %v3906_v36, %v3906_v36 }
 0x212   : > { %v2806_v13 = vadd.f32 %v2805_v54, %v2775_v22  ;;  %v3212_v58 = vpack.c.bf16 %v3909_v5, %v3903_v38  ;;  %v2738_v40 = vadd.f32 %v3909_v5, %v2737_v48  ;;  %v2776_v20 = vmul.f32 %v3909_v5, %v3909_v5  ;;  %v3626_v0 = vpop.f32.mrb[136].mxu0 }
 0x213   : > { %3249 = vst [vmem:[%s5105_s23 + $0x58] sm:$0xff] %v3217_v60   ;;  %v3627_v41 = vpop.f32.mrb[137].mxu0 }
 0x214   : > { %3248 = vst [vmem:[%s5105_s23 + $0x50] sm:$0xff] %v3212_v58   ;;  %v2739_v53 = vadd.f32 %v3900_v63, %v2738_v40  ;;  %v2807_v51 = vadd.f32 %v2806_v13, %v2776_v20  ;;  %v3800_v28 = vpop.f32.mrb[8].mxu1  ;;  %v3628_v45 = vadd.f32 %v3627_v41, %v3626_v0  ;;  %v3629_v11 = vpop.f32.mrb[138].mxu0 }
 0x215   : > { %v3912_v34 = vadd.f32 %v3911_v7, %v3800_v28  ;;  %v2367_v35 = vpop.f32.mrb[9].mxu1  ;;  %v3630_v31 = vpop.f32.mrb[139].mxu0 }
 0x216   : > { %v2808_v30 = vadd.f32 %v2807_v51, %v2777_v12  ;;  %v3915_v50 = vadd.f32 %v3914_v61, %v2367_v35  ;;  %v2740_v27 = vadd.f32 %v3906_v36, %v2739_v53  ;;  %v3801_v2 = vpop.f32.mrb[10].mxu1  ;;  %v3631_v46 = vadd.f32 %v3630_v31, %v3629_v11 }
 0x217   : > { %v3918_v39 = vadd.f32 %v3917_v33, %v3801_v2  ;;  %v2370_v14 = vpop.f32.mrb[11].mxu1  ;;  %v3926_v15 = vadd.f32 %v5026_v49, %v3628_v45  ;;  %v2781_v37 = vmul.f32 %v3912_v34, %v3912_v34 }
 0x218   : > { %v2741_v47 = vadd.f32 %v3915_v50, %v2740_v27  ;;  %v2779_v25 = vmul.f32 %v3915_v50, %v3915_v50  ;;  %v2809_v10 = vadd.f32 %v2808_v30, %v2778_v19  ;;  %v3921_v24 = vadd.f32 %v3920_v52, %v2370_v14 }
 0x219   : > { %v3227_v21 = vpack.c.bf16 %v3918_v39, %v3912_v34  ;;  %v3932_v6 = vadd.f32 %v5030_v4, %v3631_v46  ;;  %v2782_v1 = vmul.f32 %v3918_v39, %v3918_v39 }
 0x21a   : > { %v2810_v8 = vadd.f32 %v2809_v10, %v2779_v25  ;;  %v3222_v23 = vpack.c.bf16 %v3921_v24, %v3915_v50  ;;  %v2742_v16 = vadd.f32 %v3921_v24, %v2741_v47  ;;  %v2780_v61 = vmul.f32 %v3921_v24, %v3921_v24  ;;  %v3632_v3 = vpop.f32.mrb[140].mxu0 }
 0x21b   : > { %3251 = vst [vmem:[%s5105_s23 + $0x68] sm:$0xff] %v3227_v21   ;;  %v3633_v55 = vpop.f32.mrb[141].mxu0 }
 0x21c   : > { %3250 = vst [vmem:[%s5105_s23 + $0x60] sm:$0xff] %v3222_v23   ;;  %v2743_v43 = vadd.f32 %v3912_v34, %v2742_v16  ;;  %v2811_v59 = vadd.f32 %v2810_v8, %v2780_v61  ;;  %v3804_v9 = vpop.f32.mrb[12].mxu1  ;;  %v3634_v49 = vadd.f32 %v3633_v55, %v3632_v3  ;;  %v3635_v56 = vpop.f32.mrb[142].mxu0 }
 0x21d   : > { %v2383_v63 = vpop.f32.mrb[13].mxu1  ;;  %v3636_v52 = vpop.f32.mrb[143].mxu0 }
 0x21e   : > { %v2812_v57 = vadd.f32 %v2811_v59, %v2781_v37  ;;  %v3923_v4 = vadd.f32 %v5046_v29, %v3634_v49  ;;  %v3927_v26 = vadd.f32 %v3926_v15, %v2383_v63  ;;  %v2744_v32 = vadd.f32 %v3918_v39, %v2743_v43  ;;  %v3805_v38 = vpop.f32.mrb[14].mxu1 }
 0x21f   : > { %v3637_v42 = vadd.f32 %v3636_v52, %v3635_v56  ;;  %v2386_v44 = vpop.f32.mrb[15].mxu1 }
 0x220   : > { %v3924_v18 = vadd.f32 %v3923_v4, %v3804_v9  ;;  %v2745_v36 = vadd.f32 %v3927_v26, %v2744_v32  ;;  %v2783_v17 = vmul.f32 %v3927_v26, %v3927_v26  ;;  %v2813_v7 = vadd.f32 %v2812_v57, %v2782_v1 }
 0x221   : > { %v3929_v48 = vadd.f32 %v5050_v62, %v3637_v42  ;;  %v3933_v22 = vadd.f32 %v3932_v6, %v2386_v44 }
 0x222   : > { %v2785_v54 = vmul.f32 %v3924_v18, %v3924_v18  ;;  %v2814_v5 = vadd.f32 %v2813_v7, %v2783_v17 }
 0x223   : > { %v3930_v60 = vadd.f32 %v3929_v48, %v3805_v38  ;;  %v3232_v33 = vpack.c.bf16 %v3933_v22, %v3927_v26  ;;  %v2746_v13 = vadd.f32 %v3933_v22, %v2745_v36  ;;  %v2784_v29 = vmul.f32 %v3933_v22, %v3933_v22 }
 0x225   : > { %v3237_v58 = vpack.c.bf16 %v3930_v60, %v3924_v18  ;;  %v2786_v40 = vmul.f32 %v3930_v60, %v3930_v60  ;;  %3252 = vst [vmem:[%s5105_s23 + $0x70] sm:$0xff] %v3232_v33   ;;  %v2747_v20 = vadd.f32 %v3924_v18, %v2746_v13  ;;  %v2815_v0 = vadd.f32 %v2814_v5, %v2784_v29 }
 0x227   : > { %3253 = vst [vmem:[%s5105_s23 + $0x78] sm:$0xff] %v3237_v58   ;;  %v2748_v41 = vadd.f32 %v3930_v60, %v2747_v20  ;;  %v2816_v12 = vadd.f32 %v2815_v0, %v2785_v54 }
 0x229   : > { %v2749_v53 = vrot.slane %v2748_v41, 4  ;;  %v2817_v51 = vadd.f32 %v2816_v12, %v2786_v40 }
 0x22b   : > { %v2750_v28 = vadd.f32 %v2749_v53, %v2748_v41  ;;  %v2818_v62 = vrot.slane %v2817_v51, 4 }
 0x22d   : > { %v2751_v45 = vrot.slane %v2750_v28, 2  ;;  %v2819_v11 = vadd.f32 %v2818_v62, %v2817_v51 }
 0x22f   : > { %v2752_v19 = vadd.f32 %v2751_v45, %v2750_v28  ;;  %v2820_v34 = vrot.slane %v2819_v11, 2 }
 0x231   : > { %v2753_v35 = vrot.slane %v2752_v19, 1  ;;  %v2821_v31 = vadd.f32 %v2820_v34, %v2819_v11 }
 0x233   : > { %v2822_v30 = vrot.slane %v2821_v31, 1  ;;  %v2754_v50 = vadd.f32 %v2753_v35, %v2752_v19 }
 0x235   : > { %v2823_v27 = vadd.f32 %v2822_v30, %v2821_v31 }
 0x237   : > { %v2825_v2 = vsel %vm446_vm3, %v2754_v50, %v2823_v27 }
 0x238   : > { %2826 = vst [vmem:[%s182_s27] sm:$0x3] %v2825_v2 }
 0x239 PF: > { %s14_s12 = sadd.s32 1, %s4069_s12  }
 0x23a   : > { %p11_p5 = scmp.ge.s32.totalorder %s14_s12, 4  }
 0x23c   :  { %13 = sbr.rel (!%p11_p5) target bundleno = 1 (0x1), region = 74 }

</bundles_post_ra>
